<compile_context>
chip_gen: v5e
topology: v5e:2x2
jax: 0.10.0
libtpu: 0.0.40
codegen_flags: <defaults>
</compile_context>

<pallas_src>
import jax
import jax.numpy as jnp
import numpy as np
from jax.experimental import pallas as pl
from jax.experimental.pallas import tpu as pltpu


def make_deepfm_kernel(num_fields, emb_size):
    F = num_fields
    E = emb_size
    NT = (((1,), (1,)), ((), ()))          # contract last dims of both: lhs @ rhs.T

    def kernel(feat_ref,                    # [Bt, F]   raw feature columns (streamed)
               sel_ref, offi_ref, cmask_ref,  # [F,P] f32, [1,P] i32, [1,P] f32
               wbig_ref, bbig_ref,          # [P, F*E], [1, F*E]  fused embedding matrix
               wlin_ref,                    # [1, F]    FM linear head (row)
               w1_ref, t1_ref,              # [D, H], [1, H]  (bias+BN folded)
               w2_ref, t2_ref,              # [H, H], [1, H]
               w3_ref, t3_ref,              # [H, H], [1, H]
               w4_ref,                      # [1, H]    final deep head (row)
               bias_ref,                    # [1, 1] in SMEM: blin + b4
               out_ref):                    # [1, Bt]   lane-dense output (batch on lanes)
        feat = feat_ref[...]                                     # [Bt, F] f32
        bt = feat.shape[0]
        P = sel_ref.shape[1]
        D = wbig_ref.shape[1]

        # ---- single-pass design matrix [Bt, P] ---------------------------------
        # feat_g[b, p] = feature value of the field owning design column p.
        feat_g = jnp.dot(feat, sel_ref[...], preferred_element_type=jnp.float32)
        col = jax.lax.broadcasted_iota(jnp.int32, (bt, P), 1)
        onehot = (col == (feat_g.astype(jnp.int32) + offi_ref[...])).astype(jnp.float32)
        cmask = cmask_ref[...]                                   # 1 for continuous cols
        design = cmask * feat_g + (1.0 - cmask) * onehot         # [Bt, P]

        # ---- fused embedding lookup: design @ block embedding matrix -----------
        deep_in = jnp.dot(design.astype(wbig_ref.dtype), wbig_ref[...],
                          preferred_element_type=jnp.float32) + bbig_ref[...]  # [Bt, D]

        # ---- FM second-order term (lane-major [1, Bt] via NT dots) -------------
        s = deep_in[:, 0:E]
        for f in range(1, F):                                    # static unroll, F small
            s = s + deep_in[:, f * E:(f + 1) * E]
        ones_e = jnp.ones((1, E), jnp.float32)
        ones_d = jnp.ones((1, D), jnp.float32)
        ss = jax.lax.dot_general(ones_e, s * s, NT,
                                 preferred_element_type=jnp.float32)          # [1, Bt]
        dd = jax.lax.dot_general(ones_d, deep_in * deep_in, NT,
                                 preferred_element_type=jnp.float32)          # [1, Bt]
        quad = 0.5 * (ss - dd)

        # ---- FM first-order term -------------------------------------------------
        lin = jax.lax.dot_general(wlin_ref[...], feat, NT,
                                  preferred_element_type=jnp.float32)         # [1, Bt]

        # ---- Deep component: 3x (Linear + folded BN + ReLU) + 1-wide head -------
        h = deep_in
        for w_ref, t_ref in ((w1_ref, t1_ref), (w2_ref, t2_ref), (w3_ref, t3_ref)):
            h = jnp.dot(h.astype(w_ref.dtype), w_ref[...],
                        preferred_element_type=jnp.float32) + t_ref[...]
            h = jnp.maximum(h, 0.0)                              # ReLU (Dropout = identity)
        deep = jax.lax.dot_general(w4_ref[...], h.astype(w4_ref.dtype), NT,
                                   preferred_element_type=jnp.float32)        # [1, Bt]

        out_ref[...] = quad + lin + deep + bias_ref[0, 0]

    return kernel


def deepfm_forward(features, params, continuous_features, categorial_features,
                   emb_size, block_rows=512, weight_dtype=jnp.float32):
    """Glue: fold parameters once, then run a batch-gridded Pallas kernel.

    block_rows: batch tile (multiple of 128 recommended; 512-1024 in production;
    on v7x pick it so ceil(B / block_rows) >= 2 to keep both TensorCores busy).
    """
    B, F = features.shape
    E = emb_size
    D = F * E
    H = params["w1"].shape[1]
    assert block_rows % 8 == 0

    # ---- design-matrix metadata + block-structured embedding matrix ------------
    field_meta = []
    P = 0
    for i in range(F):
        if i in continuous_features:
            field_meta.append(("cont", P)); P += 1
        else:
            field_meta.append(("cat", P)); P += int(params["cat"][i].shape[0])

    sel = np.zeros((F, P), np.float32)      # column -> field selector
    offi = np.zeros((1, P), np.int32)       # column -> field design offset
    cmask = np.zeros((1, P), np.float32)    # 1 for continuous columns
    wbig = np.zeros((P, D), np.float32)
    bbig = np.zeros((1, D), np.float32)
    for f, (kind, off) in enumerate(field_meta):
        if kind == "cont":
            Wf, bf = params["cont"][f]                       # [1, E], [1, E]
            wbig[off, f * E:(f + 1) * E] = np.asarray(Wf)[0]
            bbig[0, f * E:(f + 1) * E] = np.asarray(bf)[0]
            sel[f, off] = 1.0
            cmask[0, off] = 1.0
        else:
            tab = np.asarray(params["cat"][f])               # [vocab, E]
            V = tab.shape[0]
            wbig[off:off + V, f * E:(f + 1) * E] = tab
            sel[f, off:off + V] = 1.0
            offi[0, off:off + V] = off

    sel_j = jnp.asarray(sel)                                 # keep f32: carries exact ids
    offi_j = jnp.asarray(offi)
    cmask_j = jnp.asarray(cmask)
    wbig_j = jnp.asarray(wbig).astype(weight_dtype)
    bbig_j = jnp.asarray(bbig)

    # ---- fold Linear bias + BatchNorm1d(eval) into (W', shift') ----------------
    def fold_layer(w, b, bn, eps=1e-5):
        gamma, beta, mean, var = bn
        scale = gamma / jnp.sqrt(var + eps)                  # [H]
        shift = beta - mean * scale                          # [H]
        return (w * scale[None, :]).astype(weight_dtype), (b[0] * scale + shift)[None, :]

    w1f, t1 = fold_layer(params["w1"], params["b1"], params["bn1"])
    w2f, t2 = fold_layer(params["w2"], params["b2"], params["bn2"])
    w3f, t3 = fold_layer(params["w3"], params["b3"], params["bn3"])

    wlin_row = params["wlin"].reshape(1, F)                  # keep f32 (feat contraction)
    w4_row = params["w4"].reshape(1, H).astype(weight_dtype)
    bias_sc = params["blin"].reshape(1, 1) + params["b4"].reshape(1, 1)   # folded scalar

    # ---- pad batch to a multiple of the block size (padded rows discarded) -----
    Bt = block_rows
    nb = pl.cdiv(B, Bt)
    Bp = nb * Bt
    feats = jnp.pad(features, ((0, Bp - B), (0, 0))) if Bp != B else features

    kernel = make_deepfm_kernel(F, E)

    def run(single_buffer_weights):
        pm = pl.Buffered(1) if single_buffer_weights else None

        def const(shape):   # weights stay VMEM-resident across grid steps
            if pm is None:
                return pl.BlockSpec(shape, lambda i: (0, 0))
            return pl.BlockSpec(shape, lambda i: (0, 0), pipeline_mode=pm)

        in_specs = [
            pl.BlockSpec((Bt, F), lambda i: (i, 0)),          # streamed batch tile
            const((F, P)), const((1, P)), const((1, P)),      # sel / offsets / cont mask
            const((P, D)), const((1, D)),                     # fused embedding matrix
            const((1, F)),                                    # FM linear head
            const((D, H)), const((1, H)),
            const((H, H)), const((1, H)),
            const((H, H)), const((1, H)),
            const((1, H)),
            pl.BlockSpec(memory_space=pltpu.MemorySpace.SMEM),   # folded scalar bias
        ]
        return pl.pallas_call(
            kernel,
            out_shape=jax.ShapeDtypeStruct((1, Bp), jnp.float32),   # lane-dense output slab
            grid=(nb,),
            in_specs=in_specs,
            out_specs=pl.BlockSpec((1, Bt), lambda i: (0, i)),
            compiler_params=pltpu.CompilerParams(
                # batch axis is embarrassingly parallel -> v7x shards it over 2 TCs
                dimension_semantics=("parallel",),
                # above v5e's 16 MiB default, comfortably under v7x's 64 MiB physical
                vmem_limit_bytes=48 * 1024 * 1024,
            ),
        )(feats, sel_j, offi_j, cmask_j, wbig_j, bbig_j, wlin_row,
          w1f, t1, w2f, t2, w3f, t3, w4_row, bias_sc)

    try:
        out2d = run(True)
    except Exception:
        # pipeline_mode=pl.Buffered(1) unsupported on this JAX -> default double buffer
        out2d = run(False)

    return out2d.reshape(-1)[:B]                             # .view(-1)


def deepfm_reference(features, params, continuous_features, categorial_features):
    """Pure-JAX reference mirroring the PyTorch forward (eval mode)."""
    B, F = features.shape
    emb_list = []
    for i in range(F):
        if i in continuous_features:
            W, b = params["cont"][i]
            v = features[:, i:i + 1] @ W + b
        else:
            v = params["cat"][i][features[:, i].astype(jnp.int32)]
        emb_list.append(v)
    fm1 = sum(emb_list)
    fm1 = jnp.sum(fm1 * fm1, axis=1)
    fm2 = jnp.sum(sum(e * e for e in emb_list), axis=1)
    quad = (0.5 * (fm1 - fm2))[:, None]
    lin = features @ params["wlin"] + params["blin"]
    fm = quad + lin

    h = jnp.concatenate(emb_list, axis=1)
    for w, b, bn in (("w1", "b1", "bn1"), ("w2", "b2", "bn2"), ("w3", "b3", "bn3")):
        h = h @ params[w] + params[b]
        g, bt, mu, var = params[bn]
        h = g * (h - mu) / jnp.sqrt(var + 1e-5) + bt
        h = jnp.maximum(h, 0.0)
    deep = h @ params["w4"] + params["b4"]
    return (fm + deep).reshape(-1)


if __name__ == "__main__":
    # Small, self-consistent configuration (continuous fields must have size 1).
    B = 20                                  # not a multiple of the block size on purpose
    features_size = [1, 1, 5, 7]
    continuous_features = [0, 1]
    categorial_features = [2, 3]
    F = len(features_size)
    E = 8                                   # emb_size
    H = 32                                  # num_neurons
    D = E * F

    key = jax.random.PRNGKey(0)
    ks = iter(jax.random.split(key, 64))

    def rnd(shape, scale=0.1):
        return (scale * jax.random.normal(next(ks), shape)).astype(jnp.float32)

    params = {"cont": {}, "cat": {}}
    for i in continuous_features:
        params["cont"][i] = (rnd((features_size[i], E)), rnd((1, E)))
    for i in categorial_features:
        params["cat"][i] = rnd((features_size[i], E))

    params["wlin"] = rnd((F, 1))
    params["blin"] = rnd((1, 1))

    params["w1"], params["b1"] = rnd((D, H)), rnd((1, H))
    params["w2"], params["b2"] = rnd((H, H)), rnd((1, H))
    params["w3"], params["b3"] = rnd((H, H)), rnd((1, H))
    params["w4"], params["b4"] = rnd((H, 1)), rnd((1, 1))

    for name in ("bn1", "bn2", "bn3"):
        gamma = 1.0 + rnd((H,), 0.05)
        beta = rnd((H,), 0.05)
        mean = rnd((H,), 0.05)
        var = 1.0 + jnp.abs(rnd((H,), 0.05))
        params[name] = (gamma, beta, mean, var)

    # Features: continuous columns ~ N(0,1); categorical columns are integer ids
    # stored as floats (the same tensor feeds linear_part, as in the torch code).
    cont_vals = jax.random.normal(next(ks), (B, len(continuous_features))).astype(jnp.float32)
    cat_cols = []
    for i in categorial_features:
        cat_cols.append(jax.random.randint(next(ks), (B, 1), 0,
                                           features_size[i]).astype(jnp.float32))
    features = jnp.concatenate([cont_vals] + cat_cols, axis=1)    # [B, F]

    ref = deepfm_reference(features, params, continuous_features, categorial_features)

    # f32 weights: tight check.  block_rows=128 keeps the toy test small; use
    # 512-1024 in production (and nb >= 2 on v7x).
    out = deepfm_forward(features, params, continuous_features, categorial_features,
                         emb_size=E, block_rows=128)
    out = jax.block_until_ready(out)
    assert out.shape == (B,)
    assert jnp.allclose(out, ref, atol=1e-3, rtol=1e-3), (out, ref)

    # bf16 weights (v6e/v7x MXU-native, halves resident-weight VMEM): loose check.
    out_bf16 = deepfm_forward(features, params, continuous_features, categorial_features,
                              emb_size=E, block_rows=128, weight_dtype=jnp.bfloat16)
    out_bf16 = jax.block_until_ready(out_bf16)
    assert jnp.allclose(out_bf16, ref, atol=5e-2, rtol=5e-2), (out_bf16, ref)

    print("KERNEL_OK")
</pallas_src>

<mosaic_0001>
module attributes {stable_mosaic.version = 11 : i64} {
  func.func @kernel(%arg0: i32, %arg1: memref<128x4xf32, #tpu.memory_space<vmem>>, %arg2: memref<4x14xf32, #tpu.memory_space<vmem>>, %arg3: memref<1x14xi32, #tpu.memory_space<vmem>>, %arg4: memref<1x14xf32, #tpu.memory_space<vmem>>, %arg5: memref<14x32xf32, #tpu.memory_space<vmem>>, %arg6: memref<1x32xf32, #tpu.memory_space<vmem>>, %arg7: memref<1x4xf32, #tpu.memory_space<vmem>>, %arg8: memref<32x32xf32, #tpu.memory_space<vmem>>, %arg9: memref<1x32xf32, #tpu.memory_space<vmem>>, %arg10: memref<32x32xf32, #tpu.memory_space<vmem>>, %arg11: memref<1x32xf32, #tpu.memory_space<vmem>>, %arg12: memref<32x32xf32, #tpu.memory_space<vmem>>, %arg13: memref<1x32xf32, #tpu.memory_space<vmem>>, %arg14: memref<1x32xf32, #tpu.memory_space<vmem>>, %arg15: memref<1x1xf32, #tpu.memory_space<smem>>, %arg16: memref<1x128xf32, #tpu.memory_space<vmem>>) attributes {dimension_semantics = [#tpu.dimension_semantics<parallel>], iteration_bounds = array<i64: 1>, scalar_prefetch = 0 : i64, scratch_operands = 0 : i64, tpu.core_type = #tpu.core_type<tc>, window_params = [{transform_indices = @transform_0, window_bounds = array<i64: 128, 4>}, {pipeline_mode = #tpu.pipeline_mode<synchronous>, transform_indices = @transform_1, window_bounds = array<i64: 4, 14>}, {pipeline_mode = #tpu.pipeline_mode<synchronous>, transform_indices = @transform_2, window_bounds = array<i64: 1, 14>}, {pipeline_mode = #tpu.pipeline_mode<synchronous>, transform_indices = @transform_3, window_bounds = array<i64: 1, 14>}, {pipeline_mode = #tpu.pipeline_mode<synchronous>, transform_indices = @transform_4, window_bounds = array<i64: 14, 32>}, {pipeline_mode = #tpu.pipeline_mode<synchronous>, transform_indices = @transform_5, window_bounds = array<i64: 1, 32>}, {pipeline_mode = #tpu.pipeline_mode<synchronous>, transform_indices = @transform_6, window_bounds = array<i64: 1, 4>}, {pipeline_mode = #tpu.pipeline_mode<synchronous>, transform_indices = @transform_7, window_bounds = array<i64: 32, 32>}, {pipeline_mode = #tpu.pipeline_mode<synchronous>, transform_indices = @transform_8, window_bounds = array<i64: 1, 32>}, {pipeline_mode = #tpu.pipeline_mode<synchronous>, transform_indices = @transform_9, window_bounds = array<i64: 32, 32>}, {pipeline_mode = #tpu.pipeline_mode<synchronous>, transform_indices = @transform_10, window_bounds = array<i64: 1, 32>}, {pipeline_mode = #tpu.pipeline_mode<synchronous>, transform_indices = @transform_11, window_bounds = array<i64: 32, 32>}, {pipeline_mode = #tpu.pipeline_mode<synchronous>, transform_indices = @transform_12, window_bounds = array<i64: 1, 32>}, {pipeline_mode = #tpu.pipeline_mode<synchronous>, transform_indices = @transform_13, window_bounds = array<i64: 1, 32>}, {transform_indices = @transform_14, window_bounds = array<i64: 1, 1>}, {transform_indices = @transform_15, window_bounds = array<i64: 1, 128>}]} {
    %c0 = arith.constant 0 : index
    %c0_0 = arith.constant 0 : index
    %0 = vector.load %arg1[%c0, %c0_0] : memref<128x4xf32, #tpu.memory_space<vmem>>, vector<128x4xf32>
    %c0_1 = arith.constant 0 : index
    %c0_2 = arith.constant 0 : index
    %1 = vector.load %arg2[%c0_1, %c0_2] : memref<4x14xf32, #tpu.memory_space<vmem>>, vector<4x14xf32>
    %cst = arith.constant dense<0.000000e+00> : vector<128x14xf32>
    %2 = tpu.matmul %0, %1, %cst {dimension_numbers = #tpu.dot_dimension_numbers<[1], [0], [0], [1], [0, 0, 1, 1], [], []>} : vector<128x4xf32>, vector<4x14xf32>, vector<128x14xf32> -> vector<128x14xf32>
    %3 = tpu.iota {dimensions = array<i32: 1>} : vector<128x14xi32>
    %4 = arith.fptosi %2 : vector<128x14xf32> to vector<128x14xi32>
    %c0_3 = arith.constant 0 : index
    %c0_4 = arith.constant 0 : index
    %5 = vector.load %arg3[%c0_3, %c0_4] : memref<1x14xi32, #tpu.memory_space<vmem>>, vector<1x14xi32>
    %6 = vector.broadcast %5 : vector<1x14xi32> to vector<128x14xi32>
    %7 = arith.addi %4, %6 : vector<128x14xi32>
    %8 = arith.cmpi eq, %3, %7 : vector<128x14xi32>
    %9 = arith.extui %8 : vector<128x14xi1> to vector<128x14xi32>
    %10 = arith.sitofp %9 : vector<128x14xi32> to vector<128x14xf32>
    %c0_5 = arith.constant 0 : index
    %c0_6 = arith.constant 0 : index
    %11 = vector.load %arg4[%c0_5, %c0_6] : memref<1x14xf32, #tpu.memory_space<vmem>>, vector<1x14xf32>
    %12 = vector.broadcast %11 : vector<1x14xf32> to vector<128x14xf32>
    %13 = arith.mulf %12, %2 : vector<128x14xf32>
    %cst_7 = arith.constant 1.000000e+00 : f32
    %14 = vector.broadcast %cst_7 : f32 to vector<1x14xf32>
    %15 = arith.subf %14, %11 : vector<1x14xf32>
    %16 = vector.broadcast %15 : vector<1x14xf32> to vector<128x14xf32>
    %17 = arith.mulf %16, %10 : vector<128x14xf32>
    %18 = arith.addf %13, %17 : vector<128x14xf32>
    %c0_8 = arith.constant 0 : index
    %c0_9 = arith.constant 0 : index
    %19 = vector.load %arg5[%c0_8, %c0_9] : memref<14x32xf32, #tpu.memory_space<vmem>>, vector<14x32xf32>
    %cst_10 = arith.constant dense<0.000000e+00> : vector<128x32xf32>
    %20 = tpu.matmul %18, %19, %cst_10 {dimension_numbers = #tpu.dot_dimension_numbers<[1], [0], [0], [1], [0, 0, 1, 1], [], []>} : vector<128x14xf32>, vector<14x32xf32>, vector<128x32xf32> -> vector<128x32xf32>
    %c0_11 = arith.constant 0 : index
    %c0_12 = arith.constant 0 : index
    %21 = vector.load %arg6[%c0_11, %c0_12] : memref<1x32xf32, #tpu.memory_space<vmem>>, vector<1x32xf32>
    %22 = vector.broadcast %21 : vector<1x32xf32> to vector<128x32xf32>
    %23 = arith.addf %20, %22 : vector<128x32xf32>
    %24 = vector.extract_strided_slice %23 {offsets = [0, 0], sizes = [128, 8], strides = [1, 1]} : vector<128x32xf32> to vector<128x8xf32>
    %25 = vector.extract_strided_slice %23 {offsets = [0, 8], sizes = [128, 8], strides = [1, 1]} : vector<128x32xf32> to vector<128x8xf32>
    %26 = arith.addf %24, %25 : vector<128x8xf32>
    %27 = vector.extract_strided_slice %23 {offsets = [0, 16], sizes = [128, 8], strides = [1, 1]} : vector<128x32xf32> to vector<128x8xf32>
    %28 = arith.addf %26, %27 : vector<128x8xf32>
    %29 = vector.extract_strided_slice %23 {offsets = [0, 24], sizes = [128, 8], strides = [1, 1]} : vector<128x32xf32> to vector<128x8xf32>
    %30 = arith.addf %28, %29 : vector<128x8xf32>
    %cst_13 = arith.constant 1.000000e+00 : f32
    %31 = vector.broadcast %cst_13 : f32 to vector<1x8xf32>
    %cst_14 = arith.constant 1.000000e+00 : f32
    %32 = vector.broadcast %cst_14 : f32 to vector<1x32xf32>
    %33 = arith.mulf %30, %30 : vector<128x8xf32>
    %cst_15 = arith.constant dense<0.000000e+00> : vector<1x128xf32>
    %34 = tpu.matmul %31, %33, %cst_15 {dimension_numbers = #tpu.dot_dimension_numbers<[1], [1], [0], [0], [0, 0, 1, 0], [], []>} : vector<1x8xf32>, vector<128x8xf32>, vector<1x128xf32> -> vector<1x128xf32>
    %35 = arith.mulf %23, %23 : vector<128x32xf32>
    %cst_16 = arith.constant dense<0.000000e+00> : vector<1x128xf32>
    %36 = tpu.matmul %32, %35, %cst_16 {dimension_numbers = #tpu.dot_dimension_numbers<[1], [1], [0], [0], [0, 0, 1, 0], [], []>} : vector<1x32xf32>, vector<128x32xf32>, vector<1x128xf32> -> vector<1x128xf32>
    %37 = arith.subf %34, %36 : vector<1x128xf32>
    %cst_17 = arith.constant 5.000000e-01 : f32
    %38 = vector.broadcast %cst_17 : f32 to vector<1x128xf32>
    %39 = arith.mulf %38, %37 : vector<1x128xf32>
    %c0_18 = arith.constant 0 : index
    %c0_19 = arith.constant 0 : index
    %40 = vector.load %arg7[%c0_18, %c0_19] : memref<1x4xf32, #tpu.memory_space<vmem>>, vector<1x4xf32>
    %cst_20 = arith.constant dense<0.000000e+00> : vector<1x128xf32>
    %41 = tpu.matmul %40, %0, %cst_20 {dimension_numbers = #tpu.dot_dimension_numbers<[1], [1], [0], [0], [0, 0, 1, 0], [], []>} : vector<1x4xf32>, vector<128x4xf32>, vector<1x128xf32> -> vector<1x128xf32>
    %c0_21 = arith.constant 0 : index
    %c0_22 = arith.constant 0 : index
    %42 = vector.load %arg8[%c0_21, %c0_22] : memref<32x32xf32, #tpu.memory_space<vmem>>, vector<32x32xf32>
    %cst_23 = arith.constant dense<0.000000e+00> : vector<128x32xf32>
    %43 = tpu.matmul %23, %42, %cst_23 {dimension_numbers = #tpu.dot_dimension_numbers<[1], [0], [0], [1], [0, 0, 1, 1], [], []>} : vector<128x32xf32>, vector<32x32xf32>, vector<128x32xf32> -> vector<128x32xf32>
    %c0_24 = arith.constant 0 : index
    %c0_25 = arith.constant 0 : index
    %44 = vector.load %arg9[%c0_24, %c0_25] : memref<1x32xf32, #tpu.memory_space<vmem>>, vector<1x32xf32>
    %45 = vector.broadcast %44 : vector<1x32xf32> to vector<128x32xf32>
    %46 = arith.addf %43, %45 : vector<128x32xf32>
    %cst_26 = arith.constant 0.000000e+00 : f32
    %47 = vector.broadcast %cst_26 : f32 to vector<128x32xf32>
    %48 = arith.maximumf %46, %47 : vector<128x32xf32>
    %c0_27 = arith.constant 0 : index
    %c0_28 = arith.constant 0 : index
    %49 = vector.load %arg10[%c0_27, %c0_28] : memref<32x32xf32, #tpu.memory_space<vmem>>, vector<32x32xf32>
    %cst_29 = arith.constant dense<0.000000e+00> : vector<128x32xf32>
    %50 = tpu.matmul %48, %49, %cst_29 {dimension_numbers = #tpu.dot_dimension_numbers<[1], [0], [0], [1], [0, 0, 1, 1], [], []>} : vector<128x32xf32>, vector<32x32xf32>, vector<128x32xf32> -> vector<128x32xf32>
    %c0_30 = arith.constant 0 : index
    %c0_31 = arith.constant 0 : index
    %51 = vector.load %arg11[%c0_30, %c0_31] : memref<1x32xf32, #tpu.memory_space<vmem>>, vector<1x32xf32>
    %52 = vector.broadcast %51 : vector<1x32xf32> to vector<128x32xf32>
    %53 = arith.addf %50, %52 : vector<128x32xf32>
    %cst_32 = arith.constant 0.000000e+00 : f32
    %54 = vector.broadcast %cst_32 : f32 to vector<128x32xf32>
    %55 = arith.maximumf %53, %54 : vector<128x32xf32>
    %c0_33 = arith.constant 0 : index
    %c0_34 = arith.constant 0 : index
    %56 = vector.load %arg12[%c0_33, %c0_34] : memref<32x32xf32, #tpu.memory_space<vmem>>, vector<32x32xf32>
    %cst_35 = arith.constant dense<0.000000e+00> : vector<128x32xf32>
    %57 = tpu.matmul %55, %56, %cst_35 {dimension_numbers = #tpu.dot_dimension_numbers<[1], [0], [0], [1], [0, 0, 1, 1], [], []>} : vector<128x32xf32>, vector<32x32xf32>, vector<128x32xf32> -> vector<128x32xf32>
    %c0_36 = arith.constant 0 : index
    %c0_37 = arith.constant 0 : index
    %58 = vector.load %arg13[%c0_36, %c0_37] : memref<1x32xf32, #tpu.memory_space<vmem>>, vector<1x32xf32>
    %59 = vector.broadcast %58 : vector<1x32xf32> to vector<128x32xf32>
    %60 = arith.addf %57, %59 : vector<128x32xf32>
    %cst_38 = arith.constant 0.000000e+00 : f32
    %61 = vector.broadcast %cst_38 : f32 to vector<128x32xf32>
    %62 = arith.maximumf %60, %61 : vector<128x32xf32>
    %c0_39 = arith.constant 0 : index
    %c0_40 = arith.constant 0 : index
    %63 = vector.load %arg14[%c0_39, %c0_40] : memref<1x32xf32, #tpu.memory_space<vmem>>, vector<1x32xf32>
    %cst_41 = arith.constant dense<0.000000e+00> : vector<1x128xf32>
    %64 = tpu.matmul %63, %62, %cst_41 {dimension_numbers = #tpu.dot_dimension_numbers<[1], [1], [0], [0], [0, 0, 1, 0], [], []>} : vector<1x32xf32>, vector<128x32xf32>, vector<1x128xf32> -> vector<1x128xf32>
    %65 = arith.addf %39, %41 : vector<1x128xf32>
    %66 = arith.addf %65, %64 : vector<1x128xf32>
    %c0_42 = arith.constant 0 : index
    %c0_43 = arith.constant 0 : index
    %67 = memref.load %arg15[%c0_42, %c0_43] : memref<1x1xf32, #tpu.memory_space<smem>>
    %68 = vector.broadcast %67 : f32 to vector<1x128xf32>
    %69 = arith.addf %66, %68 : vector<1x128xf32>
    %c0_44 = arith.constant 0 : index
    %c0_45 = arith.constant 0 : index
    %70 = vector.load %arg16[%c0_44, %c0_45] : memref<1x128xf32, #tpu.memory_space<vmem>>, vector<1x128xf32>
    tpu.vector_store %arg16[%c0_44, %c0_45], %69 {strides = array<i32>} : memref<1x128xf32, #tpu.memory_space<vmem>>, vector<1x128xf32>,
    return
  }
  func.func @transform_0(%arg0: i32) -> (i32, i32) {
    %c0_i32 = arith.constant 0 : i32
    %c0_i32_0 = arith.constant 0 : i32
    return %arg0, %c0_i32 : i32, i32
  }
  func.func @transform_1(%arg0: i32) -> (i32, i32) {
    %c0_i32 = arith.constant 0 : i32
    %c0_i32_0 = arith.constant 0 : i32
    %c0_i32_1 = arith.constant 0 : i32
    return %c0_i32, %c0_i32_0 : i32, i32
  }
  func.func @transform_2(%arg0: i32) -> (i32, i32) {
    %c0_i32 = arith.constant 0 : i32
    %c0_i32_0 = arith.constant 0 : i32
    %c0_i32_1 = arith.constant 0 : i32
    return %c0_i32, %c0_i32_0 : i32, i32
  }
  func.func @transform_3(%arg0: i32) -> (i32, i32) {
    %c0_i32 = arith.constant 0 : i32
    %c0_i32_0 = arith.constant 0 : i32
    %c0_i32_1 = arith.constant 0 : i32
    return %c0_i32, %c0_i32_0 : i32, i32
  }
  func.func @transform_4(%arg0: i32) -> (i32, i32) {
    %c0_i32 = arith.constant 0 : i32
    %c0_i32_0 = arith.constant 0 : i32
    %c0_i32_1 = arith.constant 0 : i32
    return %c0_i32, %c0_i32_0 : i32, i32
  }
  func.func @transform_5(%arg0: i32) -> (i32, i32) {
    %c0_i32 = arith.constant 0 : i32
    %c0_i32_0 = arith.constant 0 : i32
    %c0_i32_1 = arith.constant 0 : i32
    return %c0_i32, %c0_i32_0 : i32, i32
  }
  func.func @transform_6(%arg0: i32) -> (i32, i32) {
    %c0_i32 = arith.constant 0 : i32
    %c0_i32_0 = arith.constant 0 : i32
    %c0_i32_1 = arith.constant 0 : i32
    return %c0_i32, %c0_i32_0 : i32, i32
  }
  func.func @transform_7(%arg0: i32) -> (i32, i32) {
    %c0_i32 = arith.constant 0 : i32
    %c0_i32_0 = arith.constant 0 : i32
    %c0_i32_1 = arith.constant 0 : i32
    return %c0_i32, %c0_i32_0 : i32, i32
  }
  func.func @transform_8(%arg0: i32) -> (i32, i32) {
    %c0_i32 = arith.constant 0 : i32
    %c0_i32_0 = arith.constant 0 : i32
    %c0_i32_1 = arith.constant 0 : i32
    return %c0_i32, %c0_i32_0 : i32, i32
  }
  func.func @transform_9(%arg0: i32) -> (i32, i32) {
    %c0_i32 = arith.constant 0 : i32
    %c0_i32_0 = arith.constant 0 : i32
    %c0_i32_1 = arith.constant 0 : i32
    return %c0_i32, %c0_i32_0 : i32, i32
  }
  func.func @transform_10(%arg0: i32) -> (i32, i32) {
    %c0_i32 = arith.constant 0 : i32
    %c0_i32_0 = arith.constant 0 : i32
    %c0_i32_1 = arith.constant 0 : i32
    return %c0_i32, %c0_i32_0 : i32, i32
  }
  func.func @transform_11(%arg0: i32) -> (i32, i32) {
    %c0_i32 = arith.constant 0 : i32
    %c0_i32_0 = arith.constant 0 : i32
    %c0_i32_1 = arith.constant 0 : i32
    return %c0_i32, %c0_i32_0 : i32, i32
  }
  func.func @transform_12(%arg0: i32) -> (i32, i32) {
    %c0_i32 = arith.constant 0 : i32
    %c0_i32_0 = arith.constant 0 : i32
    %c0_i32_1 = arith.constant 0 : i32
    return %c0_i32, %c0_i32_0 : i32, i32
  }
  func.func @transform_13(%arg0: i32) -> (i32, i32) {
    %c0_i32 = arith.constant 0 : i32
    %c0_i32_0 = arith.constant 0 : i32
    %c0_i32_1 = arith.constant 0 : i32
    return %c0_i32, %c0_i32_0 : i32, i32
  }
  func.func @transform_14(%arg0: i32) -> (i32, i32) {
    %c0_i32 = arith.constant 0 : i32
    %c0_i32_0 = arith.constant 0 : i32
    %c0_i32_1 = arith.constant 0 : i32
    return %c0_i32, %c0_i32_0 : i32, i32
  }
  func.func @transform_15(%arg0: i32) -> (i32, i32) {
    %c0_i32 = arith.constant 0 : i32
    %c0_i32_0 = arith.constant 0 : i32
    return %c0_i32, %arg0 : i32, i32
  }
}

module attributes {stable_mosaic.version = 11 : i64} {
  func.func @kernel(%arg0: i32, %arg1: memref<128x4xf32, #tpu.memory_space<vmem>>, %arg2: memref<4x14xf32, #tpu.memory_space<vmem>>, %arg3: memref<1x14xi32, #tpu.memory_space<vmem>>, %arg4: memref<1x14xf32, #tpu.memory_space<vmem>>, %arg5: memref<14x32xf32, #tpu.memory_space<vmem>>, %arg6: memref<1x32xf32, #tpu.memory_space<vmem>>, %arg7: memref<1x4xf32, #tpu.memory_space<vmem>>, %arg8: memref<32x32xf32, #tpu.memory_space<vmem>>, %arg9: memref<1x32xf32, #tpu.memory_space<vmem>>, %arg10: memref<32x32xf32, #tpu.memory_space<vmem>>, %arg11: memref<1x32xf32, #tpu.memory_space<vmem>>, %arg12: memref<32x32xf32, #tpu.memory_space<vmem>>, %arg13: memref<1x32xf32, #tpu.memory_space<vmem>>, %arg14: memref<1x32xf32, #tpu.memory_space<vmem>>, %arg15: memref<1x1xf32, #tpu.memory_space<smem>>, %arg16: memref<1x128xf32, #tpu.memory_space<vmem>>) attributes {dimension_semantics = [#tpu.dimension_semantics<parallel>], iteration_bounds = array<i64: 1>, scalar_prefetch = 0 : i64, scratch_operands = 0 : i64, tpu.core_type = #tpu.core_type<tc>, window_params = [{transform_indices = @transform_0, window_bounds = array<i64: 128, 4>}, {pipeline_mode = #tpu.pipeline_mode<synchronous>, transform_indices = @transform_1, window_bounds = array<i64: 4, 14>}, {pipeline_mode = #tpu.pipeline_mode<synchronous>, transform_indices = @transform_2, window_bounds = array<i64: 1, 14>}, {pipeline_mode = #tpu.pipeline_mode<synchronous>, transform_indices = @transform_3, window_bounds = array<i64: 1, 14>}, {pipeline_mode = #tpu.pipeline_mode<synchronous>, transform_indices = @transform_4, window_bounds = array<i64: 14, 32>}, {pipeline_mode = #tpu.pipeline_mode<synchronous>, transform_indices = @transform_5, window_bounds = array<i64: 1, 32>}, {pipeline_mode = #tpu.pipeline_mode<synchronous>, transform_indices = @transform_6, window_bounds = array<i64: 1, 4>}, {pipeline_mode = #tpu.pipeline_mode<synchronous>, transform_indices = @transform_7, window_bounds = array<i64: 32, 32>}, {pipeline_mode = #tpu.pipeline_mode<synchronous>, transform_indices = @transform_8, window_bounds = array<i64: 1, 32>}, {pipeline_mode = #tpu.pipeline_mode<synchronous>, transform_indices = @transform_9, window_bounds = array<i64: 32, 32>}, {pipeline_mode = #tpu.pipeline_mode<synchronous>, transform_indices = @transform_10, window_bounds = array<i64: 1, 32>}, {pipeline_mode = #tpu.pipeline_mode<synchronous>, transform_indices = @transform_11, window_bounds = array<i64: 32, 32>}, {pipeline_mode = #tpu.pipeline_mode<synchronous>, transform_indices = @transform_12, window_bounds = array<i64: 1, 32>}, {pipeline_mode = #tpu.pipeline_mode<synchronous>, transform_indices = @transform_13, window_bounds = array<i64: 1, 32>}, {transform_indices = @transform_14, window_bounds = array<i64: 1, 1>}, {transform_indices = @transform_15, window_bounds = array<i64: 1, 128>}]} {
    %c0 = arith.constant 0 : index
    %c0_0 = arith.constant 0 : index
    %0 = vector.load %arg1[%c0, %c0_0] : memref<128x4xf32, #tpu.memory_space<vmem>>, vector<128x4xf32>
    %c0_1 = arith.constant 0 : index
    %c0_2 = arith.constant 0 : index
    %1 = vector.load %arg2[%c0_1, %c0_2] : memref<4x14xf32, #tpu.memory_space<vmem>>, vector<4x14xf32>
    %cst = arith.constant dense<0.000000e+00> : vector<128x14xf32>
    %2 = tpu.matmul %0, %1, %cst {dimension_numbers = #tpu.dot_dimension_numbers<[1], [0], [0], [1], [0, 0, 1, 1], [], []>} : vector<128x4xf32>, vector<4x14xf32>, vector<128x14xf32> -> vector<128x14xf32>
    %3 = tpu.iota {dimensions = array<i32: 1>} : vector<128x14xi32>
    %4 = arith.fptosi %2 : vector<128x14xf32> to vector<128x14xi32>
    %c0_3 = arith.constant 0 : index
    %c0_4 = arith.constant 0 : index
    %5 = vector.load %arg3[%c0_3, %c0_4] : memref<1x14xi32, #tpu.memory_space<vmem>>, vector<1x14xi32>
    %6 = vector.broadcast %5 : vector<1x14xi32> to vector<128x14xi32>
    %7 = arith.addi %4, %6 : vector<128x14xi32>
    %8 = arith.cmpi eq, %3, %7 : vector<128x14xi32>
    %9 = arith.extui %8 : vector<128x14xi1> to vector<128x14xi32>
    %10 = arith.sitofp %9 : vector<128x14xi32> to vector<128x14xf32>
    %c0_5 = arith.constant 0 : index
    %c0_6 = arith.constant 0 : index
    %11 = vector.load %arg4[%c0_5, %c0_6] : memref<1x14xf32, #tpu.memory_space<vmem>>, vector<1x14xf32>
    %12 = vector.broadcast %11 : vector<1x14xf32> to vector<128x14xf32>
    %13 = arith.mulf %12, %2 : vector<128x14xf32>
    %cst_7 = arith.constant 1.000000e+00 : f32
    %14 = vector.broadcast %cst_7 : f32 to vector<1x14xf32>
    %15 = arith.subf %14, %11 : vector<1x14xf32>
    %16 = vector.broadcast %15 : vector<1x14xf32> to vector<128x14xf32>
    %17 = arith.mulf %16, %10 : vector<128x14xf32>
    %18 = arith.addf %13, %17 : vector<128x14xf32>
    %c0_8 = arith.constant 0 : index
    %c0_9 = arith.constant 0 : index
    %19 = vector.load %arg5[%c0_8, %c0_9] : memref<14x32xf32, #tpu.memory_space<vmem>>, vector<14x32xf32>
    %cst_10 = arith.constant dense<0.000000e+00> : vector<128x32xf32>
    %20 = tpu.matmul %18, %19, %cst_10 {dimension_numbers = #tpu.dot_dimension_numbers<[1], [0], [0], [1], [0, 0, 1, 1], [], []>} : vector<128x14xf32>, vector<14x32xf32>, vector<128x32xf32> -> vector<128x32xf32>
    %c0_11 = arith.constant 0 : index
    %c0_12 = arith.constant 0 : index
    %21 = vector.load %arg6[%c0_11, %c0_12] : memref<1x32xf32, #tpu.memory_space<vmem>>, vector<1x32xf32>
    %22 = vector.broadcast %21 : vector<1x32xf32> to vector<128x32xf32>
    %23 = arith.addf %20, %22 : vector<128x32xf32>
    %24 = vector.extract_strided_slice %23 {offsets = [0, 0], sizes = [128, 8], strides = [1, 1]} : vector<128x32xf32> to vector<128x8xf32>
    %25 = vector.extract_strided_slice %23 {offsets = [0, 8], sizes = [128, 8], strides = [1, 1]} : vector<128x32xf32> to vector<128x8xf32>
    %26 = arith.addf %24, %25 : vector<128x8xf32>
    %27 = vector.extract_strided_slice %23 {offsets = [0, 16], sizes = [128, 8], strides = [1, 1]} : vector<128x32xf32> to vector<128x8xf32>
    %28 = arith.addf %26, %27 : vector<128x8xf32>
    %29 = vector.extract_strided_slice %23 {offsets = [0, 24], sizes = [128, 8], strides = [1, 1]} : vector<128x32xf32> to vector<128x8xf32>
    %30 = arith.addf %28, %29 : vector<128x8xf32>
    %cst_13 = arith.constant 1.000000e+00 : f32
    %31 = vector.broadcast %cst_13 : f32 to vector<1x8xf32>
    %cst_14 = arith.constant 1.000000e+00 : f32
    %32 = vector.broadcast %cst_14 : f32 to vector<1x32xf32>
    %33 = arith.mulf %30, %30 : vector<128x8xf32>
    %cst_15 = arith.constant dense<0.000000e+00> : vector<1x128xf32>
    %34 = tpu.matmul %31, %33, %cst_15 {dimension_numbers = #tpu.dot_dimension_numbers<[1], [1], [0], [0], [0, 0, 1, 0], [], []>} : vector<1x8xf32>, vector<128x8xf32>, vector<1x128xf32> -> vector<1x128xf32>
    %35 = arith.mulf %23, %23 : vector<128x32xf32>
    %cst_16 = arith.constant dense<0.000000e+00> : vector<1x128xf32>
    %36 = tpu.matmul %32, %35, %cst_16 {dimension_numbers = #tpu.dot_dimension_numbers<[1], [1], [0], [0], [0, 0, 1, 0], [], []>} : vector<1x32xf32>, vector<128x32xf32>, vector<1x128xf32> -> vector<1x128xf32>
    %37 = arith.subf %34, %36 : vector<1x128xf32>
    %cst_17 = arith.constant 5.000000e-01 : f32
    %38 = vector.broadcast %cst_17 : f32 to vector<1x128xf32>
    %39 = arith.mulf %38, %37 : vector<1x128xf32>
    %c0_18 = arith.constant 0 : index
    %c0_19 = arith.constant 0 : index
    %40 = vector.load %arg7[%c0_18, %c0_19] : memref<1x4xf32, #tpu.memory_space<vmem>>, vector<1x4xf32>
    %cst_20 = arith.constant dense<0.000000e+00> : vector<1x128xf32>
    %41 = tpu.matmul %40, %0, %cst_20 {dimension_numbers = #tpu.dot_dimension_numbers<[1], [1], [0], [0], [0, 0, 1, 0], [], []>} : vector<1x4xf32>, vector<128x4xf32>, vector<1x128xf32> -> vector<1x128xf32>
    %c0_21 = arith.constant 0 : index
    %c0_22 = arith.constant 0 : index
    %42 = vector.load %arg8[%c0_21, %c0_22] : memref<32x32xf32, #tpu.memory_space<vmem>>, vector<32x32xf32>
    %cst_23 = arith.constant dense<0.000000e+00> : vector<128x32xf32>
    %43 = tpu.matmul %23, %42, %cst_23 {dimension_numbers = #tpu.dot_dimension_numbers<[1], [0], [0], [1], [0, 0, 1, 1], [], []>} : vector<128x32xf32>, vector<32x32xf32>, vector<128x32xf32> -> vector<128x32xf32>
    %c0_24 = arith.constant 0 : index
    %c0_25 = arith.constant 0 : index
    %44 = vector.load %arg9[%c0_24, %c0_25] : memref<1x32xf32, #tpu.memory_space<vmem>>, vector<1x32xf32>
    %45 = vector.broadcast %44 : vector<1x32xf32> to vector<128x32xf32>
    %46 = arith.addf %43, %45 : vector<128x32xf32>
    %cst_26 = arith.constant 0.000000e+00 : f32
    %47 = vector.broadcast %cst_26 : f32 to vector<128x32xf32>
    %48 = arith.maximumf %46, %47 : vector<128x32xf32>
    %c0_27 = arith.constant 0 : index
    %c0_28 = arith.constant 0 : index
    %49 = vector.load %arg10[%c0_27, %c0_28] : memref<32x32xf32, #tpu.memory_space<vmem>>, vector<32x32xf32>
    %cst_29 = arith.constant dense<0.000000e+00> : vector<128x32xf32>
    %50 = tpu.matmul %48, %49, %cst_29 {dimension_numbers = #tpu.dot_dimension_numbers<[1], [0], [0], [1], [0, 0, 1, 1], [], []>} : vector<128x32xf32>, vector<32x32xf32>, vector<128x32xf32> -> vector<128x32xf32>
    %c0_30 = arith.constant 0 : index
    %c0_31 = arith.constant 0 : index
    %51 = vector.load %arg11[%c0_30, %c0_31] : memref<1x32xf32, #tpu.memory_space<vmem>>, vector<1x32xf32>
    %52 = vector.broadcast %51 : vector<1x32xf32> to vector<128x32xf32>
    %53 = arith.addf %50, %52 : vector<128x32xf32>
    %cst_32 = arith.constant 0.000000e+00 : f32
    %54 = vector.broadcast %cst_32 : f32 to vector<128x32xf32>
    %55 = arith.maximumf %53, %54 : vector<128x32xf32>
    %c0_33 = arith.constant 0 : index
    %c0_34 = arith.constant 0 : index
    %56 = vector.load %arg12[%c0_33, %c0_34] : memref<32x32xf32, #tpu.memory_space<vmem>>, vector<32x32xf32>
    %cst_35 = arith.constant dense<0.000000e+00> : vector<128x32xf32>
    %57 = tpu.matmul %55, %56, %cst_35 {dimension_numbers = #tpu.dot_dimension_numbers<[1], [0], [0], [1], [0, 0, 1, 1], [], []>} : vector<128x32xf32>, vector<32x32xf32>, vector<128x32xf32> -> vector<128x32xf32>
    %c0_36 = arith.constant 0 : index
    %c0_37 = arith.constant 0 : index
    %58 = vector.load %arg13[%c0_36, %c0_37] : memref<1x32xf32, #tpu.memory_space<vmem>>, vector<1x32xf32>
    %59 = vector.broadcast %58 : vector<1x32xf32> to vector<128x32xf32>
    %60 = arith.addf %57, %59 : vector<128x32xf32>
    %cst_38 = arith.constant 0.000000e+00 : f32
    %61 = vector.broadcast %cst_38 : f32 to vector<128x32xf32>
    %62 = arith.maximumf %60, %61 : vector<128x32xf32>
    %c0_39 = arith.constant 0 : index
    %c0_40 = arith.constant 0 : index
    %63 = vector.load %arg14[%c0_39, %c0_40] : memref<1x32xf32, #tpu.memory_space<vmem>>, vector<1x32xf32>
    %cst_41 = arith.constant dense<0.000000e+00> : vector<1x128xf32>
    %64 = tpu.matmul %63, %62, %cst_41 {dimension_numbers = #tpu.dot_dimension_numbers<[1], [1], [0], [0], [0, 0, 1, 0], [], []>} : vector<1x32xf32>, vector<128x32xf32>, vector<1x128xf32> -> vector<1x128xf32>
    %65 = arith.addf %39, %41 : vector<1x128xf32>
    %66 = arith.addf %65, %64 : vector<1x128xf32>
    %c0_42 = arith.constant 0 : index
    %c0_43 = arith.constant 0 : index
    %67 = memref.load %arg15[%c0_42, %c0_43] : memref<1x1xf32, #tpu.memory_space<smem>>
    %68 = vector.broadcast %67 : f32 to vector<1x128xf32>
    %69 = arith.addf %66, %68 : vector<1x128xf32>
    %c0_44 = arith.constant 0 : index
    %c0_45 = arith.constant 0 : index
    %70 = vector.load %arg16[%c0_44, %c0_45] : memref<1x128xf32, #tpu.memory_space<vmem>>, vector<1x128xf32>
    tpu.vector_store %arg16[%c0_44, %c0_45], %69 {strides = array<i32>} : memref<1x128xf32, #tpu.memory_space<vmem>>, vector<1x128xf32>,
    return
  }
  func.func @transform_0(%arg0: i32) -> (i32, i32) {
    %c0_i32 = arith.constant 0 : i32
    %c0_i32_0 = arith.constant 0 : i32
    return %arg0, %c0_i32 : i32, i32
  }
  func.func @transform_1(%arg0: i32) -> (i32, i32) {
    %c0_i32 = arith.constant 0 : i32
    %c0_i32_0 = arith.constant 0 : i32
    %c0_i32_1 = arith.constant 0 : i32
    return %c0_i32, %c0_i32_0 : i32, i32
  }
  func.func @transform_2(%arg0: i32) -> (i32, i32) {
    %c0_i32 = arith.constant 0 : i32
    %c0_i32_0 = arith.constant 0 : i32
    %c0_i32_1 = arith.constant 0 : i32
    return %c0_i32, %c0_i32_0 : i32, i32
  }
  func.func @transform_3(%arg0: i32) -> (i32, i32) {
    %c0_i32 = arith.constant 0 : i32
    %c0_i32_0 = arith.constant 0 : i32
    %c0_i32_1 = arith.constant 0 : i32
    return %c0_i32, %c0_i32_0 : i32, i32
  }
  func.func @transform_4(%arg0: i32) -> (i32, i32) {
    %c0_i32 = arith.constant 0 : i32
    %c0_i32_0 = arith.constant 0 : i32
    %c0_i32_1 = arith.constant 0 : i32
    return %c0_i32, %c0_i32_0 : i32, i32
  }
  func.func @transform_5(%arg0: i32) -> (i32, i32) {
    %c0_i32 = arith.constant 0 : i32
    %c0_i32_0 = arith.constant 0 : i32
    %c0_i32_1 = arith.constant 0 : i32
    return %c0_i32, %c0_i32_0 : i32, i32
  }
  func.func @transform_6(%arg0: i32) -> (i32, i32) {
    %c0_i32 = arith.constant 0 : i32
    %c0_i32_0 = arith.constant 0 : i32
    %c0_i32_1 = arith.constant 0 : i32
    return %c0_i32, %c0_i32_0 : i32, i32
  }
  func.func @transform_7(%arg0: i32) -> (i32, i32) {
    %c0_i32 = arith.constant 0 : i32
    %c0_i32_0 = arith.constant 0 : i32
    %c0_i32_1 = arith.constant 0 : i32
    return %c0_i32, %c0_i32_0 : i32, i32
  }
  func.func @transform_8(%arg0: i32) -> (i32, i32) {
    %c0_i32 = arith.constant 0 : i32
    %c0_i32_0 = arith.constant 0 : i32
    %c0_i32_1 = arith.constant 0 : i32
    return %c0_i32, %c0_i32_0 : i32, i32
  }
  func.func @transform_9(%arg0: i32) -> (i32, i32) {
    %c0_i32 = arith.constant 0 : i32
    %c0_i32_0 = arith.constant 0 : i32
    %c0_i32_1 = arith.constant 0 : i32
    return %c0_i32, %c0_i32_0 : i32, i32
  }
  func.func @transform_10(%arg0: i32) -> (i32, i32) {
    %c0_i32 = arith.constant 0 : i32
    %c0_i32_0 = arith.constant 0 : i32
    %c0_i32_1 = arith.constant 0 : i32
    return %c0_i32, %c0_i32_0 : i32, i32
  }
  func.func @transform_11(%arg0: i32) -> (i32, i32) {
    %c0_i32 = arith.constant 0 : i32
    %c0_i32_0 = arith.constant 0 : i32
    %c0_i32_1 = arith.constant 0 : i32
    return %c0_i32, %c0_i32_0 : i32, i32
  }
  func.func @transform_12(%arg0: i32) -> (i32, i32) {
    %c0_i32 = arith.constant 0 : i32
    %c0_i32_0 = arith.constant 0 : i32
    %c0_i32_1 = arith.constant 0 : i32
    return %c0_i32, %c0_i32_0 : i32, i32
  }
  func.func @transform_13(%arg0: i32) -> (i32, i32) {
    %c0_i32 = arith.constant 0 : i32
    %c0_i32_0 = arith.constant 0 : i32
    %c0_i32_1 = arith.constant 0 : i32
    return %c0_i32, %c0_i32_0 : i32, i32
  }
  func.func @transform_14(%arg0: i32) -> (i32, i32) {
    %c0_i32 = arith.constant 0 : i32
    %c0_i32_0 = arith.constant 0 : i32
    %c0_i32_1 = arith.constant 0 : i32
    return %c0_i32, %c0_i32_0 : i32, i32
  }
  func.func @transform_15(%arg0: i32) -> (i32, i32) {
    %c0_i32 = arith.constant 0 : i32
    %c0_i32_0 = arith.constant 0 : i32
    return %c0_i32, %arg0 : i32, i32
  }
}

</mosaic_0001>

<bundles_post_ra>
// kernel: tpu_custom_call.1
= control target key start
LH: loop header
LB: loop body
LE: loop exit
PB: predicated region body
PF: predicated region fallthrough
CT: control target
= control target key end

     0   :  { %vm118_vm0 = vcmask 1043456   ;;  %vm69_vm1 = vcmask 31744   ;;  %s2406_s0 = inlined_call_operand.vmem [shape: f32[128,4], index: 0, kind: input, shape index: {}]   ;;  %s2407_s1 = inlined_call_operand.vmem [shape: f32[4,14], index: 1, kind: input, shape index: {}]   ;;  %s2408_s2 = inlined_call_operand.vmem [shape: s32[1,14], index: 2, kind: input, shape index: {}]   ;;  %s2409_s3 = inlined_call_operand.vmem [shape: f32[1,14], index: 3, kind: input, shape index: {}]   ;;  %s2410_s4 = inlined_call_operand.vmem [shape: f32[14,32], index: 4, kind: input, shape index: {}]   ;;  %s2411_s5 = inlined_call_operand.vmem [shape: f32[1,32], index: 5, kind: input, shape index: {}]   ;;  %s2412_s6 = inlined_call_operand.vmem [shape: f32[1,4], index: 6, kind: input, shape index: {}]   ;;  %s2413_s7 = inlined_call_operand.vmem [shape: f32[32,32], index: 7, kind: input, shape index: {}]   ;;  %s2414_s8 = inlined_call_operand.vmem [shape: f32[1,32], index: 8, kind: input, shape index: {}]   ;;  %s2415_s9 = inlined_call_operand.vmem [shape: f32[32,32], index: 9, kind: input, shape index: {}]   ;;  %s2416_s10 = inlined_call_operand.vmem [shape: f32[1,32], index: 10, kind: input, shape index: {}]   ;;  %s2417_s11 = inlined_call_operand.vmem [shape: f32[32,32], index: 11, kind: input, shape index: {}]   ;;  %s2418_s12 = inlined_call_operand.vmem [shape: f32[1,32], index: 12, kind: input, shape index: {}]   ;;  %s2419_s13 = inlined_call_operand.vmem [shape: f32[1,32], index: 13, kind: input, shape index: {}]   ;;  %s2420_s14 = inlined_call_operand.<no memory space> [shape: f32[1,1], index: 14, kind: input, shape index: {}]   ;;  %s2421_s15 = inlined_call_operand.hbm [shape: f32[1,128], index: 15, kind: output, shape index: {}]  }
   0x1   :  { %v68_v0 = vld [vmem:[%s2407_s1] sm:$0xf] }
   0x2   :  { %v52_v1 = vld [vmem:[%s2406_s0] sm:$0xff]  ;;  %1349 = vmatpush.msk.msra.mxu0 %vm118_vm0, %v68_v0 }
   0x3   :  { %1350 = vmatmul.msk.f32.vlgmr.msra.gmra.mxu0 %vm69_vm1, %v52_v1 }
   0x4   :  { %21 = vsyncpa [#allocation4], 0  ;;  %v53_v2 = vld [vmem:[%s2406_s0 + $0x8] sm:$0xff]  ;;  %v54_v3 = vld [vmem:[%s2406_s0 + $0x10] sm:$0xff]  ;;  %vm382_vm2 = vcmask 1045504   ;;  %v187_v21 = vlaneseq  ;;  %v1647_v35 = vmov 0.0  }
   0x5   :  { %v55_v4 = vld [vmem:[%s2406_s0 + $0x18] sm:$0xff]  ;;  %v56_v5 = vld [vmem:[%s2406_s0 + $0x20] sm:$0xff]  ;;  %v57_v6 = vld [vmem:[%s2406_s0 + $0x28] sm:$0xff]  ;;  %vm333_vm6 = vcmask 113664   ;;  %s1648_s28 = smov 120   ;;  %s1649_s29 = smov 112  }
   0x6   :  { %v58_v7 = vld [vmem:[%s2406_s0 + $0x30] sm:$0xff]  ;;  %v59_v8 = vld [vmem:[%s2406_s0 + $0x38] sm:$0xff]  ;;  %v60_v9 = vld [vmem:[%s2406_s0 + $0x40] sm:$0xff]  ;;  %v1820_v28 = vand.u32 127, %v187_v21  ;;  %s1652_s1 = smov [#allocation3]  }
   0x7   :  { %v61_v10 = vld [vmem:[%s2406_s0 + $0x48] sm:$0xff]  ;;  %v62_v11 = vld [vmem:[%s2406_s0 + $0x50] sm:$0xff]  ;;  %v63_v12 = vld [vmem:[%s2406_s0 + $0x58] sm:$0xff]  ;;  %s1338_s26 = sshll.u32 %s1652_s1, 4  ;;  %s1339_s26 = int_to_ptr.vmem [resolvable:$true] %s1338_s26 }
   0x8   :  { %v64_v13 = vld [vmem:[%s2406_s0 + $0x60] sm:$0xff]  ;;  %v65_v14 = vld [vmem:[%s2406_s0 + $0x68] sm:$0xff]  ;;  %v1801_v17 = vld [vmem:[%s2406_s0 + $0x70] sm:$0xff] }
   0x9   :  { %v328_v15 = vld [vmem:[%s2410_s4 + $0x8] sm:$0x3f]  ;;  %v327_v16 = vld [vmem:[%s2410_s4] sm:$0xff]  ;;  %v1808_v18 = vld [vmem:[%s2406_s0 + $0x78] sm:$0xff] }
   0xa   :  { %1382 = vmatpush.msk.msra.mxu1 %vm382_vm2, %v328_v15  ;;  %v271_v19 = vld [vmem:[%s2409_s3] sm:$0x1] }
   0xb   :  { %1351 = vmatmul.msk.f32.gmra.mxu0 %vm69_vm1, %v53_v2  ;;  %v1818_v24 = vld [vmem:[%s2408_s2] ss:$0 sm:$0xff]  ;;  %v291_v25 = vsub.f32 1.0, %v271_v19  ;;  %s1340_s2 = sshll.u32 %s2421_s15, 4  ;;  %s1341_s2 = int_to_ptr.hbm [resolvable:$true] %s1340_s2 }
   0xc   :  { %401 = vmatpush.msra.mxu1 %v327_v16  ;;  %v1826_v30 = vld [vmem:[%s2409_s3] ss:$0 sm:$0xff] }
   0xd   :  { %v1828_v31 = vperm.slane %v291_v25, 0 }
  0x13   :  { %1352 = vmatmul.msk.f32.gmra.mxu0 %vm69_vm1, %v54_v3 }
  0x1b   :  { %1353 = vmatmul.msk.f32.gmra.mxu0 %vm69_vm1, %v55_v4 }
  0x23   :  { %1354 = vmatmul.msk.f32.gmra.mxu0 %vm69_vm1, %v56_v5 }
  0x2b   :  { %1355 = vmatmul.msk.f32.gmra.mxu0 %vm69_vm1, %v57_v6 }
  0x33   :  { %1356 = vmatmul.msk.f32.gmra.mxu0 %vm69_vm1, %v58_v7 }
  0x3b   :  { %1357 = vmatmul.msk.f32.gmra.mxu0 %vm69_vm1, %v59_v8 }
  0x43   :  { %1358 = vmatmul.msk.f32.gmra.mxu0 %vm69_vm1, %v60_v9 }
  0x4b   :  { %1359 = vmatmul.msk.f32.gmra.mxu0 %vm69_vm1, %v61_v10 }
  0x53   :  { %1360 = vmatmul.msk.f32.gmra.mxu0 %vm69_vm1, %v62_v11 }
  0x5b   :  { %1361 = vmatmul.msk.f32.gmra.mxu0 %vm69_vm1, %v63_v12 }
  0x63   :  { %1362 = vmatmul.msk.f32.gmra.mxu0 %vm69_vm1, %v64_v13 }
  0x6b   :  { %1363 = vmatmul.msk.f32.gmra.mxu0 %vm69_vm1, %v65_v14 }
  0x73   :  { %1364 = vmatmul.msk.f32.gmra.mxu0 %vm69_vm1, %v1801_v17 }
  0x7b   :  { %1365 = vmatmul.msk.f32.gmra.mxu0 %vm69_vm1, %v1808_v18 }
  0x80   :  { %v139_v20 = vpop.f32.mrf.mxu0 }
  0x81   :  { %vm1515_vm3 = vcmp.lt.s32.totalorder %v139_v20, 0  ;;  %v1516_v22 = vceil.f32 %v139_v20  ;;  %v1517_v23 = vfloor.f32 %v139_v20  ;;  %v275_v37 = vmul.f32 %v1826_v30, %v139_v20 }
  0x83   :  { %v1518_v26 = vsel %vm1515_vm3, %v1516_v22, %v1517_v23 }
  0x84   :  { %v1519_v27 = vcvt.f32.s32 %v1518_v26 }
  0x86   :  { %v207_v29 = vadd.s32 %v1818_v24, %v1519_v27 }
  0x88   :  { %v142_v32 = vpop.f32.mrf.mxu0  ;;  %vm223_vm4 = vcmp.eq.s32.totalorder %v1820_v28, %v207_v29 }
  0x89   :  { %vm1520_vm5 = vcmp.lt.s32.totalorder %v142_v32, 0  ;;  %v1521_v33 = vceil.f32 %v142_v32  ;;  %v1522_v34 = vfloor.f32 %v142_v32  ;;  %v1366_v36 = vsel %vm223_vm4, 1.0, %v1647_v35 }
  0x8a   :  { %v295_v38 = vmul.f32 %v1366_v36, %v1828_v31  ;;  %v276_v47 = vmul.f32 %v1826_v30, %v142_v32 }
  0x8b   :  { %v1523_v39 = vsel %vm1520_vm5, %v1521_v33, %v1522_v34 }
  0x8c   :  { %v1524_v40 = vcvt.f32.s32 %v1523_v39  ;;  %v311_v41 = vadd.f32 %v295_v38, %v275_v37 }
  0x8e   :  { %1383 = vmatmul.msk.f32.vlgmr.msra.gmra.mxu1 %vm333_vm6, %v311_v41  ;;  %v208_v42 = vadd.s32 %v1818_v24, %v1524_v40 }
  0x90   :  { %v145_v43 = vpop.f32.mrf.mxu0  ;;  %vm224_vm7 = vcmp.eq.s32.totalorder %v1820_v28, %v208_v42 }
  0x91   :  { %vm1525_vm8 = vcmp.lt.s32.totalorder %v145_v43, 0  ;;  %v1526_v44 = vceil.f32 %v145_v43  ;;  %v1527_v45 = vfloor.f32 %v145_v43  ;;  %v1367_v46 = vsel %vm224_vm7, 1.0, %v1647_v35 }
  0x92   :  { %v296_v48 = vmul.f32 %v1367_v46, %v1828_v31  ;;  %v277_v57 = vmul.f32 %v1826_v30, %v145_v43 }
  0x93   :  { %v1528_v49 = vsel %vm1525_vm8, %v1526_v44, %v1527_v45 }
  0x94   :  { %v1529_v50 = vcvt.f32.s32 %v1528_v49  ;;  %v312_v51 = vadd.f32 %v296_v48, %v276_v47 }
  0x96   :  { %1384 = vmatmul.msk.f32.gmra.mxu1 %vm333_vm6, %v312_v51  ;;  %v209_v52 = vadd.s32 %v1818_v24, %v1529_v50 }
  0x98   :  { %v148_v53 = vpop.f32.mrf.mxu0  ;;  %vm225_vm9 = vcmp.eq.s32.totalorder %v1820_v28, %v209_v52 }
  0x99   :  { %vm1530_vm10 = vcmp.lt.s32.totalorder %v148_v53, 0  ;;  %v1531_v54 = vceil.f32 %v148_v53  ;;  %v1532_v55 = vfloor.f32 %v148_v53  ;;  %v1368_v56 = vsel %vm225_vm9, 1.0, %v1647_v35 }
  0x9a   :  { %v297_v58 = vmul.f32 %v1368_v56, %v1828_v31  ;;  %v278_v3 = vmul.f32 %v1826_v30, %v148_v53 }
  0x9b   :  { %v1533_v59 = vsel %vm1530_vm10, %v1531_v54, %v1532_v55 }
  0x9c   :  { %v1534_v60 = vcvt.f32.s32 %v1533_v59  ;;  %v313_v61 = vadd.f32 %v297_v58, %v277_v57 }
  0x9e   :  { %1385 = vmatmul.msk.f32.gmra.mxu1 %vm333_vm6, %v313_v61  ;;  %v210_v62 = vadd.s32 %v1818_v24, %v1534_v60 }
  0xa0   :  { %v151_v63 = vpop.f32.mrf.mxu0  ;;  %vm226_vm11 = vcmp.eq.s32.totalorder %v1820_v28, %v210_v62 }
  0xa1   :  { %vm1535_vm12 = vcmp.lt.s32.totalorder %v151_v63, 0  ;;  %v1536_v0 = vceil.f32 %v151_v63  ;;  %v1537_v1 = vfloor.f32 %v151_v63  ;;  %v1369_v2 = vsel %vm226_vm11, 1.0, %v1647_v35 }
  0xa2   :  { %v298_v4 = vmul.f32 %v1369_v2, %v1828_v31  ;;  %v279_v13 = vmul.f32 %v1826_v30, %v151_v63 }
  0xa3   :  { %v1538_v5 = vsel %vm1535_vm12, %v1536_v0, %v1537_v1 }
  0xa4   :  { %v1539_v6 = vcvt.f32.s32 %v1538_v5  ;;  %v314_v7 = vadd.f32 %v298_v4, %v278_v3 }
  0xa6   :  { %1386 = vmatmul.msk.f32.gmra.mxu1 %vm333_vm6, %v314_v7  ;;  %v211_v8 = vadd.s32 %v1818_v24, %v1539_v6 }
  0xa8   :  { %v154_v9 = vpop.f32.mrf.mxu0  ;;  %vm227_vm13 = vcmp.eq.s32.totalorder %v1820_v28, %v211_v8 }
  0xa9   :  { %vm1540_vm14 = vcmp.lt.s32.totalorder %v154_v9, 0  ;;  %v1541_v10 = vceil.f32 %v154_v9  ;;  %v1542_v11 = vfloor.f32 %v154_v9  ;;  %v1370_v12 = vsel %vm227_vm13, 1.0, %v1647_v35 }
  0xaa   :  { %v299_v14 = vmul.f32 %v1370_v12, %v1828_v31  ;;  %v280_v26 = vmul.f32 %v1826_v30, %v154_v9 }
  0xab   :  { %v1543_v15 = vsel %vm1540_vm14, %v1541_v10, %v1542_v11 }
  0xac   :  { %v1544_v16 = vcvt.f32.s32 %v1543_v15  ;;  %v315_v19 = vadd.f32 %v299_v14, %v279_v13 }
  0xae   :  { %1387 = vmatmul.msk.f32.gmra.mxu1 %vm333_vm6, %v315_v19  ;;  %v212_v20 = vadd.s32 %v1818_v24, %v1544_v16 }
  0xb0   :  { %v157_v21 = vpop.f32.mrf.mxu0  ;;  %vm228_vm15 = vcmp.eq.s32.totalorder %v1820_v28, %v212_v20 }
  0xb1   :  { %vm1545_vm0 = vcmp.lt.s32.totalorder %v157_v21, 0  ;;  %v1546_v22 = vceil.f32 %v157_v21  ;;  %v1547_v23 = vfloor.f32 %v157_v21  ;;  %v1371_v25 = vsel %vm228_vm15, 1.0, %v1647_v35 }
  0xb2   :  { %v300_v27 = vmul.f32 %v1371_v25, %v1828_v31  ;;  %v281_v40 = vmul.f32 %v1826_v30, %v157_v21 }
  0xb3   :  { %v1548_v29 = vsel %vm1545_vm0, %v1546_v22, %v1547_v23 }
  0xb4   :  { %v1549_v32 = vcvt.f32.s32 %v1548_v29  ;;  %v316_v33 = vadd.f32 %v300_v27, %v280_v26 }
  0xb6   :  { %1388 = vmatmul.msk.f32.gmra.mxu1 %vm333_vm6, %v316_v33  ;;  %v213_v34 = vadd.s32 %v1818_v24, %v1549_v32 }
  0xb8   :  { %v160_v36 = vpop.f32.mrf.mxu0  ;;  %vm229_vm2 = vcmp.eq.s32.totalorder %v1820_v28, %v213_v34 }
  0xb9   :  { %vm1550_vm3 = vcmp.lt.s32.totalorder %v160_v36, 0  ;;  %v1551_v37 = vceil.f32 %v160_v36  ;;  %v1552_v38 = vfloor.f32 %v160_v36  ;;  %v1372_v39 = vsel %vm229_vm2, 1.0, %v1647_v35 }
  0xba   :  { %v301_v41 = vmul.f32 %v1372_v39, %v1828_v31  ;;  %v282_v51 = vmul.f32 %v1826_v30, %v160_v36 }
  0xbb   :  { %v1553_v42 = vsel %vm1550_vm3, %v1551_v37, %v1552_v38 }
  0xbc   :  { %v1554_v43 = vcvt.f32.s32 %v1553_v42  ;;  %v317_v44 = vadd.f32 %v301_v41, %v281_v40 }
  0xbe   :  { %1389 = vmatmul.msk.f32.gmra.mxu1 %vm333_vm6, %v317_v44  ;;  %v214_v45 = vadd.s32 %v1818_v24, %v1554_v43 }
  0xc0   :  { %v163_v46 = vpop.f32.mrf.mxu0  ;;  %vm230_vm4 = vcmp.eq.s32.totalorder %v1820_v28, %v214_v45 }
  0xc1   :  { %vm1555_vm5 = vcmp.lt.s32.totalorder %v163_v46, 0  ;;  %v1556_v47 = vceil.f32 %v163_v46  ;;  %v1557_v48 = vfloor.f32 %v163_v46  ;;  %v1373_v49 = vsel %vm230_vm4, 1.0, %v1647_v35 }
  0xc2   :  { %v302_v52 = vmul.f32 %v1373_v49, %v1828_v31  ;;  %v283_v60 = vmul.f32 %v1826_v30, %v163_v46 }
  0xc3   :  { %v1558_v50 = vsel %vm1555_vm5, %v1556_v47, %v1557_v48 }
  0xc4   :  { %v1559_v53 = vcvt.f32.s32 %v1558_v50  ;;  %v318_v54 = vadd.f32 %v302_v52, %v282_v51 }
  0xc6   :  { %v215_v55 = vadd.s32 %v1818_v24, %v1559_v53  ;;  %1390 = vmatmul.msk.f32.gmra.mxu1 %vm333_vm6, %v318_v54 }
  0xc8   :  { %v166_v56 = vpop.f32.mrf.mxu0  ;;  %vm231_vm7 = vcmp.eq.s32.totalorder %v1820_v28, %v215_v55 }
  0xc9   :  { %vm1560_vm8 = vcmp.lt.s32.totalorder %v166_v56, 0  ;;  %v1561_v57 = vceil.f32 %v166_v56  ;;  %v1562_v58 = vfloor.f32 %v166_v56  ;;  %v1374_v59 = vsel %vm231_vm7, 1.0, %v1647_v35 }
  0xca   :  { %v303_v62 = vmul.f32 %v1374_v59, %v1828_v31  ;;  %v284_v6 = vmul.f32 %v1826_v30, %v166_v56 }
  0xcb   :  { %v1563_v61 = vsel %vm1560_vm8, %v1561_v57, %v1562_v58  ;;  %vm675_vm8 = vcmask 64512  }
  0xcc   :  { %v1564_v63 = vcvt.f32.s32 %v1563_v61  ;;  %v319_v0 = vadd.f32 %v303_v62, %v283_v60 }
  0xce   :  { %v216_v1 = vadd.s32 %v1818_v24, %v1564_v63  ;;  %1391 = vmatmul.msk.f32.gmra.mxu1 %vm333_vm6, %v319_v0 }
  0xd0   :  { %v169_v2 = vpop.f32.mrf.mxu0  ;;  %vm232_vm9 = vcmp.eq.s32.totalorder %v1820_v28, %v216_v1 }
  0xd1   :  { %vm1565_vm10 = vcmp.lt.s32.totalorder %v169_v2, 0  ;;  %v1566_v3 = vceil.f32 %v169_v2  ;;  %v1567_v4 = vfloor.f32 %v169_v2  ;;  %v1375_v5 = vsel %vm232_vm9, 1.0, %v1647_v35 }
  0xd2   :  { %v304_v8 = vmul.f32 %v1375_v5, %v1828_v31  ;;  %v285_v16 = vmul.f32 %v1826_v30, %v169_v2 }
  0xd3   :  { %v1568_v7 = vsel %vm1565_vm10, %v1566_v3, %v1567_v4 }
  0xd4   :  { %v1569_v9 = vcvt.f32.s32 %v1568_v7  ;;  %v320_v10 = vadd.f32 %v304_v8, %v284_v6 }
  0xd6   :  { %v217_v11 = vadd.s32 %v1818_v24, %v1569_v9  ;;  %1392 = vmatmul.msk.f32.gmra.mxu1 %vm333_vm6, %v320_v10 }
  0xd8   :  { %v172_v12 = vpop.f32.mrf.mxu0  ;;  %vm233_vm11 = vcmp.eq.s32.totalorder %v1820_v28, %v217_v11 }
  0xd9   :  { %vm1570_vm12 = vcmp.lt.s32.totalorder %v172_v12, 0  ;;  %v1571_v13 = vceil.f32 %v172_v12  ;;  %v1572_v14 = vfloor.f32 %v172_v12  ;;  %v1376_v15 = vsel %vm233_vm11, 1.0, %v1647_v35 }
  0xda   :  { %v305_v20 = vmul.f32 %v1376_v15, %v1828_v31  ;;  %v286_v32 = vmul.f32 %v1826_v30, %v172_v12 }
  0xdb   :  { %v1573_v19 = vsel %vm1570_vm12, %v1571_v13, %v1572_v14 }
  0xdc   :  { %v1574_v21 = vcvt.f32.s32 %v1573_v19  ;;  %v321_v22 = vadd.f32 %v305_v20, %v285_v16 }
  0xde   :  { %v218_v23 = vadd.s32 %v1818_v24, %v1574_v21  ;;  %1393 = vmatmul.msk.f32.gmra.mxu1 %vm333_vm6, %v321_v22 }
  0xe0   :  { %v175_v25 = vpop.f32.mrf.mxu0  ;;  %vm234_vm13 = vcmp.eq.s32.totalorder %v1820_v28, %v218_v23 }
  0xe1   :  { %vm1575_vm14 = vcmp.lt.s32.totalorder %v175_v25, 0  ;;  %v1576_v26 = vceil.f32 %v175_v25  ;;  %v1577_v27 = vfloor.f32 %v175_v25  ;;  %v1377_v29 = vsel %vm234_vm13, 1.0, %v1647_v35 }
  0xe2   :  { %v306_v34 = vmul.f32 %v1377_v29, %v1828_v31  ;;  %v287_v43 = vmul.f32 %v1826_v30, %v175_v25 }
  0xe3   :  { %v1578_v33 = vsel %vm1575_vm14, %v1576_v26, %v1577_v27 }
  0xe4   :  { %v1579_v36 = vcvt.f32.s32 %v1578_v33  ;;  %v322_v37 = vadd.f32 %v306_v34, %v286_v32 }
  0xe6   :  { %v219_v38 = vadd.s32 %v1818_v24, %v1579_v36  ;;  %1394 = vmatmul.msk.f32.gmra.mxu1 %vm333_vm6, %v322_v37 }
  0xe8   :  { %v178_v39 = vpop.f32.mrf.mxu0  ;;  %vm235_vm15 = vcmp.eq.s32.totalorder %v1820_v28, %v219_v38 }
  0xe9   :  { %vm1580_vm0 = vcmp.lt.s32.totalorder %v178_v39, 0  ;;  %v1581_v40 = vceil.f32 %v178_v39  ;;  %v1582_v41 = vfloor.f32 %v178_v39  ;;  %v1378_v42 = vsel %vm235_vm15, 1.0, %v1647_v35 }
  0xea   :  { %v307_v45 = vmul.f32 %v1378_v42, %v1828_v31  ;;  %v288_v53 = vmul.f32 %v1826_v30, %v178_v39 }
  0xeb   :  { %v1583_v44 = vsel %vm1580_vm0, %v1581_v40, %v1582_v41 }
  0xec   :  { %v1584_v46 = vcvt.f32.s32 %v1583_v44  ;;  %v323_v47 = vadd.f32 %v307_v45, %v287_v43 }
  0xee   :  { %v220_v48 = vadd.s32 %v1818_v24, %v1584_v46  ;;  %1395 = vmatmul.msk.f32.gmra.mxu1 %vm333_vm6, %v323_v47 }
  0xf0   :  { %v181_v49 = vpop.f32.mrf.mxu0  ;;  %vm236_vm2 = vcmp.eq.s32.totalorder %v1820_v28, %v220_v48 }
  0xf1   :  { %vm1585_vm3 = vcmp.lt.s32.totalorder %v181_v49, 0  ;;  %v1586_v50 = vceil.f32 %v181_v49  ;;  %v1587_v51 = vfloor.f32 %v181_v49  ;;  %v1379_v52 = vsel %vm236_vm2, 1.0, %v1647_v35 }
  0xf2   :  { %v308_v55 = vmul.f32 %v1379_v52, %v1828_v31  ;;  %v289_v63 = vmul.f32 %v1826_v30, %v181_v49 }
  0xf3   :  { %v1588_v54 = vsel %vm1585_vm3, %v1586_v50, %v1587_v51 }
  0xf4   :  { %v1589_v56 = vcvt.f32.s32 %v1588_v54  ;;  %v324_v57 = vadd.f32 %v308_v55, %v288_v53 }
  0xf6   :  { %v221_v58 = vadd.s32 %v1818_v24, %v1589_v56  ;;  %1396 = vmatmul.msk.f32.gmra.mxu1 %vm333_vm6, %v324_v57 }
  0xf8   :  { %v184_v59 = vpop.f32.mrf.mxu0  ;;  %vm237_vm4 = vcmp.eq.s32.totalorder %v1820_v28, %v221_v58 }
  0xf9   :  { %vm1590_vm5 = vcmp.lt.s32.totalorder %v184_v59, 0  ;;  %v1591_v60 = vceil.f32 %v184_v59  ;;  %v1592_v61 = vfloor.f32 %v184_v59  ;;  %v1380_v62 = vsel %vm237_vm4, 1.0, %v1647_v35 }
  0xfa   :  { %v309_v1 = vmul.f32 %v1380_v62, %v1828_v31  ;;  %v290_v6 = vmul.f32 %v1826_v30, %v184_v59  ;;  %v1938_v30 = vld [vmem:[%s2411_s5] ss:$0 sm:$0xff]  ;;  %s1650_s5 = smov 104   ;;  %v984_v59 = vld [vmem:[%s2415_s9 + $0x18] sm:$0xff] }
  0xfb   :  { %v1593_v0 = vsel %vm1590_vm5, %v1591_v60, %v1592_v61  ;;  %1049 = vmatpush.msrb.mxu0 %v984_v59 }
  0xfc   :  { %v1594_v2 = vcvt.f32.s32 %v1593_v0  ;;  %v325_v3 = vadd.f32 %v309_v1, %v289_v63 }
  0xfe   :  { %v222_v4 = vadd.s32 %v1818_v24, %v1594_v2  ;;  %1397 = vmatmul.msk.f32.gmra.mxu1 %vm333_vm6, %v325_v3  ;;  %v863_v3 = vld [vmem:[%s2413_s7 + $0x18] sm:$0xff] }
 0x100   :  { %vm238_vm7 = vcmp.eq.s32.totalorder %v1820_v28, %v222_v4  ;;  %v862_v4 = vld [vmem:[%s2413_s7 + $0x10] sm:$0xff] }
 0x101   :  { %v1381_v5 = vsel %vm238_vm7, 1.0, %v1647_v35 }
 0x102   :  { %v310_v7 = vmul.f32 %v1381_v5, %v1828_v31 }
 0x104   :  { %v326_v8 = vadd.f32 %v310_v7, %v290_v6  ;;  %v1651_v6 = vmov 1.0   ;;  %v861_v7 = vld [vmem:[%s2413_s7 + $0x8] sm:$0xff] }
 0x106   :  { %1398 = vmatmul.msk.f32.gmra.mxu1 %vm333_vm6, %v326_v8  ;;  %vm763_vm6 = vcmask 261120  }
 0x10b   :  { %v1925_v9 = vpop.f32.mrf.mxu1 }
 0x10c   :  { %v2107_v56 = vadd.f32 %v1938_v30, %v1925_v9 }
 0x10e   :  { %v747_v2 = vmul.f32 %v2107_v56, %v2107_v56 }
 0x113   :  { %v1927_v10 = vpop.f32.mrf.mxu1 }
 0x114   :  { %v2091_v53 = vadd.f32 %v1938_v30, %v1927_v10 }
 0x116   :  { %v748_v61 = vmul.f32 %v2091_v53, %v2091_v53 }
 0x11b   :  { %v1929_v11 = vpop.f32.mrf.mxu1 }
 0x11c   :  { %v2073_v49 = vadd.f32 %v1938_v30, %v1929_v11 }
 0x11e   :  { %v749_v60 = vmul.f32 %v2073_v49, %v2073_v49 }
 0x123   :  { %v1931_v24 = vpop.f32.mrf.mxu1 }
 0x124   :  { %v2057_v46 = vadd.f32 %v1938_v30, %v1931_v24  ;;  %v860_v24 = vld [vmem:[%s2413_s7] sm:$0xff] }
 0x126   :  { %v750_v58 = vmul.f32 %v2057_v46, %v2057_v46 }
 0x12b   :  { %v1933_v12 = vpop.f32.mrf.mxu1 }
 0x12c   :  { %v2041_v43 = vadd.f32 %v1938_v30, %v1933_v12 }
 0x12e   :  { %v751_v55 = vmul.f32 %v2041_v43, %v2041_v43 }
 0x133   :  { %v418_v28 = vpop.f32.mrf.mxu1 }
 0x134   :  { %v2025_v40 = vadd.f32 %v1938_v30, %v418_v28 }
 0x136   :  { %v752_v54 = vmul.f32 %v2025_v40, %v2025_v40 }
 0x13b   :  { %v421_v13 = vpop.f32.mrf.mxu1 }
 0x13c   :  { %v2010_v37 = vadd.f32 %v1938_v30, %v421_v13 }
 0x13e   :  { %v753_v51 = vmul.f32 %v2010_v37, %v2010_v37 }
 0x143   :  { %v424_v31 = vpop.f32.mrf.mxu1 }
 0x144   :  { %v1941_v35 = vadd.f32 %v1938_v30, %v424_v31  ;;  %v983_v31 = vld [vmem:[%s2415_s9 + $0x10] sm:$0xff] }
 0x145   :  { %1050 = vmatpush.msrb.mxu0 %v983_v31 }
 0x146   :  { %481 = vrot.lane.b32.xlu2 %v1941_v35, %s1648_s28  ;;  %v754_v50 = vmul.f32 %v1941_v35, %v1941_v35 }
 0x14b   :  { %v427_v14 = vpop.f32.mrf.mxu1 }
 0x14c   :  { %v1946_v15 = vadd.f32 %v1938_v30, %v427_v14 }
 0x14e   :  { %547 = vrot.lane.b32.xlu1 %v1946_v15, %s1649_s29  ;;  %483 = vrot.lane.b32.xlu2 %v1946_v15, %s1648_s28  ;;  %v755_v48 = vmul.f32 %v1946_v15, %v1946_v15 }
 0x153   :  { %v430_v16 = vpop.f32.mrf.mxu1 }
 0x154   :  { %v1953_v19 = vadd.f32 %v1938_v30, %v430_v16 }
 0x156   :  { %613 = vrot.lane.b32.xlu0 %v1953_v19, %s1650_s5  ;;  %549 = vrot.lane.b32.xlu1 %v1953_v19, %s1649_s29  ;;  %v756_v47 = vmul.f32 %v1953_v19, %v1953_v19 }
 0x157   :  { %485 = vrot.lane.b32.xlu2 %v1953_v19, %s1648_s28 }
 0x15b   :  { %v433_v20 = vpop.f32.mrf.mxu1 }
 0x15c   :  { %v1962_v21 = vadd.f32 %v1938_v30, %v433_v20 }
 0x15e   :  { %615 = vrot.lane.b32.xlu0 %v1962_v21, %s1650_s5  ;;  %551 = vrot.lane.b32.xlu1 %v1962_v21, %s1649_s29  ;;  %v757_v45 = vmul.f32 %v1962_v21, %v1962_v21 }
 0x15f   :  { %487 = vrot.lane.b32.xlu2 %v1962_v21, %s1648_s28 }
 0x163   :  { %v436_v22 = vpop.f32.mrf.mxu1 }
 0x164   :  { %v1971_v23 = vadd.f32 %v1938_v30, %v436_v22 }
 0x166   :  { %617 = vrot.lane.b32.xlu0 %v1971_v23, %s1650_s5  ;;  %553 = vrot.lane.b32.xlu1 %v1971_v23, %s1649_s29  ;;  %v758_v44 = vmul.f32 %v1971_v23, %v1971_v23 }
 0x167   :  { %489 = vrot.lane.b32.xlu2 %v1971_v23, %s1648_s28 }
 0x16b   :  { %v439_v25 = vpop.f32.mrf.mxu1 }
 0x16c   :  { %v1980_v26 = vadd.f32 %v1938_v30, %v439_v25 }
 0x16e   :  { %619 = vrot.lane.b32.xlu0 %v1980_v26, %s1650_s5  ;;  %555 = vrot.lane.b32.xlu1 %v1980_v26, %s1649_s29  ;;  %v759_v42 = vmul.f32 %v1980_v26, %v1980_v26 }
 0x16f   :  { %491 = vrot.lane.b32.xlu2 %v1980_v26, %s1648_s28 }
 0x173   :  { %v442_v27 = vpop.f32.mrf.mxu1 }
 0x174   :  { %v1989_v29 = vadd.f32 %v1938_v30, %v442_v27 }
 0x176   :  { %621 = vrot.lane.b32.xlu0 %v1989_v29, %s1650_s5  ;;  %557 = vrot.lane.b32.xlu1 %v1989_v29, %s1649_s29  ;;  %v760_v41 = vmul.f32 %v1989_v29, %v1989_v29 }
 0x177   :  { %493 = vrot.lane.b32.xlu2 %v1989_v29, %s1648_s28 }
 0x17b   :  { %v445_v32 = vpop.f32.mrf.mxu1 }
 0x17c   :  { %v1998_v33 = vadd.f32 %v1938_v30, %v445_v32 }
 0x17e   :  { %623 = vrot.lane.b32.xlu0 %v1998_v33, %s1650_s5  ;;  %495 = vrot.lane.b32.xlu1 %v1998_v33, %s1648_s28  ;;  %v761_v39 = vmul.f32 %v1998_v33, %v1998_v33 }
 0x17f   :  { %559 = vrot.lane.b32.xlu2 %v1998_v33, %s1649_s29 }
 0x183   :  { %v448_v34 = vpop.f32.mrf.mxu1 }
 0x184   :  { %v2007_v36 = vadd.f32 %v1938_v30, %v448_v34 }
 0x186   :  { %625 = vrot.lane.b32.xlu1 %v2007_v36, %s1650_s5  ;;  %497 = vrot.lane.b32.xlu0 %v2007_v36, %s1648_s28  ;;  %v762_v38 = vmul.f32 %v2007_v36, %v2007_v36 }
 0x187   :  { %479 = vrot.lane.b32.xlu2 %v2010_v37, %s1648_s28 }
 0x188   :  { %1416 = vmatpush.xpose.msk.msra.mxu3 %vm763_vm6, %v762_v38 }
 0x18c   :  { %1417 = vmatpush.xpose.msk.msra.mxu3 %vm763_vm6, %v761_v39 }
 0x18e   :  { %545 = vrot.lane.b32.xlu1 %v1941_v35, %s1649_s29  ;;  %561 = vrot.lane.b32.xlu0 %v2007_v36, %s1649_s29 }
 0x18f   :  { %477 = vrot.lane.b32.xlu2 %v2025_v40, %s1648_s28 }
 0x190   :  { %1418 = vmatpush.xpose.msk.msra.mxu3 %vm763_vm6, %v760_v41 }
 0x194   :  { %1419 = vmatpush.xpose.msk.msra.mxu3 %vm763_vm6, %v759_v42  ;;  %v982_v42 = vld [vmem:[%s2415_s9 + $0x8] sm:$0xff] }
 0x195   :  { %1051 = vmatpush.msrb.mxu0 %v982_v42 }
 0x196   :  { %543 = vrot.lane.b32.xlu1 %v2010_v37, %s1649_s29  ;;  %611 = vrot.lane.b32.xlu0 %v1946_v15, %s1650_s5 }
 0x197   :  { %475 = vrot.lane.b32.xlu2 %v2041_v43, %s1648_s28 }
 0x198   :  { %1420 = vmatpush.xpose.msk.msra.mxu3 %vm763_vm6, %v758_v44 }
 0x19c   :  { %1421 = vmatpush.xpose.msk.msra.mxu3 %vm763_vm6, %v757_v45 }
 0x19e   :  { %541 = vrot.lane.b32.xlu1 %v2025_v40, %s1649_s29  ;;  %609 = vrot.lane.b32.xlu0 %v1941_v35, %s1650_s5 }
 0x19f   :  { %473 = vrot.lane.b32.xlu2 %v2057_v46, %s1648_s28 }
 0x1a0   :  { %1422 = vmatpush.xpose.msk.msra.mxu3 %vm763_vm6, %v756_v47  ;;  %v2086_v52 = vpop.permute.xlu2 %481 }
 0x1a4   :  { %1423 = vmatpush.xpose.msk.msra.mxu3 %vm763_vm6, %v755_v48 }
 0x1a6   :  { %539 = vrot.lane.b32.xlu1 %v2041_v43, %s1649_s29  ;;  %607 = vrot.lane.b32.xlu0 %v2010_v37, %s1650_s5 }
 0x1a7   :  { %471 = vrot.lane.b32.xlu2 %v2073_v49, %s1648_s28 }
 0x1a8   :  { %1424 = vmatpush.xpose.msk.msra.mxu3 %vm763_vm6, %v754_v50  ;;  %v484_v57 = vpop.permute.xlu2 %483 }
 0x1a9   :  { %v523_v62 = vadd.f32 %v484_v57, %v1946_v15 }
 0x1ac   :  { %1425 = vmatpush.xpose.msk.msra.mxu3 %vm763_vm6, %v753_v51 }
 0x1ae   :  { %537 = vrot.lane.b32.xlu1 %v2057_v46, %s1649_s29  ;;  %605 = vrot.lane.b32.xlu0 %v2025_v40, %s1650_s5 }
 0x1af   :  { %469 = vrot.lane.b32.xlu2 %v2091_v53, %s1648_s28 }
 0x1b0   :  { %1426 = vmatpush.xpose.msk.msra.mxu3 %vm763_vm6, %v752_v54 }
 0x1b1   :  { %v486_v63 = vpop.permute.xlu2 %485 }
 0x1b2   :  { %v524_v5 = vadd.f32 %v486_v63, %v1953_v19 }
 0x1b4   :  { %1427 = vmatpush.xpose.msk.msra.mxu3 %vm763_vm6, %v751_v55 }
 0x1b6   :  { %535 = vrot.lane.b32.xlu1 %v2073_v49, %s1649_s29  ;;  %603 = vrot.lane.b32.xlu0 %v2041_v43, %s1650_s5 }
 0x1b7   :  { %467 = vrot.lane.b32.xlu2 %v2107_v56, %s1648_s28 }
 0x1b8   :  { %1428 = vmatpush.xpose.msk.msra.mxu3 %vm763_vm6, %v750_v58 }
 0x1b9   :  { %v488_v10 = vpop.permute.xlu2 %487 }
 0x1ba   :  { %v525_v31 = vadd.f32 %v488_v10, %v1962_v21  ;;  %v981_v10 = vld [vmem:[%s2415_s9] sm:$0xff] }
 0x1bb   :  { %1052 = vmatpush.msrb.mxu0 %v981_v10 }
 0x1bc   :  { %1429 = vmatpush.xpose.msk.msra.mxu3 %vm763_vm6, %v749_v60 }
 0x1be   :  { %533 = vrot.lane.b32.xlu1 %v2091_v53, %s1649_s29  ;;  %601 = vrot.lane.b32.xlu0 %v2057_v46, %s1650_s5 }
 0x1bf   :  { %595 = vrot.lane.b32.xlu2 %v2107_v56, %s1650_s5 }
 0x1c0   :  { %v548_v0 = vpop.permute.xlu1 %547  ;;  %1430 = vmatpush.xpose.msk.msra.mxu3 %vm763_vm6, %v748_v61 }
 0x1c1   :  { %v2134_v1 = vadd.f32 %v548_v0, %v523_v62  ;;  %v490_v30 = vpop.permute.xlu2 %489 }
 0x1c4   :  { %1431 = vmatpush.xpose.msk.msra.mxu3 %vm763_vm6, %v747_v2 }
 0x1c6   :  { %531 = vrot.lane.b32.xlu1 %v2107_v56, %s1649_s29  ;;  %599 = vrot.lane.b32.xlu0 %v2073_v49, %s1650_s5 }
 0x1c7   :  { %1432 = vmatmul.msk.f32.vlgmr.msra.gmra.mxu3 %vm763_vm6, %v1651_v6 }
 0x1c8   :  { %912 = vmatpush.msrb.mxu3 %v863_v3  ;;  %v614_v8 = vpop.permute.xlu0 %613  ;;  %v550_v9 = vpop.permute.xlu1 %549 }
 0x1c9   :  { %v588_v11 = vadd.f32 %v550_v9, %v524_v5  ;;  %v492_v20 = vpop.permute.xlu2 %491 }
 0x1ca   :  { %913 = vmatpush.msrb.mxu3 %v862_v4  ;;  %v527_v0 = vadd.f32 %v492_v20, %v1980_v26 }
 0x1cb   :  { %v2158_v12 = vadd.f32 %v614_v8, %v588_v11  ;;  %v526_v8 = vadd.f32 %v490_v30, %v1971_v23 }
 0x1cc   :  { %914 = vmatpush.msrb.mxu3 %v861_v7 }
 0x1ce   :  { %915 = vmatpush.msrb.mxu3 %v860_v24  ;;  %597 = vrot.lane.b32.xlu0 %v2091_v53, %s1650_s5 }
 0x1cf   :  { %1450 = vmatmul.msk.f32.vlgmr.msrb.gmra.mxu3 %vm763_vm6, %v2107_v56 }
 0x1d0   :  { %v2164_v28 = vpop.permute.xlu0 %615  ;;  %v552_v13 = vpop.permute.xlu1 %551 }
 0x1d1   :  { %v494_v27 = vpop.permute.xlu2 %493 }
 0x1d2   :  { %v528_v58 = vadd.f32 %v494_v27, %v1989_v29 }
 0x1d7   :  { %1451 = vmatmul.msk.f32.gmra.mxu3 %vm763_vm6, %v2091_v53 }
 0x1d8   :  { %v618_v14 = vpop.permute.xlu0 %617  ;;  %v554_v16 = vpop.permute.xlu1 %553 }
 0x1d9   :  { %v560_v41 = vpop.permute.xlu2 %559  ;;  %v590_v9 = vadd.f32 %v554_v16, %v526_v8 }
 0x1df   :  { %1452 = vmatmul.msk.f32.gmra.mxu3 %vm763_vm6, %v2073_v49 }
 0x1e0   :  { %v620_v22 = vpop.permute.xlu0 %619  ;;  %v556_v25 = vpop.permute.xlu1 %555 }
 0x1e1   :  { %v480_v47 = vpop.permute.xlu2 %479  ;;  %v591_v4 = vadd.f32 %v556_v25, %v527_v0  ;;  %v589_v25 = vadd.f32 %v552_v13, %v525_v31 }
 0x1e3   :  { %v655_v11 = vadd.f32 %v620_v22, %v591_v4  ;;  %v653_v30 = vadd.f32 %v2164_v28, %v589_v25  ;;  %v522_v28 = vadd.f32 %v2086_v52, %v1941_v35 }
 0x1e5   :  { %v669_v13 = vmul.f32 %v653_v30, %v653_v30  ;;  %v1609_v30 = vld [vmem:[%s2406_s0 + $0x58] sm:$0xff] }
 0x1e7   :  { %1453 = vmatmul.msk.f32.gmra.mxu3 %vm763_vm6, %v2057_v46 }
 0x1e8   :  { %v622_v32 = vpop.permute.xlu0 %621  ;;  %v558_v34 = vpop.permute.xlu1 %557 }
 0x1e9   :  { %v592_v60 = vadd.f32 %v558_v34, %v528_v58  ;;  %v478_v61 = vpop.permute.xlu2 %477 }
 0x1ea   :  { %v520_v52 = vadd.f32 %v478_v61, %v2025_v40 }
 0x1eb   :  { %v656_v5 = vadd.f32 %v622_v32, %v592_v60  ;;  %v654_v32 = vadd.f32 %v618_v14, %v590_v9 }
 0x1ed   :  { %v672_v24 = vmul.f32 %v656_v5, %v656_v5  ;;  %v670_v16 = vmul.f32 %v654_v32, %v654_v32 }
 0x1ef   :  { %1454 = vmatmul.msk.f32.gmra.mxu3 %vm763_vm6, %v2041_v43 }
 0x1f0   :  { %v624_v38 = vpop.permute.xlu0 %623  ;;  %v496_v39 = vpop.permute.xlu1 %495 }
 0x1f1   :  { %v529_v48 = vadd.f32 %v496_v39, %v1998_v33  ;;  %v476_v20 = vpop.permute.xlu2 %475  ;;  %v668_v39 = vmul.f32 %v2158_v12, %v2158_v12 }
 0x1f3   :  { %v593_v55 = vadd.f32 %v560_v41, %v529_v48 }
 0x1f5   :  { %v657_v63 = vadd.f32 %v624_v38, %v593_v55  ;;  %v671_v38 = vmul.f32 %v655_v11, %v655_v11 }
 0x1f7   :  { %1455 = vmatmul.msk.f32.gmra.mxu3 %vm763_vm6, %v2025_v40  ;;  %v673_v7 = vmul.f32 %v657_v63, %v657_v63 }
 0x1f8   :  { %v626_v44 = vpop.permute.xlu1 %625  ;;  %v498_v45 = vpop.permute.xlu0 %497 }
 0x1f9   :  { %v530_v50 = vadd.f32 %v498_v45, %v2007_v36  ;;  %v474_v14 = vpop.permute.xlu2 %473  ;;  %v521_v45 = vadd.f32 %v480_v47, %v2010_v37 }
 0x1ff   :  { %1456 = vmatmul.msk.f32.gmra.mxu3 %vm763_vm6, %v2010_v37  ;;  %v519_v37 = vadd.f32 %v476_v20, %v2041_v43 }
 0x200   :  { %v546_v51 = vpop.permute.xlu1 %545  ;;  %v562_v54 = vpop.permute.xlu0 %561 }
 0x201   :  { %v594_v57 = vadd.f32 %v562_v54, %v530_v50 }
 0x203   :  { %v658_v59 = vadd.f32 %v626_v44, %v594_v57 }
 0x205   :  { %v674_v62 = vmul.f32 %v658_v59, %v658_v59  ;;  %v518_v59 = vadd.f32 %v474_v14, %v2057_v46  ;;  %v1121_v46 = vld [vmem:[%s2417_s11 + $0x18] sm:$0xff] }
 0x206   :  { %1186 = vmatpush.msrb.mxu1 %v1121_v46 }
 0x207   :  { %1399 = vmatpush.xpose.msk.msra.mxu2 %vm675_vm8, %v674_v62  ;;  %1457 = vmatmul.msk.f32.gmra.mxu3 %vm763_vm6, %v1941_v35  ;;  %v472_v35 = vpop.permute.xlu2 %471 }
 0x208   :  { %v544_v2 = vpop.permute.xlu1 %543  ;;  %v612_v3 = vpop.permute.xlu0 %611 }
 0x209   :  { %v651_v41 = vadd.f32 %v612_v3, %v2134_v1  ;;  %v585_v54 = vadd.f32 %v544_v2, %v521_v45  ;;  %v517_v2 = vadd.f32 %v472_v35, %v2073_v49 }
 0x20b   :  { %1400 = vmatpush.xpose.msk.msra.mxu2 %vm675_vm8, %v673_v7  ;;  %v667_v48 = vmul.f32 %v651_v41, %v651_v41  ;;  %v1612_v41 = vld [vmem:[%s2406_s0 + $0x40] sm:$0xff] }
 0x20f   :  { %1401 = vmatpush.xpose.msk.msra.mxu2 %vm675_vm8, %v672_v24  ;;  %1458 = vmatmul.msk.f32.gmra.mxu3 %vm763_vm6, %v1946_v15  ;;  %v470_v61 = vpop.permute.xlu2 %469 }
 0x210   :  { %v542_v27 = vpop.permute.xlu1 %541  ;;  %v610_v34 = vpop.permute.xlu0 %609  ;;  %v516_v11 = vadd.f32 %v470_v61, %v2091_v53  ;;  %v836_v61 = vld [vmem:[%s2412_s6] sm:$0x1] }
 0x213   :  { %1402 = vmatpush.xpose.msk.msra.mxu2 %vm675_vm8, %v671_v38 }
 0x217   :  { %1403 = vmatpush.xpose.msk.msra.mxu2 %vm675_vm8, %v670_v16  ;;  %1459 = vmatmul.msk.f32.gmra.mxu3 %vm763_vm6, %v1953_v19  ;;  %v586_v19 = vadd.f32 %v546_v51, %v522_v28  ;;  %v584_v51 = vadd.f32 %v542_v27, %v520_v52 }
 0x218   :  { %v540_v15 = vpop.permute.xlu1 %539  ;;  %v608_v22 = vpop.permute.xlu0 %607 }
 0x219   :  { %v650_v50 = vadd.f32 %v610_v34, %v586_v19  ;;  %v649_v1 = vadd.f32 %v608_v22, %v585_v54  ;;  %v583_v58 = vadd.f32 %v540_v15, %v519_v37  ;;  %v1610_v22 = vld [vmem:[%s2406_s0 + $0x50] sm:$0xff]  ;;  %v1613_v19 = vld [vmem:[%s2406_s0 + $0x38] sm:$0xff] }
 0x21b   :  { %1404 = vmatpush.xpose.msk.msra.mxu2 %vm675_vm8, %v669_v13  ;;  %v666_v12 = vmul.f32 %v650_v50, %v650_v50  ;;  %v665_v47 = vmul.f32 %v649_v1, %v649_v1  ;;  %v1611_v13 = vld [vmem:[%s2406_s0 + $0x48] sm:$0xff] }
 0x21c   :  { %v1615_v50 = vld [vmem:[%s2406_s0 + $0x28] sm:$0xff] }
 0x21d   :  { %v1119_v1 = vld [vmem:[%s2417_s11 + $0x8] sm:$0xff] }
 0x21f   :  { %1405 = vmatpush.xpose.msk.msra.mxu2 %vm675_vm8, %v668_v39  ;;  %1460 = vmatmul.msk.f32.gmra.mxu3 %vm763_vm6, %v1962_v21 }
 0x220   :  { %v538_v42 = vpop.permute.xlu1 %537  ;;  %v606_v44 = vpop.permute.xlu0 %605 }
 0x221   :  { %v648_v57 = vadd.f32 %v606_v44, %v584_v51  ;;  %v582_v62 = vadd.f32 %v538_v42, %v518_v59  ;;  %v1617_v51 = vld [vmem:[%s2406_s0 + $0x18] sm:$0xff] }
 0x223   :  { %1406 = vmatpush.xpose.msk.msra.mxu2 %vm675_vm8, %v667_v48  ;;  %v664_v40 = vmul.f32 %v648_v57, %v648_v57  ;;  %v1614_v48 = vld [vmem:[%s2406_s0 + $0x30] sm:$0xff]  ;;  %v1619_v57 = vld [vmem:[%s2406_s0 + $0x8] sm:$0xff] }
 0x227   :  { %1407 = vmatpush.xpose.msk.msra.mxu2 %vm675_vm8, %v666_v12  ;;  %1461 = vmatmul.msk.f32.gmra.mxu3 %vm763_vm6, %v1971_v23  ;;  %v1616_v12 = vld [vmem:[%s2406_s0 + $0x20] sm:$0xff] }
 0x228   :  { %v536_v21 = vpop.permute.xlu1 %535  ;;  %v604_v55 = vpop.permute.xlu0 %603 }
 0x229   :  { %v647_v60 = vadd.f32 %v604_v55, %v583_v58  ;;  %v581_v4 = vadd.f32 %v536_v21, %v517_v2 }
 0x22b   :  { %1408 = vmatpush.xpose.msk.msra.mxu2 %vm675_vm8, %v665_v47  ;;  %v663_v63 = vmul.f32 %v647_v60, %v647_v60  ;;  %v1618_v47 = vld [vmem:[%s2406_s0 + $0x10] sm:$0xff]  ;;  %v1620_v60 = vld [vmem:[%s2406_s0] sm:$0xff] }
 0x22f   :  { %1409 = vmatpush.xpose.msk.msra.mxu2 %vm675_vm8, %v664_v40  ;;  %1462 = vmatmul.msk.f32.gmra.mxu3 %vm763_vm6, %v1980_v26  ;;  %v468_v26 = vpop.permute.xlu2 %467 }
 0x230   :  { %v602_v23 = vpop.permute.xlu0 %601  ;;  %v534_v43 = vpop.permute.xlu1 %533  ;;  %v515_v49 = vadd.f32 %v468_v26, %v2107_v56 }
 0x231   :  { %v646_v0 = vadd.f32 %v602_v23, %v582_v62  ;;  %v580_v24 = vadd.f32 %v534_v43, %v516_v11 }
 0x233   :  { %1410 = vmatpush.xpose.msk.msra.mxu2 %vm675_vm8, %v663_v63  ;;  %v662_v3 = vmul.f32 %v646_v0, %v646_v0 }
 0x237   :  { %1411 = vmatpush.xpose.msk.msra.mxu2 %vm675_vm8, %v662_v3  ;;  %1463 = vmatmul.msk.f32.gmra.mxu3 %vm763_vm6, %v1989_v29  ;;  %v596_v27 = vpop.permute.xlu2 %595  ;;  %v1118_v3 = vld [vmem:[%s2417_s11] sm:$0xff] }
 0x238   :  { %v600_v5 = vpop.permute.xlu0 %599  ;;  %v532_v9 = vpop.permute.xlu1 %531 }
 0x239   :  { %v645_v7 = vadd.f32 %v600_v5, %v581_v4  ;;  %v579_v31 = vadd.f32 %v532_v9, %v515_v49 }
 0x23b   :  { %v661_v8 = vmul.f32 %v645_v7, %v645_v7  ;;  %v643_v34 = vadd.f32 %v596_v27, %v579_v31 }
 0x23d   :  { %1412 = vmatpush.xpose.msk.msra.mxu2 %vm675_vm8, %v661_v8  ;;  %v659_v32 = vmul.f32 %v643_v34, %v643_v34 }
 0x23f   :  { %1464 = vmatmul.msk.f32.gmra.mxu3 %vm763_vm6, %v1998_v33  ;;  %v2254_v33 = vld [vmem:[%s2414_s8] ss:$0 sm:$0xff] }
 0x240   :  { %v598_v29 = vpop.permute.xlu0 %597 }
 0x241   :  { %v644_v20 = vadd.f32 %v598_v29, %v580_v24 }
 0x243   :  { %v660_v25 = vmul.f32 %v644_v20, %v644_v20 }
 0x245   :  { %1413 = vmatpush.xpose.msk.msra.mxu2 %vm675_vm8, %v660_v25 }
 0x247   :  { %1465 = vmatmul.msk.f32.gmra.mxu3 %vm763_vm6, %v2007_v36  ;;  %v1607_v36 = vld [vmem:[%s2406_s0 + $0x68] sm:$0xff] }
 0x249   :  { %1414 = vmatpush.xpose.msk.msra.mxu2 %vm675_vm8, %v659_v32 }
 0x24a   :  { %v2243_v53 = vpop.f32.mrf.mxu3 }
 0x24c   :  { %1415 = vmatmul.msk.f32.vlgmr.msra.gmra.mxu2 %vm675_vm8, %v1651_v6  ;;  %v1608_v6 = vld [vmem:[%s2406_s0 + $0x60] sm:$0xff] }
 0x24d   :  { %1433 = vmatpush.xpose.msk.msrb.mxu2 %vm69_vm1, %v1808_v18 }
 0x251   :  { %1434 = vmatpush.xpose.msk.msrb.mxu2 %vm69_vm1, %v1801_v17  ;;  %v1120_v17 = vld [vmem:[%s2417_s11 + $0x10] sm:$0xff] }
 0x252   :  { %v917_v56 = vpop.f32.mrf.mxu3  ;;  %1187 = vmatpush.msrb.mxu1 %v1120_v17 }
 0x253   :  { %v918_v18 = vadd.f32 %v2254_v33, %v917_v56 }
 0x254   :  { %1188 = vmatpush.msrb.mxu1 %v1119_v1 }
 0x255   :  { %1435 = vmatpush.xpose.msk.msrb.mxu2 %vm69_vm1, %v1607_v36  ;;  %v965_v38 = vmax.f32 %v918_v18, 0.0 }
 0x256   :  { %1189 = vmatpush.msrb.mxu1 %v1118_v3 }
 0x257   :  { %1466 = vmatmul.msk.f32.vlgmr.msrb.gmra.mxu0 %vm763_vm6, %v965_v38 }
 0x259   :  { %1436 = vmatpush.xpose.msk.msrb.mxu2 %vm69_vm1, %v1608_v6  ;;  %v1605_v6 = vld [vmem:[%s2416_s10] ss:$0 sm:$0xff] }
 0x25a   :  { %v920_v16 = vpop.f32.mrf.mxu3 }
 0x25b   :  { %v921_v10 = vadd.f32 %v2254_v33, %v920_v16 }
 0x25d   :  { %1437 = vmatpush.xpose.msk.msrb.mxu2 %vm69_vm1, %v1609_v30  ;;  %v966_v15 = vmax.f32 %v921_v10, 0.0 }
 0x25f   :  { %1467 = vmatmul.msk.f32.gmra.mxu0 %vm763_vm6, %v966_v15 }
 0x261   :  { %1438 = vmatpush.xpose.msk.msrb.mxu2 %vm69_vm1, %v1610_v22 }
 0x262   :  { %v923_v14 = vpop.f32.mrf.mxu3 }
 0x263   :  { %v924_v28 = vadd.f32 %v2254_v33, %v923_v14 }
 0x265   :  { %1439 = vmatpush.xpose.msk.msrb.mxu2 %vm69_vm1, %v1611_v13  ;;  %v967_v39 = vmax.f32 %v924_v28, 0.0 }
 0x267   :  { %1468 = vmatmul.msk.f32.gmra.mxu0 %vm763_vm6, %v967_v39 }
 0x269   :  { %1440 = vmatpush.xpose.msk.msrb.mxu2 %vm69_vm1, %v1612_v41 }
 0x26a   :  { %v926_v42 = vpop.f32.mrf.mxu3 }
 0x26b   :  { %v927_v44 = vadd.f32 %v2254_v33, %v926_v42 }
 0x26d   :  { %1441 = vmatpush.xpose.msk.msrb.mxu2 %vm69_vm1, %v1613_v19  ;;  %v968_v45 = vmax.f32 %v927_v44, 0.0 }
 0x26f   :  { %1469 = vmatmul.msk.f32.gmra.mxu0 %vm763_vm6, %v968_v45 }
 0x271   :  { %1442 = vmatpush.xpose.msk.msrb.mxu2 %vm69_vm1, %v1614_v48 }
 0x272   :  { %v929_v54 = vpop.f32.mrf.mxu3 }
 0x273   :  { %v930_v35 = vadd.f32 %v2254_v33, %v929_v54 }
 0x275   :  { %1443 = vmatpush.xpose.msk.msrb.mxu2 %vm69_vm1, %v1615_v50  ;;  %v969_v52 = vmax.f32 %v930_v35, 0.0 }
 0x277   :  { %1470 = vmatmul.msk.f32.gmra.mxu0 %vm763_vm6, %v969_v52 }
 0x279   :  { %1444 = vmatpush.xpose.msk.msrb.mxu2 %vm69_vm1, %v1616_v12 }
 0x27a   :  { %v932_v21 = vpop.f32.mrf.mxu3 }
 0x27b   :  { %v933_v55 = vadd.f32 %v2254_v33, %v932_v21 }
 0x27d   :  { %1445 = vmatpush.xpose.msk.msrb.mxu2 %vm69_vm1, %v1617_v51  ;;  %v970_v37 = vmax.f32 %v933_v55, 0.0 }
 0x27f   :  { %1471 = vmatmul.msk.f32.gmra.mxu0 %vm763_vm6, %v970_v37 }
 0x281   :  { %1446 = vmatpush.xpose.msk.msrb.mxu2 %vm69_vm1, %v1618_v47 }
 0x282   :  { %v935_v58 = vpop.f32.mrf.mxu3 }
 0x283   :  { %v936_v59 = vadd.f32 %v2254_v33, %v935_v58 }
 0x285   :  { %1447 = vmatpush.xpose.msk.msrb.mxu2 %vm69_vm1, %v1619_v57  ;;  %v971_v40 = vmax.f32 %v936_v59, 0.0 }
 0x287   :  { %1472 = vmatmul.msk.f32.gmra.mxu0 %vm763_vm6, %v971_v40 }
 0x289   :  { %1448 = vmatpush.xpose.msk.msrb.mxu2 %vm69_vm1, %v1620_v60 }
 0x28a   :  { %v938_v62 = vpop.f32.mrf.mxu3 }
 0x28b   :  { %v939_v23 = vadd.f32 %v2254_v33, %v938_v62 }
 0x28c   :  { %1449 = vmatmul.msk.f32.vlgmr.msrb.gmra.mxu2 %vm69_vm1, %v836_v61 }
 0x28d   :  { %v972_v63 = vmax.f32 %v939_v23, 0.0 }
 0x28f   :  { %1473 = vmatmul.msk.f32.gmra.mxu0 %vm763_vm6, %v972_v63 }
 0x292   :  { %v941_v0 = vpop.f32.mrf.mxu3 }
 0x293   :  { %v942_v43 = vadd.f32 %v2254_v33, %v941_v0 }
 0x295   :  { %v973_v2 = vmax.f32 %v942_v43, 0.0 }
 0x297   :  { %1474 = vmatmul.msk.f32.gmra.mxu0 %vm763_vm6, %v973_v2 }
 0x29a   :  { %v944_v4 = vpop.f32.mrf.mxu3 }
 0x29b   :  { %v945_v46 = vadd.f32 %v2254_v33, %v944_v4 }
 0x29d   :  { %v974_v26 = vmax.f32 %v945_v46, 0.0 }
 0x29f   :  { %1475 = vmatmul.msk.f32.gmra.mxu0 %vm763_vm6, %v974_v26 }
 0x2a2   :  { %v947_v5 = vpop.f32.mrf.mxu3 }
 0x2a3   :  { %v948_v7 = vadd.f32 %v2254_v33, %v947_v5 }
 0x2a5   :  { %v975_v8 = vmax.f32 %v948_v7, 0.0 }
 0x2a7   :  { %1476 = vmatmul.msk.f32.gmra.mxu0 %vm763_vm6, %v975_v8 }
 0x2aa   :  { %v950_v9 = vpop.f32.mrf.mxu3 }
 0x2ab   :  { %v951_v11 = vadd.f32 %v2254_v33, %v950_v9 }
 0x2ad   :  { %v976_v49 = vmax.f32 %v951_v11, 0.0 }
 0x2af   :  { %1477 = vmatmul.msk.f32.gmra.mxu0 %vm763_vm6, %v976_v49 }
 0x2b2   :  { %v953_v24 = vpop.f32.mrf.mxu3 }
 0x2b3   :  { %v954_v31 = vadd.f32 %v2254_v33, %v953_v24 }
 0x2b5   :  { %v977_v29 = vmax.f32 %v954_v31, 0.0 }
 0x2b7   :  { %1478 = vmatmul.msk.f32.gmra.mxu0 %vm763_vm6, %v977_v29 }
 0x2ba   :  { %v956_v20 = vpop.f32.mrf.mxu3 }
 0x2bb   :  { %v957_v27 = vadd.f32 %v2254_v33, %v956_v20 }
 0x2bd   :  { %v978_v34 = vmax.f32 %v957_v27, 0.0 }
 0x2bf   :  { %1479 = vmatmul.msk.f32.gmra.mxu0 %vm763_vm6, %v978_v34 }
 0x2c2   :  { %v959_v25 = vpop.f32.mrf.mxu3 }
 0x2c3   :  { %v960_v32 = vadd.f32 %v2254_v33, %v959_v25 }
 0x2c5   :  { %v979_v36 = vmax.f32 %v960_v32, 0.0 }
 0x2c7   :  { %1480 = vmatmul.msk.f32.gmra.mxu0 %vm763_vm6, %v979_v36 }
 0x2ca   :  { %v962_v56 = vpop.f32.mrf.mxu3 }
 0x2cb   :  { %v963_v18 = vadd.f32 %v2254_v33, %v962_v56 }
 0x2cd   :  { %v980_v38 = vmax.f32 %v963_v18, 0.0 }
 0x2cf   :  { %1481 = vmatmul.msk.f32.gmra.mxu0 %vm763_vm6, %v980_v38 }
 0x2d4   :  { %v1054_v17 = vpop.f32.mrf.mxu0 }
 0x2d5   :  { %v1055_v30 = vadd.f32 %v1605_v6, %v1054_v17 }
 0x2d7   :  { %v1102_v16 = vmax.f32 %v1055_v30, 0.0 }
 0x2d9   :  { %1482 = vmatmul.msk.f32.vlgmr.msrb.gmra.mxu1 %vm763_vm6, %v1102_v16 }
 0x2dc   :  { %v1057_v10 = vpop.f32.mrf.mxu0 }
 0x2dd   :  { %v1058_v15 = vadd.f32 %v1605_v6, %v1057_v10 }
 0x2df   :  { %v1103_v22 = vmax.f32 %v1058_v15, 0.0 }
 0x2e1   :  { %1483 = vmatmul.msk.f32.gmra.mxu1 %vm763_vm6, %v1103_v22 }
 0x2e4   :  { %v1060_v13 = vpop.f32.mrf.mxu0 }
 0x2e5   :  { %v1061_v14 = vadd.f32 %v1605_v6, %v1060_v13 }
 0x2e7   :  { %v1104_v33 = vmax.f32 %v1061_v14, 0.0 }
 0x2e9   :  { %1484 = vmatmul.msk.f32.gmra.mxu1 %vm763_vm6, %v1104_v33 }
 0x2ec   :  { %v1063_v28 = vpop.f32.mrf.mxu0 }
 0x2ed   :  { %v1064_v39 = vadd.f32 %v1605_v6, %v1063_v28 }
 0x2ef   :  { %v1105_v41 = vmax.f32 %v1064_v39, 0.0 }
 0x2f1   :  { %1485 = vmatmul.msk.f32.gmra.mxu1 %vm763_vm6, %v1105_v41 }
 0x2f4   :  { %v1066_v19 = vpop.f32.mrf.mxu0 }
 0x2f5   :  { %v1067_v42 = vadd.f32 %v1605_v6, %v1066_v19 }
 0x2f7   :  { %v1106_v44 = vmax.f32 %v1067_v42, 0.0 }
 0x2f9   :  { %1486 = vmatmul.msk.f32.gmra.mxu1 %vm763_vm6, %v1106_v44 }
 0x2fc   :  { %v1069_v45 = vpop.f32.mrf.mxu0 }
 0x2fd   :  { %v1070_v48 = vadd.f32 %v1605_v6, %v1069_v45 }
 0x2ff   :  { %v1107_v50 = vmax.f32 %v1070_v48, 0.0 }
 0x301   :  { %1487 = vmatmul.msk.f32.gmra.mxu1 %vm763_vm6, %v1107_v50 }
 0x304   :  { %v1072_v54 = vpop.f32.mrf.mxu0 }
 0x305   :  { %v1073_v35 = vadd.f32 %v1605_v6, %v1072_v54 }
 0x307   :  { %v1108_v52 = vmax.f32 %v1073_v35, 0.0 }
 0x309   :  { %1488 = vmatmul.msk.f32.gmra.mxu1 %vm763_vm6, %v1108_v52 }
 0x30c   :  { %v1075_v12 = vpop.f32.mrf.mxu0 }
 0x30d   :  { %v1076_v1 = vadd.f32 %v1605_v6, %v1075_v12 }
 0x30f   :  { %v1109_v51 = vmax.f32 %v1076_v1, 0.0 }
 0x311   :  { %1489 = vmatmul.msk.f32.gmra.mxu1 %vm763_vm6, %v1109_v51 }
 0x314   :  { %v1078_v21 = vpop.f32.mrf.mxu0 }
 0x315   :  { %v1079_v55 = vadd.f32 %v1605_v6, %v1078_v21 }
 0x317   :  { %v1110_v37 = vmax.f32 %v1079_v55, 0.0 }
 0x319   :  { %1490 = vmatmul.msk.f32.gmra.mxu1 %vm763_vm6, %v1110_v37 }
 0x31c   :  { %v1081_v47 = vpop.f32.mrf.mxu0 }
 0x31d   :  { %v1082_v57 = vadd.f32 %v1605_v6, %v1081_v47 }
 0x31f   :  { %v1111_v58 = vmax.f32 %v1082_v57, 0.0 }
 0x321   :  { %1491 = vmatmul.msk.f32.gmra.mxu1 %vm763_vm6, %v1111_v58 }
 0x324   :  { %v1084_v59 = vpop.f32.mrf.mxu0 }
 0x325   :  { %v1085_v40 = vadd.f32 %v1605_v6, %v1084_v59 }
 0x327   :  { %v1112_v60 = vmax.f32 %v1085_v40, 0.0 }
 0x329   :  { %1492 = vmatmul.msk.f32.gmra.mxu1 %vm763_vm6, %v1112_v60 }
 0x32c   :  { %v1087_v61 = vpop.f32.mrf.mxu0 }
 0x32d   :  { %v1088_v62 = vadd.f32 %v1605_v6, %v1087_v61 }
 0x32f   :  { %v1113_v23 = vmax.f32 %v1088_v62, 0.0  ;;  %v1255_v62 = vld [vmem:[%s2419_s13] sm:$0x1] }
 0x331   :  { %1493 = vmatmul.msk.f32.gmra.mxu1 %vm763_vm6, %v1113_v23  ;;  %v744_v23 = vpop.f32.mrf.mxu2 }
 0x334   :  { %v1090_v63 = vpop.f32.mrf.mxu0 }
 0x335   :  { %v1091_v0 = vadd.f32 %v1605_v6, %v1090_v63 }
 0x337   :  { %v1114_v43 = vmax.f32 %v1091_v0, 0.0  ;;  %v834_v0 = vsub.f32 %v744_v23, %v2243_v53 }
 0x339   :  { %1494 = vmatmul.msk.f32.gmra.mxu1 %vm763_vm6, %v1114_v43  ;;  %v857_v63 = vpop.f32.mrf.mxu2  ;;  %v835_v43 = vmul.f32 0.5, %v834_v0 }
 0x33c   :  { %v1093_v2 = vpop.f32.mrf.mxu0 }
 0x33d   :  { %v1094_v3 = vadd.f32 %v1605_v6, %v1093_v2  ;;  %v1327_v2 = vadd.f32 %v857_v63, %v835_v43 }
 0x33f   :  { %v1115_v4 = vmax.f32 %v1094_v3, 0.0 }
 0x341   :  { %1495 = vmatmul.msk.f32.gmra.mxu1 %vm763_vm6, %v1115_v4  ;;  %v1330_v4 = vstv %s2420_s14 }
 0x344   :  { %v1096_v46 = vpop.f32.mrf.mxu0 }
 0x345   :  { %v1097_v26 = vadd.f32 %v1605_v6, %v1096_v46 }
 0x347   :  { %v1116_v5 = vmax.f32 %v1097_v26, 0.0 }
 0x349   :  { %1496 = vmatmul.msk.f32.gmra.mxu1 %vm763_vm6, %v1116_v5 }
 0x34c   :  { %v1099_v7 = vpop.f32.mrf.mxu0 }
 0x34d   :  { %v1100_v8 = vadd.f32 %v1605_v6, %v1099_v7  ;;  %v1606_v6 = vld [vmem:[%s2418_s12] ss:$0 sm:$0xff] }
 0x34f   :  { %v1117_v9 = vmax.f32 %v1100_v8, 0.0 }
 0x351   :  { %1497 = vmatmul.msk.f32.gmra.mxu1 %vm763_vm6, %v1117_v9 }
 0x356   :  { %v1191_v11 = vpop.f32.mrf.mxu1 }
 0x357   :  { %v1192_v40 = vadd.f32 %v1606_v6, %v1191_v11 }
 0x359   :  { %v1239_v61 = vmax.f32 %v1192_v40, 0.0 }
 0x35e   :  { %v1194_v49 = vpop.f32.mrf.mxu1 }
 0x35f   :  { %v1195_v58 = vadd.f32 %v1606_v6, %v1194_v49 }
 0x361   :  { %v1240_v60 = vmax.f32 %v1195_v58, 0.0 }
 0x366   :  { %v1197_v24 = vpop.f32.mrf.mxu1 }
 0x367   :  { %v1198_v47 = vadd.f32 %v1606_v6, %v1197_v24 }
 0x369   :  { %v1241_v59 = vmax.f32 %v1198_v47, 0.0 }
 0x36e   :  { %v1200_v31 = vpop.f32.mrf.mxu1 }
 0x36f   :  { %v1201_v55 = vadd.f32 %v1606_v6, %v1200_v31 }
 0x371   :  { %v1242_v57 = vmax.f32 %v1201_v55, 0.0 }
 0x376   :  { %v1203_v29 = vpop.f32.mrf.mxu1 }
 0x377   :  { %v1204_v51 = vadd.f32 %v1606_v6, %v1203_v29 }
 0x379   :  { %v1243_v37 = vmax.f32 %v1204_v51, 0.0 }
 0x37e   :  { %v1206_v20 = vpop.f32.mrf.mxu1 }
 0x37f   :  { %v1207_v12 = vadd.f32 %v1606_v6, %v1206_v20 }
 0x381   :  { %v1244_v21 = vmax.f32 %v1207_v12, 0.0 }
 0x386   :  { %v1209_v27 = vpop.f32.mrf.mxu1 }
 0x387   :  { %v1210_v35 = vadd.f32 %v1606_v6, %v1209_v27 }
 0x389   :  { %v1245_v1 = vmax.f32 %v1210_v35, 0.0 }
 0x38e   :  { %v1212_v34 = vpop.f32.mrf.mxu1 }
 0x38f   :  { %v1213_v50 = vadd.f32 %v1606_v6, %v1212_v34 }
 0x391   :  { %v1246_v52 = vmax.f32 %v1213_v50, 0.0 }
 0x396   :  { %v1215_v25 = vpop.f32.mrf.mxu1 }
 0x397   :  { %v1216_v45 = vadd.f32 %v1606_v6, %v1215_v25 }
 0x399   :  { %v1247_v54 = vmax.f32 %v1216_v45, 0.0 }
 0x39e   :  { %v1218_v32 = vpop.f32.mrf.mxu1 }
 0x39f   :  { %v1219_v42 = vadd.f32 %v1606_v6, %v1218_v32 }
 0x3a1   :  { %v1248_v48 = vmax.f32 %v1219_v42, 0.0 }
 0x3a6   :  { %v1221_v36 = vpop.f32.mrf.mxu1 }
 0x3a7   :  { %v1222_v41 = vadd.f32 %v1606_v6, %v1221_v36 }
 0x3a9   :  { %v1249_v44 = vmax.f32 %v1222_v41, 0.0 }
 0x3ae   :  { %v1224_v56 = vpop.f32.mrf.mxu1 }
 0x3af   :  { %v1225_v28 = vadd.f32 %v1606_v6, %v1224_v56 }
 0x3b1   :  { %v1250_v19 = vmax.f32 %v1225_v28, 0.0 }
 0x3b6   :  { %v1227_v18 = vpop.f32.mrf.mxu1 }
 0x3b7   :  { %v1228_v14 = vadd.f32 %v1606_v6, %v1227_v18 }
 0x3b9   :  { %v1251_v39 = vmax.f32 %v1228_v14, 0.0 }
 0x3be   :  { %v1230_v38 = vpop.f32.mrf.mxu1 }
 0x3bf   :  { %v1231_v22 = vadd.f32 %v1606_v6, %v1230_v38 }
 0x3c1   :  { %v1252_v33 = vmax.f32 %v1231_v22, 0.0 }
 0x3c6   :  { %v1233_v17 = vpop.f32.mrf.mxu1 }
 0x3c7   :  { %v1234_v10 = vadd.f32 %v1606_v6, %v1233_v17 }
 0x3c9   :  { %v1253_v13 = vmax.f32 %v1234_v10, 0.0 }
 0x3ce   :  { %v1236_v30 = vpop.f32.mrf.mxu1 }
 0x3cf   :  { %v1237_v16 = vadd.f32 %v1606_v6, %v1236_v30 }
 0x3d1   :  { %v1254_v15 = vmax.f32 %v1237_v16, 0.0 }
 0x3d3   :  { %1498 = vmatpush.xpose.msk.msra.mxu2 %vm763_vm6, %v1254_v15 }
 0x3d7   :  { %1499 = vmatpush.xpose.msk.msra.mxu2 %vm763_vm6, %v1253_v13 }
 0x3db   :  { %1500 = vmatpush.xpose.msk.msra.mxu2 %vm763_vm6, %v1252_v33 }
 0x3df   :  { %1501 = vmatpush.xpose.msk.msra.mxu2 %vm763_vm6, %v1251_v39 }
 0x3e3   :  { %1502 = vmatpush.xpose.msk.msra.mxu2 %vm763_vm6, %v1250_v19 }
 0x3e7   :  { %1503 = vmatpush.xpose.msk.msra.mxu2 %vm763_vm6, %v1249_v44 }
 0x3eb   :  { %1504 = vmatpush.xpose.msk.msra.mxu2 %vm763_vm6, %v1248_v48 }
 0x3ef   :  { %1505 = vmatpush.xpose.msk.msra.mxu2 %vm763_vm6, %v1247_v54 }
 0x3f3   :  { %1506 = vmatpush.xpose.msk.msra.mxu2 %vm763_vm6, %v1246_v52 }
 0x3f7   :  { %1507 = vmatpush.xpose.msk.msra.mxu2 %vm763_vm6, %v1245_v1 }
 0x3fb   :  { %1508 = vmatpush.xpose.msk.msra.mxu2 %vm763_vm6, %v1244_v21 }
 0x3ff   :  { %1509 = vmatpush.xpose.msk.msra.mxu2 %vm763_vm6, %v1243_v37 }
 0x403   :  { %1510 = vmatpush.xpose.msk.msra.mxu2 %vm763_vm6, %v1242_v57 }
 0x407   :  { %1511 = vmatpush.xpose.msk.msra.mxu2 %vm763_vm6, %v1241_v59 }
 0x40b   :  { %1512 = vmatpush.xpose.msk.msra.mxu2 %vm763_vm6, %v1240_v60 }
 0x40f   :  { %1513 = vmatpush.xpose.msk.msra.mxu2 %vm763_vm6, %v1239_v61 }
 0x412   :  { %1514 = vmatmul.msk.f32.vlgmr.msra.gmra.mxu2 %vm763_vm6, %v1255_v62 }
 0x495   :  { %v1324_v3 = vpop.f32.mrf.mxu2 }
 0x496   :  { %v1328_v46 = vadd.f32 %v1327_v2, %v1324_v3 }
 0x498   :  { %v1331_v26 = vadd.f32 %v1330_v4, %v1328_v46 }
 0x49a   :  { %1332 = vst [vmem:[#allocation3] sm:$0x1] %v1331_v26 }
 0x49b   :  { %1343 = dma.vmem_to_hbm [thread:$0]  %s1339_s26, 16, %s1341_s2, [#allocation4]  }
 0x49c   :  { %1645 = dma.done.wait [#allocation4], 16  }
 0x49d   :  { %1646 = vsyncadd [#allocation4], 4294967280 }
 0x49e   :  { %1348 = vsyncpa [#allocation4], 1 }

// kernel: tpu_custom_call.1
= control target key start
LH: loop header
LB: loop body
LE: loop exit
PB: predicated region body
PF: predicated region fallthrough
CT: control target
= control target key end

     0   :  { %vm118_vm0 = vcmask 1043456   ;;  %vm69_vm1 = vcmask 31744   ;;  %s2406_s0 = inlined_call_operand.vmem [shape: f32[128,4], index: 0, kind: input, shape index: {}]   ;;  %s2407_s1 = inlined_call_operand.vmem [shape: f32[4,14], index: 1, kind: input, shape index: {}]   ;;  %s2408_s2 = inlined_call_operand.vmem [shape: s32[1,14], index: 2, kind: input, shape index: {}]   ;;  %s2409_s3 = inlined_call_operand.vmem [shape: f32[1,14], index: 3, kind: input, shape index: {}]   ;;  %s2410_s4 = inlined_call_operand.vmem [shape: f32[14,32], index: 4, kind: input, shape index: {}]   ;;  %s2411_s5 = inlined_call_operand.vmem [shape: f32[1,32], index: 5, kind: input, shape index: {}]   ;;  %s2412_s6 = inlined_call_operand.vmem [shape: f32[1,4], index: 6, kind: input, shape index: {}]   ;;  %s2413_s7 = inlined_call_operand.vmem [shape: f32[32,32], index: 7, kind: input, shape index: {}]   ;;  %s2414_s8 = inlined_call_operand.vmem [shape: f32[1,32], index: 8, kind: input, shape index: {}]   ;;  %s2415_s9 = inlined_call_operand.vmem [shape: f32[32,32], index: 9, kind: input, shape index: {}]   ;;  %s2416_s10 = inlined_call_operand.vmem [shape: f32[1,32], index: 10, kind: input, shape index: {}]   ;;  %s2417_s11 = inlined_call_operand.vmem [shape: f32[32,32], index: 11, kind: input, shape index: {}]   ;;  %s2418_s12 = inlined_call_operand.vmem [shape: f32[1,32], index: 12, kind: input, shape index: {}]   ;;  %s2419_s13 = inlined_call_operand.vmem [shape: f32[1,32], index: 13, kind: input, shape index: {}]   ;;  %s2420_s14 = inlined_call_operand.<no memory space> [shape: f32[1,1], index: 14, kind: input, shape index: {}]   ;;  %s2421_s15 = inlined_call_operand.hbm [shape: f32[1,128], index: 15, kind: output, shape index: {}]  }
   0x1   :  { %v68_v0 = vld [vmem:[%s2407_s1] sm:$0xf] }
   0x2   :  { %v52_v1 = vld [vmem:[%s2406_s0] sm:$0xff]  ;;  %1349 = vmatpush.msk.msra.mxu0 %vm118_vm0, %v68_v0 }
   0x3   :  { %1350 = vmatmul.msk.f32.vlgmr.msra.gmra.mxu0 %vm69_vm1, %v52_v1 }
   0x4   :  { %21 = vsyncpa [#allocation4], 0  ;;  %v53_v2 = vld [vmem:[%s2406_s0 + $0x8] sm:$0xff]  ;;  %v54_v3 = vld [vmem:[%s2406_s0 + $0x10] sm:$0xff]  ;;  %vm382_vm2 = vcmask 1045504   ;;  %v187_v21 = vlaneseq  ;;  %v1647_v35 = vmov 0.0  }
   0x5   :  { %v55_v4 = vld [vmem:[%s2406_s0 + $0x18] sm:$0xff]  ;;  %v56_v5 = vld [vmem:[%s2406_s0 + $0x20] sm:$0xff]  ;;  %v57_v6 = vld [vmem:[%s2406_s0 + $0x28] sm:$0xff]  ;;  %vm333_vm6 = vcmask 113664   ;;  %s1648_s28 = smov 120   ;;  %s1649_s29 = smov 112  }
   0x6   :  { %v58_v7 = vld [vmem:[%s2406_s0 + $0x30] sm:$0xff]  ;;  %v59_v8 = vld [vmem:[%s2406_s0 + $0x38] sm:$0xff]  ;;  %v60_v9 = vld [vmem:[%s2406_s0 + $0x40] sm:$0xff]  ;;  %v1820_v28 = vand.u32 127, %v187_v21  ;;  %s1652_s1 = smov [#allocation3]  }
   0x7   :  { %v61_v10 = vld [vmem:[%s2406_s0 + $0x48] sm:$0xff]  ;;  %v62_v11 = vld [vmem:[%s2406_s0 + $0x50] sm:$0xff]  ;;  %v63_v12 = vld [vmem:[%s2406_s0 + $0x58] sm:$0xff]  ;;  %s1338_s26 = sshll.u32 %s1652_s1, 4  ;;  %s1339_s26 = int_to_ptr.vmem [resolvable:$true] %s1338_s26 }
   0x8   :  { %v64_v13 = vld [vmem:[%s2406_s0 + $0x60] sm:$0xff]  ;;  %v65_v14 = vld [vmem:[%s2406_s0 + $0x68] sm:$0xff]  ;;  %v1801_v17 = vld [vmem:[%s2406_s0 + $0x70] sm:$0xff] }
   0x9   :  { %v328_v15 = vld [vmem:[%s2410_s4 + $0x8] sm:$0x3f]  ;;  %v327_v16 = vld [vmem:[%s2410_s4] sm:$0xff]  ;;  %v1808_v18 = vld [vmem:[%s2406_s0 + $0x78] sm:$0xff] }
   0xa   :  { %1382 = vmatpush.msk.msra.mxu1 %vm382_vm2, %v328_v15  ;;  %v271_v19 = vld [vmem:[%s2409_s3] sm:$0x1] }
   0xb   :  { %1351 = vmatmul.msk.f32.gmra.mxu0 %vm69_vm1, %v53_v2  ;;  %v1818_v24 = vld [vmem:[%s2408_s2] ss:$0 sm:$0xff]  ;;  %v291_v25 = vsub.f32 1.0, %v271_v19  ;;  %s1340_s2 = sshll.u32 %s2421_s15, 4  ;;  %s1341_s2 = int_to_ptr.hbm [resolvable:$true] %s1340_s2 }
   0xc   :  { %401 = vmatpush.msra.mxu1 %v327_v16  ;;  %v1826_v30 = vld [vmem:[%s2409_s3] ss:$0 sm:$0xff] }
   0xd   :  { %v1828_v31 = vperm.slane %v291_v25, 0 }
  0x13   :  { %1352 = vmatmul.msk.f32.gmra.mxu0 %vm69_vm1, %v54_v3 }
  0x1b   :  { %1353 = vmatmul.msk.f32.gmra.mxu0 %vm69_vm1, %v55_v4 }
  0x23   :  { %1354 = vmatmul.msk.f32.gmra.mxu0 %vm69_vm1, %v56_v5 }
  0x2b   :  { %1355 = vmatmul.msk.f32.gmra.mxu0 %vm69_vm1, %v57_v6 }
  0x33   :  { %1356 = vmatmul.msk.f32.gmra.mxu0 %vm69_vm1, %v58_v7 }
  0x3b   :  { %1357 = vmatmul.msk.f32.gmra.mxu0 %vm69_vm1, %v59_v8 }
  0x43   :  { %1358 = vmatmul.msk.f32.gmra.mxu0 %vm69_vm1, %v60_v9 }
  0x4b   :  { %1359 = vmatmul.msk.f32.gmra.mxu0 %vm69_vm1, %v61_v10 }
  0x53   :  { %1360 = vmatmul.msk.f32.gmra.mxu0 %vm69_vm1, %v62_v11 }
  0x5b   :  { %1361 = vmatmul.msk.f32.gmra.mxu0 %vm69_vm1, %v63_v12 }
  0x63   :  { %1362 = vmatmul.msk.f32.gmra.mxu0 %vm69_vm1, %v64_v13 }
  0x6b   :  { %1363 = vmatmul.msk.f32.gmra.mxu0 %vm69_vm1, %v65_v14 }
  0x73   :  { %1364 = vmatmul.msk.f32.gmra.mxu0 %vm69_vm1, %v1801_v17 }
  0x7b   :  { %1365 = vmatmul.msk.f32.gmra.mxu0 %vm69_vm1, %v1808_v18 }
  0x80   :  { %v139_v20 = vpop.f32.mrf.mxu0 }
  0x81   :  { %vm1515_vm3 = vcmp.lt.s32.totalorder %v139_v20, 0  ;;  %v1516_v22 = vceil.f32 %v139_v20  ;;  %v1517_v23 = vfloor.f32 %v139_v20  ;;  %v275_v37 = vmul.f32 %v1826_v30, %v139_v20 }
  0x83   :  { %v1518_v26 = vsel %vm1515_vm3, %v1516_v22, %v1517_v23 }
  0x84   :  { %v1519_v27 = vcvt.f32.s32 %v1518_v26 }
  0x86   :  { %v207_v29 = vadd.s32 %v1818_v24, %v1519_v27 }
  0x88   :  { %v142_v32 = vpop.f32.mrf.mxu0  ;;  %vm223_vm4 = vcmp.eq.s32.totalorder %v1820_v28, %v207_v29 }
  0x89   :  { %vm1520_vm5 = vcmp.lt.s32.totalorder %v142_v32, 0  ;;  %v1521_v33 = vceil.f32 %v142_v32  ;;  %v1522_v34 = vfloor.f32 %v142_v32  ;;  %v1366_v36 = vsel %vm223_vm4, 1.0, %v1647_v35 }
  0x8a   :  { %v295_v38 = vmul.f32 %v1366_v36, %v1828_v31  ;;  %v276_v47 = vmul.f32 %v1826_v30, %v142_v32 }
  0x8b   :  { %v1523_v39 = vsel %vm1520_vm5, %v1521_v33, %v1522_v34 }
  0x8c   :  { %v1524_v40 = vcvt.f32.s32 %v1523_v39  ;;  %v311_v41 = vadd.f32 %v295_v38, %v275_v37 }
  0x8e   :  { %1383 = vmatmul.msk.f32.vlgmr.msra.gmra.mxu1 %vm333_vm6, %v311_v41  ;;  %v208_v42 = vadd.s32 %v1818_v24, %v1524_v40 }
  0x90   :  { %v145_v43 = vpop.f32.mrf.mxu0  ;;  %vm224_vm7 = vcmp.eq.s32.totalorder %v1820_v28, %v208_v42 }
  0x91   :  { %vm1525_vm8 = vcmp.lt.s32.totalorder %v145_v43, 0  ;;  %v1526_v44 = vceil.f32 %v145_v43  ;;  %v1527_v45 = vfloor.f32 %v145_v43  ;;  %v1367_v46 = vsel %vm224_vm7, 1.0, %v1647_v35 }
  0x92   :  { %v296_v48 = vmul.f32 %v1367_v46, %v1828_v31  ;;  %v277_v57 = vmul.f32 %v1826_v30, %v145_v43 }
  0x93   :  { %v1528_v49 = vsel %vm1525_vm8, %v1526_v44, %v1527_v45 }
  0x94   :  { %v1529_v50 = vcvt.f32.s32 %v1528_v49  ;;  %v312_v51 = vadd.f32 %v296_v48, %v276_v47 }
  0x96   :  { %1384 = vmatmul.msk.f32.gmra.mxu1 %vm333_vm6, %v312_v51  ;;  %v209_v52 = vadd.s32 %v1818_v24, %v1529_v50 }
  0x98   :  { %v148_v53 = vpop.f32.mrf.mxu0  ;;  %vm225_vm9 = vcmp.eq.s32.totalorder %v1820_v28, %v209_v52 }
  0x99   :  { %vm1530_vm10 = vcmp.lt.s32.totalorder %v148_v53, 0  ;;  %v1531_v54 = vceil.f32 %v148_v53  ;;  %v1532_v55 = vfloor.f32 %v148_v53  ;;  %v1368_v56 = vsel %vm225_vm9, 1.0, %v1647_v35 }
  0x9a   :  { %v297_v58 = vmul.f32 %v1368_v56, %v1828_v31  ;;  %v278_v3 = vmul.f32 %v1826_v30, %v148_v53 }
  0x9b   :  { %v1533_v59 = vsel %vm1530_vm10, %v1531_v54, %v1532_v55 }
  0x9c   :  { %v1534_v60 = vcvt.f32.s32 %v1533_v59  ;;  %v313_v61 = vadd.f32 %v297_v58, %v277_v57 }
  0x9e   :  { %1385 = vmatmul.msk.f32.gmra.mxu1 %vm333_vm6, %v313_v61  ;;  %v210_v62 = vadd.s32 %v1818_v24, %v1534_v60 }
  0xa0   :  { %v151_v63 = vpop.f32.mrf.mxu0  ;;  %vm226_vm11 = vcmp.eq.s32.totalorder %v1820_v28, %v210_v62 }
  0xa1   :  { %vm1535_vm12 = vcmp.lt.s32.totalorder %v151_v63, 0  ;;  %v1536_v0 = vceil.f32 %v151_v63  ;;  %v1537_v1 = vfloor.f32 %v151_v63  ;;  %v1369_v2 = vsel %vm226_vm11, 1.0, %v1647_v35 }
  0xa2   :  { %v298_v4 = vmul.f32 %v1369_v2, %v1828_v31  ;;  %v279_v13 = vmul.f32 %v1826_v30, %v151_v63 }
  0xa3   :  { %v1538_v5 = vsel %vm1535_vm12, %v1536_v0, %v1537_v1 }
  0xa4   :  { %v1539_v6 = vcvt.f32.s32 %v1538_v5  ;;  %v314_v7 = vadd.f32 %v298_v4, %v278_v3 }
  0xa6   :  { %1386 = vmatmul.msk.f32.gmra.mxu1 %vm333_vm6, %v314_v7  ;;  %v211_v8 = vadd.s32 %v1818_v24, %v1539_v6 }
  0xa8   :  { %v154_v9 = vpop.f32.mrf.mxu0  ;;  %vm227_vm13 = vcmp.eq.s32.totalorder %v1820_v28, %v211_v8 }
  0xa9   :  { %vm1540_vm14 = vcmp.lt.s32.totalorder %v154_v9, 0  ;;  %v1541_v10 = vceil.f32 %v154_v9  ;;  %v1542_v11 = vfloor.f32 %v154_v9  ;;  %v1370_v12 = vsel %vm227_vm13, 1.0, %v1647_v35 }
  0xaa   :  { %v299_v14 = vmul.f32 %v1370_v12, %v1828_v31  ;;  %v280_v26 = vmul.f32 %v1826_v30, %v154_v9 }
  0xab   :  { %v1543_v15 = vsel %vm1540_vm14, %v1541_v10, %v1542_v11 }
  0xac   :  { %v1544_v16 = vcvt.f32.s32 %v1543_v15  ;;  %v315_v19 = vadd.f32 %v299_v14, %v279_v13 }
  0xae   :  { %1387 = vmatmul.msk.f32.gmra.mxu1 %vm333_vm6, %v315_v19  ;;  %v212_v20 = vadd.s32 %v1818_v24, %v1544_v16 }
  0xb0   :  { %v157_v21 = vpop.f32.mrf.mxu0  ;;  %vm228_vm15 = vcmp.eq.s32.totalorder %v1820_v28, %v212_v20 }
  0xb1   :  { %vm1545_vm0 = vcmp.lt.s32.totalorder %v157_v21, 0  ;;  %v1546_v22 = vceil.f32 %v157_v21  ;;  %v1547_v23 = vfloor.f32 %v157_v21  ;;  %v1371_v25 = vsel %vm228_vm15, 1.0, %v1647_v35 }
  0xb2   :  { %v300_v27 = vmul.f32 %v1371_v25, %v1828_v31  ;;  %v281_v40 = vmul.f32 %v1826_v30, %v157_v21 }
  0xb3   :  { %v1548_v29 = vsel %vm1545_vm0, %v1546_v22, %v1547_v23 }
  0xb4   :  { %v1549_v32 = vcvt.f32.s32 %v1548_v29  ;;  %v316_v33 = vadd.f32 %v300_v27, %v280_v26 }
  0xb6   :  { %1388 = vmatmul.msk.f32.gmra.mxu1 %vm333_vm6, %v316_v33  ;;  %v213_v34 = vadd.s32 %v1818_v24, %v1549_v32 }
  0xb8   :  { %v160_v36 = vpop.f32.mrf.mxu0  ;;  %vm229_vm2 = vcmp.eq.s32.totalorder %v1820_v28, %v213_v34 }
  0xb9   :  { %vm1550_vm3 = vcmp.lt.s32.totalorder %v160_v36, 0  ;;  %v1551_v37 = vceil.f32 %v160_v36  ;;  %v1552_v38 = vfloor.f32 %v160_v36  ;;  %v1372_v39 = vsel %vm229_vm2, 1.0, %v1647_v35 }
  0xba   :  { %v301_v41 = vmul.f32 %v1372_v39, %v1828_v31  ;;  %v282_v51 = vmul.f32 %v1826_v30, %v160_v36 }
  0xbb   :  { %v1553_v42 = vsel %vm1550_vm3, %v1551_v37, %v1552_v38 }
  0xbc   :  { %v1554_v43 = vcvt.f32.s32 %v1553_v42  ;;  %v317_v44 = vadd.f32 %v301_v41, %v281_v40 }
  0xbe   :  { %1389 = vmatmul.msk.f32.gmra.mxu1 %vm333_vm6, %v317_v44  ;;  %v214_v45 = vadd.s32 %v1818_v24, %v1554_v43 }
  0xc0   :  { %v163_v46 = vpop.f32.mrf.mxu0  ;;  %vm230_vm4 = vcmp.eq.s32.totalorder %v1820_v28, %v214_v45 }
  0xc1   :  { %vm1555_vm5 = vcmp.lt.s32.totalorder %v163_v46, 0  ;;  %v1556_v47 = vceil.f32 %v163_v46  ;;  %v1557_v48 = vfloor.f32 %v163_v46  ;;  %v1373_v49 = vsel %vm230_vm4, 1.0, %v1647_v35 }
  0xc2   :  { %v302_v52 = vmul.f32 %v1373_v49, %v1828_v31  ;;  %v283_v60 = vmul.f32 %v1826_v30, %v163_v46 }
  0xc3   :  { %v1558_v50 = vsel %vm1555_vm5, %v1556_v47, %v1557_v48 }
  0xc4   :  { %v1559_v53 = vcvt.f32.s32 %v1558_v50  ;;  %v318_v54 = vadd.f32 %v302_v52, %v282_v51 }
  0xc6   :  { %v215_v55 = vadd.s32 %v1818_v24, %v1559_v53  ;;  %1390 = vmatmul.msk.f32.gmra.mxu1 %vm333_vm6, %v318_v54 }
  0xc8   :  { %v166_v56 = vpop.f32.mrf.mxu0  ;;  %vm231_vm7 = vcmp.eq.s32.totalorder %v1820_v28, %v215_v55 }
  0xc9   :  { %vm1560_vm8 = vcmp.lt.s32.totalorder %v166_v56, 0  ;;  %v1561_v57 = vceil.f32 %v166_v56  ;;  %v1562_v58 = vfloor.f32 %v166_v56  ;;  %v1374_v59 = vsel %vm231_vm7, 1.0, %v1647_v35 }
  0xca   :  { %v303_v62 = vmul.f32 %v1374_v59, %v1828_v31  ;;  %v284_v6 = vmul.f32 %v1826_v30, %v166_v56 }
  0xcb   :  { %v1563_v61 = vsel %vm1560_vm8, %v1561_v57, %v1562_v58  ;;  %vm675_vm8 = vcmask 64512  }
  0xcc   :  { %v1564_v63 = vcvt.f32.s32 %v1563_v61  ;;  %v319_v0 = vadd.f32 %v303_v62, %v283_v60 }
  0xce   :  { %v216_v1 = vadd.s32 %v1818_v24, %v1564_v63  ;;  %1391 = vmatmul.msk.f32.gmra.mxu1 %vm333_vm6, %v319_v0 }
  0xd0   :  { %v169_v2 = vpop.f32.mrf.mxu0  ;;  %vm232_vm9 = vcmp.eq.s32.totalorder %v1820_v28, %v216_v1 }
  0xd1   :  { %vm1565_vm10 = vcmp.lt.s32.totalorder %v169_v2, 0  ;;  %v1566_v3 = vceil.f32 %v169_v2  ;;  %v1567_v4 = vfloor.f32 %v169_v2  ;;  %v1375_v5 = vsel %vm232_vm9, 1.0, %v1647_v35 }
  0xd2   :  { %v304_v8 = vmul.f32 %v1375_v5, %v1828_v31  ;;  %v285_v16 = vmul.f32 %v1826_v30, %v169_v2 }
  0xd3   :  { %v1568_v7 = vsel %vm1565_vm10, %v1566_v3, %v1567_v4 }
  0xd4   :  { %v1569_v9 = vcvt.f32.s32 %v1568_v7  ;;  %v320_v10 = vadd.f32 %v304_v8, %v284_v6 }
  0xd6   :  { %v217_v11 = vadd.s32 %v1818_v24, %v1569_v9  ;;  %1392 = vmatmul.msk.f32.gmra.mxu1 %vm333_vm6, %v320_v10 }
  0xd8   :  { %v172_v12 = vpop.f32.mrf.mxu0  ;;  %vm233_vm11 = vcmp.eq.s32.totalorder %v1820_v28, %v217_v11 }
  0xd9   :  { %vm1570_vm12 = vcmp.lt.s32.totalorder %v172_v12, 0  ;;  %v1571_v13 = vceil.f32 %v172_v12  ;;  %v1572_v14 = vfloor.f32 %v172_v12  ;;  %v1376_v15 = vsel %vm233_vm11, 1.0, %v1647_v35 }
  0xda   :  { %v305_v20 = vmul.f32 %v1376_v15, %v1828_v31  ;;  %v286_v32 = vmul.f32 %v1826_v30, %v172_v12 }
  0xdb   :  { %v1573_v19 = vsel %vm1570_vm12, %v1571_v13, %v1572_v14 }
  0xdc   :  { %v1574_v21 = vcvt.f32.s32 %v1573_v19  ;;  %v321_v22 = vadd.f32 %v305_v20, %v285_v16 }
  0xde   :  { %v218_v23 = vadd.s32 %v1818_v24, %v1574_v21  ;;  %1393 = vmatmul.msk.f32.gmra.mxu1 %vm333_vm6, %v321_v22 }
  0xe0   :  { %v175_v25 = vpop.f32.mrf.mxu0  ;;  %vm234_vm13 = vcmp.eq.s32.totalorder %v1820_v28, %v218_v23 }
  0xe1   :  { %vm1575_vm14 = vcmp.lt.s32.totalorder %v175_v25, 0  ;;  %v1576_v26 = vceil.f32 %v175_v25  ;;  %v1577_v27 = vfloor.f32 %v175_v25  ;;  %v1377_v29 = vsel %vm234_vm13, 1.0, %v1647_v35 }
  0xe2   :  { %v306_v34 = vmul.f32 %v1377_v29, %v1828_v31  ;;  %v287_v43 = vmul.f32 %v1826_v30, %v175_v25 }
  0xe3   :  { %v1578_v33 = vsel %vm1575_vm14, %v1576_v26, %v1577_v27 }
  0xe4   :  { %v1579_v36 = vcvt.f32.s32 %v1578_v33  ;;  %v322_v37 = vadd.f32 %v306_v34, %v286_v32 }
  0xe6   :  { %v219_v38 = vadd.s32 %v1818_v24, %v1579_v36  ;;  %1394 = vmatmul.msk.f32.gmra.mxu1 %vm333_vm6, %v322_v37 }
  0xe8   :  { %v178_v39 = vpop.f32.mrf.mxu0  ;;  %vm235_vm15 = vcmp.eq.s32.totalorder %v1820_v28, %v219_v38 }
  0xe9   :  { %vm1580_vm0 = vcmp.lt.s32.totalorder %v178_v39, 0  ;;  %v1581_v40 = vceil.f32 %v178_v39  ;;  %v1582_v41 = vfloor.f32 %v178_v39  ;;  %v1378_v42 = vsel %vm235_vm15, 1.0, %v1647_v35 }
  0xea   :  { %v307_v45 = vmul.f32 %v1378_v42, %v1828_v31  ;;  %v288_v53 = vmul.f32 %v1826_v30, %v178_v39 }
  0xeb   :  { %v1583_v44 = vsel %vm1580_vm0, %v1581_v40, %v1582_v41 }
  0xec   :  { %v1584_v46 = vcvt.f32.s32 %v1583_v44  ;;  %v323_v47 = vadd.f32 %v307_v45, %v287_v43 }
  0xee   :  { %v220_v48 = vadd.s32 %v1818_v24, %v1584_v46  ;;  %1395 = vmatmul.msk.f32.gmra.mxu1 %vm333_vm6, %v323_v47 }
  0xf0   :  { %v181_v49 = vpop.f32.mrf.mxu0  ;;  %vm236_vm2 = vcmp.eq.s32.totalorder %v1820_v28, %v220_v48 }
  0xf1   :  { %vm1585_vm3 = vcmp.lt.s32.totalorder %v181_v49, 0  ;;  %v1586_v50 = vceil.f32 %v181_v49  ;;  %v1587_v51 = vfloor.f32 %v181_v49  ;;  %v1379_v52 = vsel %vm236_vm2, 1.0, %v1647_v35 }
  0xf2   :  { %v308_v55 = vmul.f32 %v1379_v52, %v1828_v31  ;;  %v289_v63 = vmul.f32 %v1826_v30, %v181_v49 }
  0xf3   :  { %v1588_v54 = vsel %vm1585_vm3, %v1586_v50, %v1587_v51 }
  0xf4   :  { %v1589_v56 = vcvt.f32.s32 %v1588_v54  ;;  %v324_v57 = vadd.f32 %v308_v55, %v288_v53 }
  0xf6   :  { %v221_v58 = vadd.s32 %v1818_v24, %v1589_v56  ;;  %1396 = vmatmul.msk.f32.gmra.mxu1 %vm333_vm6, %v324_v57 }
  0xf8   :  { %v184_v59 = vpop.f32.mrf.mxu0  ;;  %vm237_vm4 = vcmp.eq.s32.totalorder %v1820_v28, %v221_v58 }
  0xf9   :  { %vm1590_vm5 = vcmp.lt.s32.totalorder %v184_v59, 0  ;;  %v1591_v60 = vceil.f32 %v184_v59  ;;  %v1592_v61 = vfloor.f32 %v184_v59  ;;  %v1380_v62 = vsel %vm237_vm4, 1.0, %v1647_v35 }
  0xfa   :  { %v309_v1 = vmul.f32 %v1380_v62, %v1828_v31  ;;  %v290_v6 = vmul.f32 %v1826_v30, %v184_v59  ;;  %v1938_v30 = vld [vmem:[%s2411_s5] ss:$0 sm:$0xff]  ;;  %s1650_s5 = smov 104   ;;  %v984_v59 = vld [vmem:[%s2415_s9 + $0x18] sm:$0xff] }
  0xfb   :  { %v1593_v0 = vsel %vm1590_vm5, %v1591_v60, %v1592_v61  ;;  %1049 = vmatpush.msrb.mxu0 %v984_v59 }
  0xfc   :  { %v1594_v2 = vcvt.f32.s32 %v1593_v0  ;;  %v325_v3 = vadd.f32 %v309_v1, %v289_v63 }
  0xfe   :  { %v222_v4 = vadd.s32 %v1818_v24, %v1594_v2  ;;  %1397 = vmatmul.msk.f32.gmra.mxu1 %vm333_vm6, %v325_v3  ;;  %v863_v3 = vld [vmem:[%s2413_s7 + $0x18] sm:$0xff] }
 0x100   :  { %vm238_vm7 = vcmp.eq.s32.totalorder %v1820_v28, %v222_v4  ;;  %v862_v4 = vld [vmem:[%s2413_s7 + $0x10] sm:$0xff] }
 0x101   :  { %v1381_v5 = vsel %vm238_vm7, 1.0, %v1647_v35 }
 0x102   :  { %v310_v7 = vmul.f32 %v1381_v5, %v1828_v31 }
 0x104   :  { %v326_v8 = vadd.f32 %v310_v7, %v290_v6  ;;  %v1651_v6 = vmov 1.0   ;;  %v861_v7 = vld [vmem:[%s2413_s7 + $0x8] sm:$0xff] }
 0x106   :  { %1398 = vmatmul.msk.f32.gmra.mxu1 %vm333_vm6, %v326_v8  ;;  %vm763_vm6 = vcmask 261120  }
 0x10b   :  { %v1925_v9 = vpop.f32.mrf.mxu1 }
 0x10c   :  { %v2107_v56 = vadd.f32 %v1938_v30, %v1925_v9 }
 0x10e   :  { %v747_v2 = vmul.f32 %v2107_v56, %v2107_v56 }
 0x113   :  { %v1927_v10 = vpop.f32.mrf.mxu1 }
 0x114   :  { %v2091_v53 = vadd.f32 %v1938_v30, %v1927_v10 }
 0x116   :  { %v748_v61 = vmul.f32 %v2091_v53, %v2091_v53 }
 0x11b   :  { %v1929_v11 = vpop.f32.mrf.mxu1 }
 0x11c   :  { %v2073_v49 = vadd.f32 %v1938_v30, %v1929_v11 }
 0x11e   :  { %v749_v60 = vmul.f32 %v2073_v49, %v2073_v49 }
 0x123   :  { %v1931_v24 = vpop.f32.mrf.mxu1 }
 0x124   :  { %v2057_v46 = vadd.f32 %v1938_v30, %v1931_v24  ;;  %v860_v24 = vld [vmem:[%s2413_s7] sm:$0xff] }
 0x126   :  { %v750_v58 = vmul.f32 %v2057_v46, %v2057_v46 }
 0x12b   :  { %v1933_v12 = vpop.f32.mrf.mxu1 }
 0x12c   :  { %v2041_v43 = vadd.f32 %v1938_v30, %v1933_v12 }
 0x12e   :  { %v751_v55 = vmul.f32 %v2041_v43, %v2041_v43 }
 0x133   :  { %v418_v28 = vpop.f32.mrf.mxu1 }
 0x134   :  { %v2025_v40 = vadd.f32 %v1938_v30, %v418_v28 }
 0x136   :  { %v752_v54 = vmul.f32 %v2025_v40, %v2025_v40 }
 0x13b   :  { %v421_v13 = vpop.f32.mrf.mxu1 }
 0x13c   :  { %v2010_v37 = vadd.f32 %v1938_v30, %v421_v13 }
 0x13e   :  { %v753_v51 = vmul.f32 %v2010_v37, %v2010_v37 }
 0x143   :  { %v424_v31 = vpop.f32.mrf.mxu1 }
 0x144   :  { %v1941_v35 = vadd.f32 %v1938_v30, %v424_v31  ;;  %v983_v31 = vld [vmem:[%s2415_s9 + $0x10] sm:$0xff] }
 0x145   :  { %1050 = vmatpush.msrb.mxu0 %v983_v31 }
 0x146   :  { %481 = vrot.lane.b32.xlu2 %v1941_v35, %s1648_s28  ;;  %v754_v50 = vmul.f32 %v1941_v35, %v1941_v35 }
 0x14b   :  { %v427_v14 = vpop.f32.mrf.mxu1 }
 0x14c   :  { %v1946_v15 = vadd.f32 %v1938_v30, %v427_v14 }
 0x14e   :  { %547 = vrot.lane.b32.xlu1 %v1946_v15, %s1649_s29  ;;  %483 = vrot.lane.b32.xlu2 %v1946_v15, %s1648_s28  ;;  %v755_v48 = vmul.f32 %v1946_v15, %v1946_v15 }
 0x153   :  { %v430_v16 = vpop.f32.mrf.mxu1 }
 0x154   :  { %v1953_v19 = vadd.f32 %v1938_v30, %v430_v16 }
 0x156   :  { %613 = vrot.lane.b32.xlu0 %v1953_v19, %s1650_s5  ;;  %549 = vrot.lane.b32.xlu1 %v1953_v19, %s1649_s29  ;;  %v756_v47 = vmul.f32 %v1953_v19, %v1953_v19 }
 0x157   :  { %485 = vrot.lane.b32.xlu2 %v1953_v19, %s1648_s28 }
 0x15b   :  { %v433_v20 = vpop.f32.mrf.mxu1 }
 0x15c   :  { %v1962_v21 = vadd.f32 %v1938_v30, %v433_v20 }
 0x15e   :  { %615 = vrot.lane.b32.xlu0 %v1962_v21, %s1650_s5  ;;  %551 = vrot.lane.b32.xlu1 %v1962_v21, %s1649_s29  ;;  %v757_v45 = vmul.f32 %v1962_v21, %v1962_v21 }
 0x15f   :  { %487 = vrot.lane.b32.xlu2 %v1962_v21, %s1648_s28 }
 0x163   :  { %v436_v22 = vpop.f32.mrf.mxu1 }
 0x164   :  { %v1971_v23 = vadd.f32 %v1938_v30, %v436_v22 }
 0x166   :  { %617 = vrot.lane.b32.xlu0 %v1971_v23, %s1650_s5  ;;  %553 = vrot.lane.b32.xlu1 %v1971_v23, %s1649_s29  ;;  %v758_v44 = vmul.f32 %v1971_v23, %v1971_v23 }
 0x167   :  { %489 = vrot.lane.b32.xlu2 %v1971_v23, %s1648_s28 }
 0x16b   :  { %v439_v25 = vpop.f32.mrf.mxu1 }
 0x16c   :  { %v1980_v26 = vadd.f32 %v1938_v30, %v439_v25 }
 0x16e   :  { %619 = vrot.lane.b32.xlu0 %v1980_v26, %s1650_s5  ;;  %555 = vrot.lane.b32.xlu1 %v1980_v26, %s1649_s29  ;;  %v759_v42 = vmul.f32 %v1980_v26, %v1980_v26 }
 0x16f   :  { %491 = vrot.lane.b32.xlu2 %v1980_v26, %s1648_s28 }
 0x173   :  { %v442_v27 = vpop.f32.mrf.mxu1 }
 0x174   :  { %v1989_v29 = vadd.f32 %v1938_v30, %v442_v27 }
 0x176   :  { %621 = vrot.lane.b32.xlu0 %v1989_v29, %s1650_s5  ;;  %557 = vrot.lane.b32.xlu1 %v1989_v29, %s1649_s29  ;;  %v760_v41 = vmul.f32 %v1989_v29, %v1989_v29 }
 0x177   :  { %493 = vrot.lane.b32.xlu2 %v1989_v29, %s1648_s28 }
 0x17b   :  { %v445_v32 = vpop.f32.mrf.mxu1 }
 0x17c   :  { %v1998_v33 = vadd.f32 %v1938_v30, %v445_v32 }
 0x17e   :  { %623 = vrot.lane.b32.xlu0 %v1998_v33, %s1650_s5  ;;  %495 = vrot.lane.b32.xlu1 %v1998_v33, %s1648_s28  ;;  %v761_v39 = vmul.f32 %v1998_v33, %v1998_v33 }
 0x17f   :  { %559 = vrot.lane.b32.xlu2 %v1998_v33, %s1649_s29 }
 0x183   :  { %v448_v34 = vpop.f32.mrf.mxu1 }
 0x184   :  { %v2007_v36 = vadd.f32 %v1938_v30, %v448_v34 }
 0x186   :  { %625 = vrot.lane.b32.xlu1 %v2007_v36, %s1650_s5  ;;  %497 = vrot.lane.b32.xlu0 %v2007_v36, %s1648_s28  ;;  %v762_v38 = vmul.f32 %v2007_v36, %v2007_v36 }
 0x187   :  { %479 = vrot.lane.b32.xlu2 %v2010_v37, %s1648_s28 }
 0x188   :  { %1416 = vmatpush.xpose.msk.msra.mxu3 %vm763_vm6, %v762_v38 }
 0x18c   :  { %1417 = vmatpush.xpose.msk.msra.mxu3 %vm763_vm6, %v761_v39 }
 0x18e   :  { %545 = vrot.lane.b32.xlu1 %v1941_v35, %s1649_s29  ;;  %561 = vrot.lane.b32.xlu0 %v2007_v36, %s1649_s29 }
 0x18f   :  { %477 = vrot.lane.b32.xlu2 %v2025_v40, %s1648_s28 }
 0x190   :  { %1418 = vmatpush.xpose.msk.msra.mxu3 %vm763_vm6, %v760_v41 }
 0x194   :  { %1419 = vmatpush.xpose.msk.msra.mxu3 %vm763_vm6, %v759_v42  ;;  %v982_v42 = vld [vmem:[%s2415_s9 + $0x8] sm:$0xff] }
 0x195   :  { %1051 = vmatpush.msrb.mxu0 %v982_v42 }
 0x196   :  { %543 = vrot.lane.b32.xlu1 %v2010_v37, %s1649_s29  ;;  %611 = vrot.lane.b32.xlu0 %v1946_v15, %s1650_s5 }
 0x197   :  { %475 = vrot.lane.b32.xlu2 %v2041_v43, %s1648_s28 }
 0x198   :  { %1420 = vmatpush.xpose.msk.msra.mxu3 %vm763_vm6, %v758_v44 }
 0x19c   :  { %1421 = vmatpush.xpose.msk.msra.mxu3 %vm763_vm6, %v757_v45 }
 0x19e   :  { %541 = vrot.lane.b32.xlu1 %v2025_v40, %s1649_s29  ;;  %609 = vrot.lane.b32.xlu0 %v1941_v35, %s1650_s5 }
 0x19f   :  { %473 = vrot.lane.b32.xlu2 %v2057_v46, %s1648_s28 }
 0x1a0   :  { %1422 = vmatpush.xpose.msk.msra.mxu3 %vm763_vm6, %v756_v47  ;;  %v2086_v52 = vpop.permute.xlu2 %481 }
 0x1a4   :  { %1423 = vmatpush.xpose.msk.msra.mxu3 %vm763_vm6, %v755_v48 }
 0x1a6   :  { %539 = vrot.lane.b32.xlu1 %v2041_v43, %s1649_s29  ;;  %607 = vrot.lane.b32.xlu0 %v2010_v37, %s1650_s5 }
 0x1a7   :  { %471 = vrot.lane.b32.xlu2 %v2073_v49, %s1648_s28 }
 0x1a8   :  { %1424 = vmatpush.xpose.msk.msra.mxu3 %vm763_vm6, %v754_v50  ;;  %v484_v57 = vpop.permute.xlu2 %483 }
 0x1a9   :  { %v523_v62 = vadd.f32 %v484_v57, %v1946_v15 }
 0x1ac   :  { %1425 = vmatpush.xpose.msk.msra.mxu3 %vm763_vm6, %v753_v51 }
 0x1ae   :  { %537 = vrot.lane.b32.xlu1 %v2057_v46, %s1649_s29  ;;  %605 = vrot.lane.b32.xlu0 %v2025_v40, %s1650_s5 }
 0x1af   :  { %469 = vrot.lane.b32.xlu2 %v2091_v53, %s1648_s28 }
 0x1b0   :  { %1426 = vmatpush.xpose.msk.msra.mxu3 %vm763_vm6, %v752_v54 }
 0x1b1   :  { %v486_v63 = vpop.permute.xlu2 %485 }
 0x1b2   :  { %v524_v5 = vadd.f32 %v486_v63, %v1953_v19 }
 0x1b4   :  { %1427 = vmatpush.xpose.msk.msra.mxu3 %vm763_vm6, %v751_v55 }
 0x1b6   :  { %535 = vrot.lane.b32.xlu1 %v2073_v49, %s1649_s29  ;;  %603 = vrot.lane.b32.xlu0 %v2041_v43, %s1650_s5 }
 0x1b7   :  { %467 = vrot.lane.b32.xlu2 %v2107_v56, %s1648_s28 }
 0x1b8   :  { %1428 = vmatpush.xpose.msk.msra.mxu3 %vm763_vm6, %v750_v58 }
 0x1b9   :  { %v488_v10 = vpop.permute.xlu2 %487 }
 0x1ba   :  { %v525_v31 = vadd.f32 %v488_v10, %v1962_v21  ;;  %v981_v10 = vld [vmem:[%s2415_s9] sm:$0xff] }
 0x1bb   :  { %1052 = vmatpush.msrb.mxu0 %v981_v10 }
 0x1bc   :  { %1429 = vmatpush.xpose.msk.msra.mxu3 %vm763_vm6, %v749_v60 }
 0x1be   :  { %533 = vrot.lane.b32.xlu1 %v2091_v53, %s1649_s29  ;;  %601 = vrot.lane.b32.xlu0 %v2057_v46, %s1650_s5 }
 0x1bf   :  { %595 = vrot.lane.b32.xlu2 %v2107_v56, %s1650_s5 }
 0x1c0   :  { %v548_v0 = vpop.permute.xlu1 %547  ;;  %1430 = vmatpush.xpose.msk.msra.mxu3 %vm763_vm6, %v748_v61 }
 0x1c1   :  { %v2134_v1 = vadd.f32 %v548_v0, %v523_v62  ;;  %v490_v30 = vpop.permute.xlu2 %489 }
 0x1c4   :  { %1431 = vmatpush.xpose.msk.msra.mxu3 %vm763_vm6, %v747_v2 }
 0x1c6   :  { %531 = vrot.lane.b32.xlu1 %v2107_v56, %s1649_s29  ;;  %599 = vrot.lane.b32.xlu0 %v2073_v49, %s1650_s5 }
 0x1c7   :  { %1432 = vmatmul.msk.f32.vlgmr.msra.gmra.mxu3 %vm763_vm6, %v1651_v6 }
 0x1c8   :  { %912 = vmatpush.msrb.mxu3 %v863_v3  ;;  %v614_v8 = vpop.permute.xlu0 %613  ;;  %v550_v9 = vpop.permute.xlu1 %549 }
 0x1c9   :  { %v588_v11 = vadd.f32 %v550_v9, %v524_v5  ;;  %v492_v20 = vpop.permute.xlu2 %491 }
 0x1ca   :  { %913 = vmatpush.msrb.mxu3 %v862_v4  ;;  %v527_v0 = vadd.f32 %v492_v20, %v1980_v26 }
 0x1cb   :  { %v2158_v12 = vadd.f32 %v614_v8, %v588_v11  ;;  %v526_v8 = vadd.f32 %v490_v30, %v1971_v23 }
 0x1cc   :  { %914 = vmatpush.msrb.mxu3 %v861_v7 }
 0x1ce   :  { %915 = vmatpush.msrb.mxu3 %v860_v24  ;;  %597 = vrot.lane.b32.xlu0 %v2091_v53, %s1650_s5 }
 0x1cf   :  { %1450 = vmatmul.msk.f32.vlgmr.msrb.gmra.mxu3 %vm763_vm6, %v2107_v56 }
 0x1d0   :  { %v2164_v28 = vpop.permute.xlu0 %615  ;;  %v552_v13 = vpop.permute.xlu1 %551 }
 0x1d1   :  { %v494_v27 = vpop.permute.xlu2 %493 }
 0x1d2   :  { %v528_v58 = vadd.f32 %v494_v27, %v1989_v29 }
 0x1d7   :  { %1451 = vmatmul.msk.f32.gmra.mxu3 %vm763_vm6, %v2091_v53 }
 0x1d8   :  { %v618_v14 = vpop.permute.xlu0 %617  ;;  %v554_v16 = vpop.permute.xlu1 %553 }
 0x1d9   :  { %v560_v41 = vpop.permute.xlu2 %559  ;;  %v590_v9 = vadd.f32 %v554_v16, %v526_v8 }
 0x1df   :  { %1452 = vmatmul.msk.f32.gmra.mxu3 %vm763_vm6, %v2073_v49 }
 0x1e0   :  { %v620_v22 = vpop.permute.xlu0 %619  ;;  %v556_v25 = vpop.permute.xlu1 %555 }
 0x1e1   :  { %v480_v47 = vpop.permute.xlu2 %479  ;;  %v591_v4 = vadd.f32 %v556_v25, %v527_v0  ;;  %v589_v25 = vadd.f32 %v552_v13, %v525_v31 }
 0x1e3   :  { %v655_v11 = vadd.f32 %v620_v22, %v591_v4  ;;  %v653_v30 = vadd.f32 %v2164_v28, %v589_v25  ;;  %v522_v28 = vadd.f32 %v2086_v52, %v1941_v35 }
 0x1e5   :  { %v669_v13 = vmul.f32 %v653_v30, %v653_v30  ;;  %v1609_v30 = vld [vmem:[%s2406_s0 + $0x58] sm:$0xff] }
 0x1e7   :  { %1453 = vmatmul.msk.f32.gmra.mxu3 %vm763_vm6, %v2057_v46 }
 0x1e8   :  { %v622_v32 = vpop.permute.xlu0 %621  ;;  %v558_v34 = vpop.permute.xlu1 %557 }
 0x1e9   :  { %v592_v60 = vadd.f32 %v558_v34, %v528_v58  ;;  %v478_v61 = vpop.permute.xlu2 %477 }
 0x1ea   :  { %v520_v52 = vadd.f32 %v478_v61, %v2025_v40 }
 0x1eb   :  { %v656_v5 = vadd.f32 %v622_v32, %v592_v60  ;;  %v654_v32 = vadd.f32 %v618_v14, %v590_v9 }
 0x1ed   :  { %v672_v24 = vmul.f32 %v656_v5, %v656_v5  ;;  %v670_v16 = vmul.f32 %v654_v32, %v654_v32 }
 0x1ef   :  { %1454 = vmatmul.msk.f32.gmra.mxu3 %vm763_vm6, %v2041_v43 }
 0x1f0   :  { %v624_v38 = vpop.permute.xlu0 %623  ;;  %v496_v39 = vpop.permute.xlu1 %495 }
 0x1f1   :  { %v529_v48 = vadd.f32 %v496_v39, %v1998_v33  ;;  %v476_v20 = vpop.permute.xlu2 %475  ;;  %v668_v39 = vmul.f32 %v2158_v12, %v2158_v12 }
 0x1f3   :  { %v593_v55 = vadd.f32 %v560_v41, %v529_v48 }
 0x1f5   :  { %v657_v63 = vadd.f32 %v624_v38, %v593_v55  ;;  %v671_v38 = vmul.f32 %v655_v11, %v655_v11 }
 0x1f7   :  { %1455 = vmatmul.msk.f32.gmra.mxu3 %vm763_vm6, %v2025_v40  ;;  %v673_v7 = vmul.f32 %v657_v63, %v657_v63 }
 0x1f8   :  { %v626_v44 = vpop.permute.xlu1 %625  ;;  %v498_v45 = vpop.permute.xlu0 %497 }
 0x1f9   :  { %v530_v50 = vadd.f32 %v498_v45, %v2007_v36  ;;  %v474_v14 = vpop.permute.xlu2 %473  ;;  %v521_v45 = vadd.f32 %v480_v47, %v2010_v37 }
 0x1ff   :  { %1456 = vmatmul.msk.f32.gmra.mxu3 %vm763_vm6, %v2010_v37  ;;  %v519_v37 = vadd.f32 %v476_v20, %v2041_v43 }
 0x200   :  { %v546_v51 = vpop.permute.xlu1 %545  ;;  %v562_v54 = vpop.permute.xlu0 %561 }
 0x201   :  { %v594_v57 = vadd.f32 %v562_v54, %v530_v50 }
 0x203   :  { %v658_v59 = vadd.f32 %v626_v44, %v594_v57 }
 0x205   :  { %v674_v62 = vmul.f32 %v658_v59, %v658_v59  ;;  %v518_v59 = vadd.f32 %v474_v14, %v2057_v46  ;;  %v1121_v46 = vld [vmem:[%s2417_s11 + $0x18] sm:$0xff] }
 0x206   :  { %1186 = vmatpush.msrb.mxu1 %v1121_v46 }
 0x207   :  { %1399 = vmatpush.xpose.msk.msra.mxu2 %vm675_vm8, %v674_v62  ;;  %1457 = vmatmul.msk.f32.gmra.mxu3 %vm763_vm6, %v1941_v35  ;;  %v472_v35 = vpop.permute.xlu2 %471 }
 0x208   :  { %v544_v2 = vpop.permute.xlu1 %543  ;;  %v612_v3 = vpop.permute.xlu0 %611 }
 0x209   :  { %v651_v41 = vadd.f32 %v612_v3, %v2134_v1  ;;  %v585_v54 = vadd.f32 %v544_v2, %v521_v45  ;;  %v517_v2 = vadd.f32 %v472_v35, %v2073_v49 }
 0x20b   :  { %1400 = vmatpush.xpose.msk.msra.mxu2 %vm675_vm8, %v673_v7  ;;  %v667_v48 = vmul.f32 %v651_v41, %v651_v41  ;;  %v1612_v41 = vld [vmem:[%s2406_s0 + $0x40] sm:$0xff] }
 0x20f   :  { %1401 = vmatpush.xpose.msk.msra.mxu2 %vm675_vm8, %v672_v24  ;;  %1458 = vmatmul.msk.f32.gmra.mxu3 %vm763_vm6, %v1946_v15  ;;  %v470_v61 = vpop.permute.xlu2 %469 }
 0x210   :  { %v542_v27 = vpop.permute.xlu1 %541  ;;  %v610_v34 = vpop.permute.xlu0 %609  ;;  %v516_v11 = vadd.f32 %v470_v61, %v2091_v53  ;;  %v836_v61 = vld [vmem:[%s2412_s6] sm:$0x1] }
 0x213   :  { %1402 = vmatpush.xpose.msk.msra.mxu2 %vm675_vm8, %v671_v38 }
 0x217   :  { %1403 = vmatpush.xpose.msk.msra.mxu2 %vm675_vm8, %v670_v16  ;;  %1459 = vmatmul.msk.f32.gmra.mxu3 %vm763_vm6, %v1953_v19  ;;  %v586_v19 = vadd.f32 %v546_v51, %v522_v28  ;;  %v584_v51 = vadd.f32 %v542_v27, %v520_v52 }
 0x218   :  { %v540_v15 = vpop.permute.xlu1 %539  ;;  %v608_v22 = vpop.permute.xlu0 %607 }
 0x219   :  { %v650_v50 = vadd.f32 %v610_v34, %v586_v19  ;;  %v649_v1 = vadd.f32 %v608_v22, %v585_v54  ;;  %v583_v58 = vadd.f32 %v540_v15, %v519_v37  ;;  %v1610_v22 = vld [vmem:[%s2406_s0 + $0x50] sm:$0xff]  ;;  %v1613_v19 = vld [vmem:[%s2406_s0 + $0x38] sm:$0xff] }
 0x21b   :  { %1404 = vmatpush.xpose.msk.msra.mxu2 %vm675_vm8, %v669_v13  ;;  %v666_v12 = vmul.f32 %v650_v50, %v650_v50  ;;  %v665_v47 = vmul.f32 %v649_v1, %v649_v1  ;;  %v1611_v13 = vld [vmem:[%s2406_s0 + $0x48] sm:$0xff] }
 0x21c   :  { %v1615_v50 = vld [vmem:[%s2406_s0 + $0x28] sm:$0xff] }
 0x21d   :  { %v1119_v1 = vld [vmem:[%s2417_s11 + $0x8] sm:$0xff] }
 0x21f   :  { %1405 = vmatpush.xpose.msk.msra.mxu2 %vm675_vm8, %v668_v39  ;;  %1460 = vmatmul.msk.f32.gmra.mxu3 %vm763_vm6, %v1962_v21 }
 0x220   :  { %v538_v42 = vpop.permute.xlu1 %537  ;;  %v606_v44 = vpop.permute.xlu0 %605 }
 0x221   :  { %v648_v57 = vadd.f32 %v606_v44, %v584_v51  ;;  %v582_v62 = vadd.f32 %v538_v42, %v518_v59  ;;  %v1617_v51 = vld [vmem:[%s2406_s0 + $0x18] sm:$0xff] }
 0x223   :  { %1406 = vmatpush.xpose.msk.msra.mxu2 %vm675_vm8, %v667_v48  ;;  %v664_v40 = vmul.f32 %v648_v57, %v648_v57  ;;  %v1614_v48 = vld [vmem:[%s2406_s0 + $0x30] sm:$0xff]  ;;  %v1619_v57 = vld [vmem:[%s2406_s0 + $0x8] sm:$0xff] }
 0x227   :  { %1407 = vmatpush.xpose.msk.msra.mxu2 %vm675_vm8, %v666_v12  ;;  %1461 = vmatmul.msk.f32.gmra.mxu3 %vm763_vm6, %v1971_v23  ;;  %v1616_v12 = vld [vmem:[%s2406_s0 + $0x20] sm:$0xff] }
 0x228   :  { %v536_v21 = vpop.permute.xlu1 %535  ;;  %v604_v55 = vpop.permute.xlu0 %603 }
 0x229   :  { %v647_v60 = vadd.f32 %v604_v55, %v583_v58  ;;  %v581_v4 = vadd.f32 %v536_v21, %v517_v2 }
 0x22b   :  { %1408 = vmatpush.xpose.msk.msra.mxu2 %vm675_vm8, %v665_v47  ;;  %v663_v63 = vmul.f32 %v647_v60, %v647_v60  ;;  %v1618_v47 = vld [vmem:[%s2406_s0 + $0x10] sm:$0xff]  ;;  %v1620_v60 = vld [vmem:[%s2406_s0] sm:$0xff] }
 0x22f   :  { %1409 = vmatpush.xpose.msk.msra.mxu2 %vm675_vm8, %v664_v40  ;;  %1462 = vmatmul.msk.f32.gmra.mxu3 %vm763_vm6, %v1980_v26  ;;  %v468_v26 = vpop.permute.xlu2 %467 }
 0x230   :  { %v602_v23 = vpop.permute.xlu0 %601  ;;  %v534_v43 = vpop.permute.xlu1 %533  ;;  %v515_v49 = vadd.f32 %v468_v26, %v2107_v56 }
 0x231   :  { %v646_v0 = vadd.f32 %v602_v23, %v582_v62  ;;  %v580_v24 = vadd.f32 %v534_v43, %v516_v11 }
 0x233   :  { %1410 = vmatpush.xpose.msk.msra.mxu2 %vm675_vm8, %v663_v63  ;;  %v662_v3 = vmul.f32 %v646_v0, %v646_v0 }
 0x237   :  { %1411 = vmatpush.xpose.msk.msra.mxu2 %vm675_vm8, %v662_v3  ;;  %1463 = vmatmul.msk.f32.gmra.mxu3 %vm763_vm6, %v1989_v29  ;;  %v596_v27 = vpop.permute.xlu2 %595  ;;  %v1118_v3 = vld [vmem:[%s2417_s11] sm:$0xff] }
 0x238   :  { %v600_v5 = vpop.permute.xlu0 %599  ;;  %v532_v9 = vpop.permute.xlu1 %531 }
 0x239   :  { %v645_v7 = vadd.f32 %v600_v5, %v581_v4  ;;  %v579_v31 = vadd.f32 %v532_v9, %v515_v49 }
 0x23b   :  { %v661_v8 = vmul.f32 %v645_v7, %v645_v7  ;;  %v643_v34 = vadd.f32 %v596_v27, %v579_v31 }
 0x23d   :  { %1412 = vmatpush.xpose.msk.msra.mxu2 %vm675_vm8, %v661_v8  ;;  %v659_v32 = vmul.f32 %v643_v34, %v643_v34 }
 0x23f   :  { %1464 = vmatmul.msk.f32.gmra.mxu3 %vm763_vm6, %v1998_v33  ;;  %v2254_v33 = vld [vmem:[%s2414_s8] ss:$0 sm:$0xff] }
 0x240   :  { %v598_v29 = vpop.permute.xlu0 %597 }
 0x241   :  { %v644_v20 = vadd.f32 %v598_v29, %v580_v24 }
 0x243   :  { %v660_v25 = vmul.f32 %v644_v20, %v644_v20 }
 0x245   :  { %1413 = vmatpush.xpose.msk.msra.mxu2 %vm675_vm8, %v660_v25 }
 0x247   :  { %1465 = vmatmul.msk.f32.gmra.mxu3 %vm763_vm6, %v2007_v36  ;;  %v1607_v36 = vld [vmem:[%s2406_s0 + $0x68] sm:$0xff] }
 0x249   :  { %1414 = vmatpush.xpose.msk.msra.mxu2 %vm675_vm8, %v659_v32 }
 0x24a   :  { %v2243_v53 = vpop.f32.mrf.mxu3 }
 0x24c   :  { %1415 = vmatmul.msk.f32.vlgmr.msra.gmra.mxu2 %vm675_vm8, %v1651_v6  ;;  %v1608_v6 = vld [vmem:[%s2406_s0 + $0x60] sm:$0xff] }
 0x24d   :  { %1433 = vmatpush.xpose.msk.msrb.mxu2 %vm69_vm1, %v1808_v18 }
 0x251   :  { %1434 = vmatpush.xpose.msk.msrb.mxu2 %vm69_vm1, %v1801_v17  ;;  %v1120_v17 = vld [vmem:[%s2417_s11 + $0x10] sm:$0xff] }
 0x252   :  { %v917_v56 = vpop.f32.mrf.mxu3  ;;  %1187 = vmatpush.msrb.mxu1 %v1120_v17 }
 0x253   :  { %v918_v18 = vadd.f32 %v2254_v33, %v917_v56 }
 0x254   :  { %1188 = vmatpush.msrb.mxu1 %v1119_v1 }
 0x255   :  { %1435 = vmatpush.xpose.msk.msrb.mxu2 %vm69_vm1, %v1607_v36  ;;  %v965_v38 = vmax.f32 %v918_v18, 0.0 }
 0x256   :  { %1189 = vmatpush.msrb.mxu1 %v1118_v3 }
 0x257   :  { %1466 = vmatmul.msk.f32.vlgmr.msrb.gmra.mxu0 %vm763_vm6, %v965_v38 }
 0x259   :  { %1436 = vmatpush.xpose.msk.msrb.mxu2 %vm69_vm1, %v1608_v6  ;;  %v1605_v6 = vld [vmem:[%s2416_s10] ss:$0 sm:$0xff] }
 0x25a   :  { %v920_v16 = vpop.f32.mrf.mxu3 }
 0x25b   :  { %v921_v10 = vadd.f32 %v2254_v33, %v920_v16 }
 0x25d   :  { %1437 = vmatpush.xpose.msk.msrb.mxu2 %vm69_vm1, %v1609_v30  ;;  %v966_v15 = vmax.f32 %v921_v10, 0.0 }
 0x25f   :  { %1467 = vmatmul.msk.f32.gmra.mxu0 %vm763_vm6, %v966_v15 }
 0x261   :  { %1438 = vmatpush.xpose.msk.msrb.mxu2 %vm69_vm1, %v1610_v22 }
 0x262   :  { %v923_v14 = vpop.f32.mrf.mxu3 }
 0x263   :  { %v924_v28 = vadd.f32 %v2254_v33, %v923_v14 }
 0x265   :  { %1439 = vmatpush.xpose.msk.msrb.mxu2 %vm69_vm1, %v1611_v13  ;;  %v967_v39 = vmax.f32 %v924_v28, 0.0 }
 0x267   :  { %1468 = vmatmul.msk.f32.gmra.mxu0 %vm763_vm6, %v967_v39 }
 0x269   :  { %1440 = vmatpush.xpose.msk.msrb.mxu2 %vm69_vm1, %v1612_v41 }
 0x26a   :  { %v926_v42 = vpop.f32.mrf.mxu3 }
 0x26b   :  { %v927_v44 = vadd.f32 %v2254_v33, %v926_v42 }
 0x26d   :  { %1441 = vmatpush.xpose.msk.msrb.mxu2 %vm69_vm1, %v1613_v19  ;;  %v968_v45 = vmax.f32 %v927_v44, 0.0 }
 0x26f   :  { %1469 = vmatmul.msk.f32.gmra.mxu0 %vm763_vm6, %v968_v45 }
 0x271   :  { %1442 = vmatpush.xpose.msk.msrb.mxu2 %vm69_vm1, %v1614_v48 }
 0x272   :  { %v929_v54 = vpop.f32.mrf.mxu3 }
 0x273   :  { %v930_v35 = vadd.f32 %v2254_v33, %v929_v54 }
 0x275   :  { %1443 = vmatpush.xpose.msk.msrb.mxu2 %vm69_vm1, %v1615_v50  ;;  %v969_v52 = vmax.f32 %v930_v35, 0.0 }
 0x277   :  { %1470 = vmatmul.msk.f32.gmra.mxu0 %vm763_vm6, %v969_v52 }
 0x279   :  { %1444 = vmatpush.xpose.msk.msrb.mxu2 %vm69_vm1, %v1616_v12 }
 0x27a   :  { %v932_v21 = vpop.f32.mrf.mxu3 }
 0x27b   :  { %v933_v55 = vadd.f32 %v2254_v33, %v932_v21 }
 0x27d   :  { %1445 = vmatpush.xpose.msk.msrb.mxu2 %vm69_vm1, %v1617_v51  ;;  %v970_v37 = vmax.f32 %v933_v55, 0.0 }
 0x27f   :  { %1471 = vmatmul.msk.f32.gmra.mxu0 %vm763_vm6, %v970_v37 }
 0x281   :  { %1446 = vmatpush.xpose.msk.msrb.mxu2 %vm69_vm1, %v1618_v47 }
 0x282   :  { %v935_v58 = vpop.f32.mrf.mxu3 }
 0x283   :  { %v936_v59 = vadd.f32 %v2254_v33, %v935_v58 }
 0x285   :  { %1447 = vmatpush.xpose.msk.msrb.mxu2 %vm69_vm1, %v1619_v57  ;;  %v971_v40 = vmax.f32 %v936_v59, 0.0 }
 0x287   :  { %1472 = vmatmul.msk.f32.gmra.mxu0 %vm763_vm6, %v971_v40 }
 0x289   :  { %1448 = vmatpush.xpose.msk.msrb.mxu2 %vm69_vm1, %v1620_v60 }
 0x28a   :  { %v938_v62 = vpop.f32.mrf.mxu3 }
 0x28b   :  { %v939_v23 = vadd.f32 %v2254_v33, %v938_v62 }
 0x28c   :  { %1449 = vmatmul.msk.f32.vlgmr.msrb.gmra.mxu2 %vm69_vm1, %v836_v61 }
 0x28d   :  { %v972_v63 = vmax.f32 %v939_v23, 0.0 }
 0x28f   :  { %1473 = vmatmul.msk.f32.gmra.mxu0 %vm763_vm6, %v972_v63 }
 0x292   :  { %v941_v0 = vpop.f32.mrf.mxu3 }
 0x293   :  { %v942_v43 = vadd.f32 %v2254_v33, %v941_v0 }
 0x295   :  { %v973_v2 = vmax.f32 %v942_v43, 0.0 }
 0x297   :  { %1474 = vmatmul.msk.f32.gmra.mxu0 %vm763_vm6, %v973_v2 }
 0x29a   :  { %v944_v4 = vpop.f32.mrf.mxu3 }
 0x29b   :  { %v945_v46 = vadd.f32 %v2254_v33, %v944_v4 }
 0x29d   :  { %v974_v26 = vmax.f32 %v945_v46, 0.0 }
 0x29f   :  { %1475 = vmatmul.msk.f32.gmra.mxu0 %vm763_vm6, %v974_v26 }
 0x2a2   :  { %v947_v5 = vpop.f32.mrf.mxu3 }
 0x2a3   :  { %v948_v7 = vadd.f32 %v2254_v33, %v947_v5 }
 0x2a5   :  { %v975_v8 = vmax.f32 %v948_v7, 0.0 }
 0x2a7   :  { %1476 = vmatmul.msk.f32.gmra.mxu0 %vm763_vm6, %v975_v8 }
 0x2aa   :  { %v950_v9 = vpop.f32.mrf.mxu3 }
 0x2ab   :  { %v951_v11 = vadd.f32 %v2254_v33, %v950_v9 }
 0x2ad   :  { %v976_v49 = vmax.f32 %v951_v11, 0.0 }
 0x2af   :  { %1477 = vmatmul.msk.f32.gmra.mxu0 %vm763_vm6, %v976_v49 }
 0x2b2   :  { %v953_v24 = vpop.f32.mrf.mxu3 }
 0x2b3   :  { %v954_v31 = vadd.f32 %v2254_v33, %v953_v24 }
 0x2b5   :  { %v977_v29 = vmax.f32 %v954_v31, 0.0 }
 0x2b7   :  { %1478 = vmatmul.msk.f32.gmra.mxu0 %vm763_vm6, %v977_v29 }
 0x2ba   :  { %v956_v20 = vpop.f32.mrf.mxu3 }
 0x2bb   :  { %v957_v27 = vadd.f32 %v2254_v33, %v956_v20 }
 0x2bd   :  { %v978_v34 = vmax.f32 %v957_v27, 0.0 }
 0x2bf   :  { %1479 = vmatmul.msk.f32.gmra.mxu0 %vm763_vm6, %v978_v34 }
 0x2c2   :  { %v959_v25 = vpop.f32.mrf.mxu3 }
 0x2c3   :  { %v960_v32 = vadd.f32 %v2254_v33, %v959_v25 }
 0x2c5   :  { %v979_v36 = vmax.f32 %v960_v32, 0.0 }
 0x2c7   :  { %1480 = vmatmul.msk.f32.gmra.mxu0 %vm763_vm6, %v979_v36 }
 0x2ca   :  { %v962_v56 = vpop.f32.mrf.mxu3 }
 0x2cb   :  { %v963_v18 = vadd.f32 %v2254_v33, %v962_v56 }
 0x2cd   :  { %v980_v38 = vmax.f32 %v963_v18, 0.0 }
 0x2cf   :  { %1481 = vmatmul.msk.f32.gmra.mxu0 %vm763_vm6, %v980_v38 }
 0x2d4   :  { %v1054_v17 = vpop.f32.mrf.mxu0 }
 0x2d5   :  { %v1055_v30 = vadd.f32 %v1605_v6, %v1054_v17 }
 0x2d7   :  { %v1102_v16 = vmax.f32 %v1055_v30, 0.0 }
 0x2d9   :  { %1482 = vmatmul.msk.f32.vlgmr.msrb.gmra.mxu1 %vm763_vm6, %v1102_v16 }
 0x2dc   :  { %v1057_v10 = vpop.f32.mrf.mxu0 }
 0x2dd   :  { %v1058_v15 = vadd.f32 %v1605_v6, %v1057_v10 }
 0x2df   :  { %v1103_v22 = vmax.f32 %v1058_v15, 0.0 }
 0x2e1   :  { %1483 = vmatmul.msk.f32.gmra.mxu1 %vm763_vm6, %v1103_v22 }
 0x2e4   :  { %v1060_v13 = vpop.f32.mrf.mxu0 }
 0x2e5   :  { %v1061_v14 = vadd.f32 %v1605_v6, %v1060_v13 }
 0x2e7   :  { %v1104_v33 = vmax.f32 %v1061_v14, 0.0 }
 0x2e9   :  { %1484 = vmatmul.msk.f32.gmra.mxu1 %vm763_vm6, %v1104_v33 }
 0x2ec   :  { %v1063_v28 = vpop.f32.mrf.mxu0 }
 0x2ed   :  { %v1064_v39 = vadd.f32 %v1605_v6, %v1063_v28 }
 0x2ef   :  { %v1105_v41 = vmax.f32 %v1064_v39, 0.0 }
 0x2f1   :  { %1485 = vmatmul.msk.f32.gmra.mxu1 %vm763_vm6, %v1105_v41 }
 0x2f4   :  { %v1066_v19 = vpop.f32.mrf.mxu0 }
 0x2f5   :  { %v1067_v42 = vadd.f32 %v1605_v6, %v1066_v19 }
 0x2f7   :  { %v1106_v44 = vmax.f32 %v1067_v42, 0.0 }
 0x2f9   :  { %1486 = vmatmul.msk.f32.gmra.mxu1 %vm763_vm6, %v1106_v44 }
 0x2fc   :  { %v1069_v45 = vpop.f32.mrf.mxu0 }
 0x2fd   :  { %v1070_v48 = vadd.f32 %v1605_v6, %v1069_v45 }
 0x2ff   :  { %v1107_v50 = vmax.f32 %v1070_v48, 0.0 }
 0x301   :  { %1487 = vmatmul.msk.f32.gmra.mxu1 %vm763_vm6, %v1107_v50 }
 0x304   :  { %v1072_v54 = vpop.f32.mrf.mxu0 }
 0x305   :  { %v1073_v35 = vadd.f32 %v1605_v6, %v1072_v54 }
 0x307   :  { %v1108_v52 = vmax.f32 %v1073_v35, 0.0 }
 0x309   :  { %1488 = vmatmul.msk.f32.gmra.mxu1 %vm763_vm6, %v1108_v52 }
 0x30c   :  { %v1075_v12 = vpop.f32.mrf.mxu0 }
 0x30d   :  { %v1076_v1 = vadd.f32 %v1605_v6, %v1075_v12 }
 0x30f   :  { %v1109_v51 = vmax.f32 %v1076_v1, 0.0 }
 0x311   :  { %1489 = vmatmul.msk.f32.gmra.mxu1 %vm763_vm6, %v1109_v51 }
 0x314   :  { %v1078_v21 = vpop.f32.mrf.mxu0 }
 0x315   :  { %v1079_v55 = vadd.f32 %v1605_v6, %v1078_v21 }
 0x317   :  { %v1110_v37 = vmax.f32 %v1079_v55, 0.0 }
 0x319   :  { %1490 = vmatmul.msk.f32.gmra.mxu1 %vm763_vm6, %v1110_v37 }
 0x31c   :  { %v1081_v47 = vpop.f32.mrf.mxu0 }
 0x31d   :  { %v1082_v57 = vadd.f32 %v1605_v6, %v1081_v47 }
 0x31f   :  { %v1111_v58 = vmax.f32 %v1082_v57, 0.0 }
 0x321   :  { %1491 = vmatmul.msk.f32.gmra.mxu1 %vm763_vm6, %v1111_v58 }
 0x324   :  { %v1084_v59 = vpop.f32.mrf.mxu0 }
 0x325   :  { %v1085_v40 = vadd.f32 %v1605_v6, %v1084_v59 }
 0x327   :  { %v1112_v60 = vmax.f32 %v1085_v40, 0.0 }
 0x329   :  { %1492 = vmatmul.msk.f32.gmra.mxu1 %vm763_vm6, %v1112_v60 }
 0x32c   :  { %v1087_v61 = vpop.f32.mrf.mxu0 }
 0x32d   :  { %v1088_v62 = vadd.f32 %v1605_v6, %v1087_v61 }
 0x32f   :  { %v1113_v23 = vmax.f32 %v1088_v62, 0.0  ;;  %v1255_v62 = vld [vmem:[%s2419_s13] sm:$0x1] }
 0x331   :  { %1493 = vmatmul.msk.f32.gmra.mxu1 %vm763_vm6, %v1113_v23  ;;  %v744_v23 = vpop.f32.mrf.mxu2 }
 0x334   :  { %v1090_v63 = vpop.f32.mrf.mxu0 }
 0x335   :  { %v1091_v0 = vadd.f32 %v1605_v6, %v1090_v63 }
 0x337   :  { %v1114_v43 = vmax.f32 %v1091_v0, 0.0  ;;  %v834_v0 = vsub.f32 %v744_v23, %v2243_v53 }
 0x339   :  { %1494 = vmatmul.msk.f32.gmra.mxu1 %vm763_vm6, %v1114_v43  ;;  %v857_v63 = vpop.f32.mrf.mxu2  ;;  %v835_v43 = vmul.f32 0.5, %v834_v0 }
 0x33c   :  { %v1093_v2 = vpop.f32.mrf.mxu0 }
 0x33d   :  { %v1094_v3 = vadd.f32 %v1605_v6, %v1093_v2  ;;  %v1327_v2 = vadd.f32 %v857_v63, %v835_v43 }
 0x33f   :  { %v1115_v4 = vmax.f32 %v1094_v3, 0.0 }
 0x341   :  { %1495 = vmatmul.msk.f32.gmra.mxu1 %vm763_vm6, %v1115_v4  ;;  %v1330_v4 = vstv %s2420_s14 }
 0x344   :  { %v1096_v46 = vpop.f32.mrf.mxu0 }
 0x345   :  { %v1097_v26 = vadd.f32 %v1605_v6, %v1096_v46 }
 0x347   :  { %v1116_v5 = vmax.f32 %v1097_v26, 0.0 }
 0x349   :  { %1496 = vmatmul.msk.f32.gmra.mxu1 %vm763_vm6, %v1116_v5 }
 0x34c   :  { %v1099_v7 = vpop.f32.mrf.mxu0 }
 0x34d   :  { %v1100_v8 = vadd.f32 %v1605_v6, %v1099_v7  ;;  %v1606_v6 = vld [vmem:[%s2418_s12] ss:$0 sm:$0xff] }
 0x34f   :  { %v1117_v9 = vmax.f32 %v1100_v8, 0.0 }
 0x351   :  { %1497 = vmatmul.msk.f32.gmra.mxu1 %vm763_vm6, %v1117_v9 }
 0x356   :  { %v1191_v11 = vpop.f32.mrf.mxu1 }
 0x357   :  { %v1192_v40 = vadd.f32 %v1606_v6, %v1191_v11 }
 0x359   :  { %v1239_v61 = vmax.f32 %v1192_v40, 0.0 }
 0x35e   :  { %v1194_v49 = vpop.f32.mrf.mxu1 }
 0x35f   :  { %v1195_v58 = vadd.f32 %v1606_v6, %v1194_v49 }
 0x361   :  { %v1240_v60 = vmax.f32 %v1195_v58, 0.0 }
 0x366   :  { %v1197_v24 = vpop.f32.mrf.mxu1 }
 0x367   :  { %v1198_v47 = vadd.f32 %v1606_v6, %v1197_v24 }
 0x369   :  { %v1241_v59 = vmax.f32 %v1198_v47, 0.0 }
 0x36e   :  { %v1200_v31 = vpop.f32.mrf.mxu1 }
 0x36f   :  { %v1201_v55 = vadd.f32 %v1606_v6, %v1200_v31 }
 0x371   :  { %v1242_v57 = vmax.f32 %v1201_v55, 0.0 }
 0x376   :  { %v1203_v29 = vpop.f32.mrf.mxu1 }
 0x377   :  { %v1204_v51 = vadd.f32 %v1606_v6, %v1203_v29 }
 0x379   :  { %v1243_v37 = vmax.f32 %v1204_v51, 0.0 }
 0x37e   :  { %v1206_v20 = vpop.f32.mrf.mxu1 }
 0x37f   :  { %v1207_v12 = vadd.f32 %v1606_v6, %v1206_v20 }
 0x381   :  { %v1244_v21 = vmax.f32 %v1207_v12, 0.0 }
 0x386   :  { %v1209_v27 = vpop.f32.mrf.mxu1 }
 0x387   :  { %v1210_v35 = vadd.f32 %v1606_v6, %v1209_v27 }
 0x389   :  { %v1245_v1 = vmax.f32 %v1210_v35, 0.0 }
 0x38e   :  { %v1212_v34 = vpop.f32.mrf.mxu1 }
 0x38f   :  { %v1213_v50 = vadd.f32 %v1606_v6, %v1212_v34 }
 0x391   :  { %v1246_v52 = vmax.f32 %v1213_v50, 0.0 }
 0x396   :  { %v1215_v25 = vpop.f32.mrf.mxu1 }
 0x397   :  { %v1216_v45 = vadd.f32 %v1606_v6, %v1215_v25 }
 0x399   :  { %v1247_v54 = vmax.f32 %v1216_v45, 0.0 }
 0x39e   :  { %v1218_v32 = vpop.f32.mrf.mxu1 }
 0x39f   :  { %v1219_v42 = vadd.f32 %v1606_v6, %v1218_v32 }
 0x3a1   :  { %v1248_v48 = vmax.f32 %v1219_v42, 0.0 }
 0x3a6   :  { %v1221_v36 = vpop.f32.mrf.mxu1 }
 0x3a7   :  { %v1222_v41 = vadd.f32 %v1606_v6, %v1221_v36 }
 0x3a9   :  { %v1249_v44 = vmax.f32 %v1222_v41, 0.0 }
 0x3ae   :  { %v1224_v56 = vpop.f32.mrf.mxu1 }
 0x3af   :  { %v1225_v28 = vadd.f32 %v1606_v6, %v1224_v56 }
 0x3b1   :  { %v1250_v19 = vmax.f32 %v1225_v28, 0.0 }
 0x3b6   :  { %v1227_v18 = vpop.f32.mrf.mxu1 }
 0x3b7   :  { %v1228_v14 = vadd.f32 %v1606_v6, %v1227_v18 }
 0x3b9   :  { %v1251_v39 = vmax.f32 %v1228_v14, 0.0 }
 0x3be   :  { %v1230_v38 = vpop.f32.mrf.mxu1 }
 0x3bf   :  { %v1231_v22 = vadd.f32 %v1606_v6, %v1230_v38 }
 0x3c1   :  { %v1252_v33 = vmax.f32 %v1231_v22, 0.0 }
 0x3c6   :  { %v1233_v17 = vpop.f32.mrf.mxu1 }
 0x3c7   :  { %v1234_v10 = vadd.f32 %v1606_v6, %v1233_v17 }
 0x3c9   :  { %v1253_v13 = vmax.f32 %v1234_v10, 0.0 }
 0x3ce   :  { %v1236_v30 = vpop.f32.mrf.mxu1 }
 0x3cf   :  { %v1237_v16 = vadd.f32 %v1606_v6, %v1236_v30 }
 0x3d1   :  { %v1254_v15 = vmax.f32 %v1237_v16, 0.0 }
 0x3d3   :  { %1498 = vmatpush.xpose.msk.msra.mxu2 %vm763_vm6, %v1254_v15 }
 0x3d7   :  { %1499 = vmatpush.xpose.msk.msra.mxu2 %vm763_vm6, %v1253_v13 }
 0x3db   :  { %1500 = vmatpush.xpose.msk.msra.mxu2 %vm763_vm6, %v1252_v33 }
 0x3df   :  { %1501 = vmatpush.xpose.msk.msra.mxu2 %vm763_vm6, %v1251_v39 }
 0x3e3   :  { %1502 = vmatpush.xpose.msk.msra.mxu2 %vm763_vm6, %v1250_v19 }
 0x3e7   :  { %1503 = vmatpush.xpose.msk.msra.mxu2 %vm763_vm6, %v1249_v44 }
 0x3eb   :  { %1504 = vmatpush.xpose.msk.msra.mxu2 %vm763_vm6, %v1248_v48 }
 0x3ef   :  { %1505 = vmatpush.xpose.msk.msra.mxu2 %vm763_vm6, %v1247_v54 }
 0x3f3   :  { %1506 = vmatpush.xpose.msk.msra.mxu2 %vm763_vm6, %v1246_v52 }
 0x3f7   :  { %1507 = vmatpush.xpose.msk.msra.mxu2 %vm763_vm6, %v1245_v1 }
 0x3fb   :  { %1508 = vmatpush.xpose.msk.msra.mxu2 %vm763_vm6, %v1244_v21 }
 0x3ff   :  { %1509 = vmatpush.xpose.msk.msra.mxu2 %vm763_vm6, %v1243_v37 }
 0x403   :  { %1510 = vmatpush.xpose.msk.msra.mxu2 %vm763_vm6, %v1242_v57 }
 0x407   :  { %1511 = vmatpush.xpose.msk.msra.mxu2 %vm763_vm6, %v1241_v59 }
 0x40b   :  { %1512 = vmatpush.xpose.msk.msra.mxu2 %vm763_vm6, %v1240_v60 }
 0x40f   :  { %1513 = vmatpush.xpose.msk.msra.mxu2 %vm763_vm6, %v1239_v61 }
 0x412   :  { %1514 = vmatmul.msk.f32.vlgmr.msra.gmra.mxu2 %vm763_vm6, %v1255_v62 }
 0x495   :  { %v1324_v3 = vpop.f32.mrf.mxu2 }
 0x496   :  { %v1328_v46 = vadd.f32 %v1327_v2, %v1324_v3 }
 0x498   :  { %v1331_v26 = vadd.f32 %v1330_v4, %v1328_v46 }
 0x49a   :  { %1332 = vst [vmem:[#allocation3] sm:$0x1] %v1331_v26 }
 0x49b   :  { %1343 = dma.vmem_to_hbm [thread:$0]  %s1339_s26, 16, %s1341_s2, [#allocation4]  }
 0x49c   :  { %1645 = dma.done.wait [#allocation4], 16  }
 0x49d   :  { %1646 = vsyncadd [#allocation4], 4294967280 }
 0x49e   :  { %1348 = vsyncpa [#allocation4], 1 }

</bundles_post_ra>
